<compile_context>
chip_gen: v6e
topology: v6e:2x2x1
jax: 0.10.0
libtpu: 0.0.40
codegen_flags: <defaults>
</compile_context>

<pallas_src>
import functools

import jax
import jax.numpy as jnp
from jax.experimental import pallas as pl
from jax.experimental.pallas import tpu as pltpu

_INV_SQRT2 = 0.7071067811865476


def _fused_encoder_kernel(*refs, cfg, eps):
    """Full ConvEncoderBENDR forward for one batch element (one grid step).

    refs (in order):
      refs[0]                x_ref     (T0 + 2*pad0, C_in0)   pre-padded, time-major input
      refs[1 : 1+L]          w_refs[l] (K_l, C_in_l, C)       tap-major conv weights (MXU dtype)
      refs[1+L]              pgb_ref   (3L, C)                [bias_0..L-1 | gamma_0..L-1 | beta_0..L-1]
      refs[2+L]              o_ref     (t_final, C)           time-major output
      refs[3+L : 2+2L]       act_refs  (t_in_l + 2*pad_l, C)  zero-padded activation scratch, layers 1..L-1

    cfg: static per-layer tuple (t_in, t_out, k_w, stride, pad).
    """
    n_layers = len(cfg)
    x_ref = refs[0]
    w_refs = refs[1:1 + n_layers]
    pgb_ref = refs[1 + n_layers]
    o_ref = refs[2 + n_layers]
    act_refs = refs[3 + n_layers:]

    C = o_ref.shape[-1]

    # Channel-parity mask: even lane <-> first channel of its GroupNorm pair.
    lane = jax.lax.broadcasted_iota(jnp.int32, (1, C), 1)
    is_even = (lane & 1) == 0

    def pair_pool(v):
        """(1, C) per-channel sums -> per-channel *group* (adjacent-pair) sums."""
        nxt = pltpu.roll(v, C - 1, 1)   # nxt[c] = v[(c + 1) % C]
        prv = pltpu.roll(v, 1, 1)       # prv[c] = v[(c - 1) % C]
        return v + jnp.where(is_even, nxt, prv)

    src = x_ref                                          # padded time-major input of layer 0
    for l, (t_in, t_out, k_w, stride, pad) in enumerate(cfg):
        bias = pgb_ref[pl.ds(l, 1), :]                   # (1, C) f32
        gamma = pgb_ref[pl.ds(n_layers + l, 1), :]
        beta = pgb_ref[pl.ds(2 * n_layers + l, 1), :]

        # ---- Conv1d: K strided sublane tap loads + K accumulated MXU matmuls ----
        y = jnp.zeros((t_out, C), jnp.float32)
        for k in range(k_w):
            wk = w_refs[l][k]                                     # (C_in, C) compute dtype
            xk = src[pl.ds(k, t_out, stride=stride), :]           # (t_out, C_in) strided load
            y = y + jnp.dot(xk.astype(wk.dtype), wk,
                            preferred_element_type=jnp.float32)
        y = y + bias

        # ---- GroupNorm: 2 channels / group, biased variance (torch semantics) ----
        inv_n = 1.0 / (2.0 * t_out)
        mean = pair_pool(jnp.sum(y, axis=0, keepdims=True)) * inv_n       # (1, C)
        d = y - mean
        var = pair_pool(jnp.sum(d * d, axis=0, keepdims=True)) * inv_n    # (1, C)
        yn = d * jax.lax.rsqrt(var + eps) * gamma + beta

        # ---- exact GELU (erf form, torch.nn.GELU default) ----
        h = 0.5 * yn * (1.0 + jax.lax.erf(yn * _INV_SQRT2))

        if l + 1 < n_layers:
            # Stage into the next layer's zero-padded, time-major scratch buffer.
            nxt_ref = act_refs[l]
            nxt_pad = cfg[l + 1][4]
            if nxt_pad > 0:
                zpad = jnp.zeros((nxt_pad, C), jnp.float32)
                nxt_ref[pl.ds(0, nxt_pad), :] = zpad
                nxt_ref[pl.ds(nxt_pad + t_out, nxt_pad), :] = zpad
            nxt_ref[pl.ds(nxt_pad, t_out), :] = h
            src = nxt_ref
        else:
            o_ref[...] = h.astype(o_ref.dtype)


def _const_index_map(rank):
    return lambda b: (0,) * rank


def conv_encoder_bendr_forward(x, params, enc_width, enc_downsample, *,
                               eps=1e-5, compute_dtype=jnp.bfloat16):
    """x: (B, in_features, T) -> (B, encoder_h, T_final), fully fused Pallas forward.

    params[l] = (w (C, C_in, K), bias (C,), gamma (C,), beta (C,)) with torch layouts.
    Dropout1d(p=0.0) is the identity and projection_head=False (module defaults).
    """
    B, c_in0, T = x.shape
    L = len(params)
    C = params[0][0].shape[0]                 # encoder_h

    # Static per-layer geometry: (t_in, t_out, kernel, stride, pad).
    cfg = []
    t_in = T
    for (w, _, _, _), k_w, s in zip(params, enc_width, enc_downsample):
        assert w.shape[-1] == k_w
        pad = k_w // 2
        t_out = (t_in + 2 * pad - k_w) // s + 1
        cfg.append((t_in, t_out, k_w, s, pad))
        t_in = t_out
    t_final = t_in
    pad0 = cfg[0][4]

    # Time-major (lane = C) input, pre-padded once for the first conv's zero padding.
    x_tm = jnp.pad(jnp.transpose(x, (0, 2, 1)).astype(jnp.float32),
                   ((0, 0), (pad0, pad0), (0, 0)))

    # Tap-major conv weights (K, C_in, C) in the MXU compute dtype (bf16 by default).
    w_packed = [jnp.transpose(p[0], (2, 1, 0)).astype(compute_dtype) for p in params]

    # bias / gamma / beta packed as a single (3L, C) table (lane dim = C).
    pgb = jnp.concatenate(
        [jnp.stack([p[1] for p in params]),
         jnp.stack([p[2] for p in params]),
         jnp.stack([p[3] for p in params])], axis=0).astype(jnp.float32)

    kern = functools.partial(_fused_encoder_kernel, cfg=tuple(cfg), eps=float(eps))

    in_specs = [pl.BlockSpec((None, T + 2 * pad0, c_in0), lambda b: (b, 0, 0))]
    in_specs += [pl.BlockSpec(w.shape, _const_index_map(w.ndim)) for w in w_packed]
    in_specs += [pl.BlockSpec(pgb.shape, _const_index_map(pgb.ndim))]

    # Zero-padded, time-major activation staging buffers for layers 1..L-1.
    scratch_shapes = [pltpu.VMEM((ti + 2 * p, C), jnp.float32)
                      for (ti, _, _, _, p) in cfg[1:]]

    out_tm = pl.pallas_call(
        kern,
        out_shape=jax.ShapeDtypeStruct((B, t_final, C), jnp.float32),
        grid_spec=pltpu.PrefetchScalarGridSpec(
            num_scalar_prefetch=0,
            grid=(B,),
            in_specs=in_specs,
            out_specs=pl.BlockSpec((None, t_final, C), lambda b: (b, 0, 0)),
            scratch_shapes=scratch_shapes,
        ),
        compiler_params=pltpu.CompilerParams(
            dimension_semantics=("parallel",),  # independent batch -> megacore on v7x
        ),
    )(x_tm, *w_packed, pgb)

    # Back to the module's channel-major (B, C, T_final) output layout.
    return jnp.transpose(out_tm, (0, 2, 1))


def init_params(key, in_features, encoder_h, enc_width, enc_downsample):
    """Deterministic parameters mirroring the module's layer shapes (torch layouts)."""
    enc_width = tuple(e if e % 2 else e + 1 for e in enc_width)   # (3,2,...) -> (3,3,...)
    params = []
    c_in = in_features
    for k_w, _ in zip(enc_width, enc_downsample):
        key, k1, k2, k3, k4 = jax.random.split(key, 5)
        fan_in = c_in * k_w
        w = jax.random.normal(k1, (encoder_h, c_in, k_w), jnp.float32) / jnp.sqrt(
            jnp.float32(fan_in))
        bound = 1.0 / float(fan_in) ** 0.5
        b = jax.random.uniform(k2, (encoder_h,), jnp.float32, -bound, bound)
        gamma = jax.random.uniform(k3, (encoder_h,), jnp.float32, 0.5, 1.5)
        beta = 0.1 * jax.random.normal(k4, (encoder_h,), jnp.float32)
        params.append((w, b, gamma, beta))
        c_in = encoder_h
    return params, enc_width


def reference_forward(x, params, enc_width, enc_downsample, eps=1e-5):
    """Pure-JAX reference with PyTorch semantics (f32, HIGHEST matmul precision)."""
    for (w, b, g, be), k_w, s in zip(params, enc_width, enc_downsample):
        y = jax.lax.conv_general_dilated(
            x, w, (s,), [(k_w // 2, k_w // 2)],
            dimension_numbers=('NCH', 'OIH', 'NCH'),
            precision=jax.lax.Precision.HIGHEST)
        y = y + b[None, :, None]
        B, C, T = y.shape
        yr = y.reshape(B, C // 2, 2 * T)
        mean = yr.mean(axis=2, keepdims=True)
        var = ((yr - mean) ** 2).mean(axis=2, keepdims=True)
        yn = ((yr - mean) / jnp.sqrt(var + eps)).reshape(B, C, T)
        y = yn * g[None, :, None] + be[None, :, None]
        x = jax.nn.gelu(y, approximate=False)
    return x


if __name__ == "__main__":
    # Small demo shapes consistent with the module's forward: input (B, in_features, T).
    # encoder_h = 128 keeps the channel (lane) dim fully dense while staying small.
    B, in_features, T = 2, 4, 384
    encoder_h = 128
    enc_width = (3, 2, 2, 2, 2, 2)
    enc_downsample = (3, 2, 2, 2, 2, 2)

    key = jax.random.PRNGKey(0)
    kx, kp = jax.random.split(key)
    x = jax.random.normal(kx, (B, in_features, T), jnp.float32)
    params, widths = init_params(kp, in_features, encoder_h, enc_width, enc_downsample)

    out = conv_encoder_bendr_forward(x, params, widths, enc_downsample)
    out = jax.block_until_ready(out)

    ref = reference_forward(x, params, widths, enc_downsample)
    assert out.shape == ref.shape, (out.shape, ref.shape)

    # bf16 MXU operands (f32 accumulation) vs. a full-f32 reference -> ~1% drift budget.
    max_abs = float(jnp.max(jnp.abs(out - ref)))
    rel_l2 = float(jnp.linalg.norm(out - ref) / jnp.linalg.norm(ref))
    assert rel_l2 < 5e-2 and max_abs < 0.25, (rel_l2, max_abs)

    print("KERNEL_OK")
</pallas_src>

<mosaic_0001>
module attributes {stable_mosaic.version = 11 : i64} {
  func.func @_fused_encoder_kernel(%arg0: i32, %arg1: memref<1x386x4xf32, #tpu.memory_space<vmem>>, %arg2: memref<3x4x128xbf16, #tpu.memory_space<vmem>>, %arg3: memref<3x128x128xbf16, #tpu.memory_space<vmem>>, %arg4: memref<3x128x128xbf16, #tpu.memory_space<vmem>>, %arg5: memref<3x128x128xbf16, #tpu.memory_space<vmem>>, %arg6: memref<3x128x128xbf16, #tpu.memory_space<vmem>>, %arg7: memref<3x128x128xbf16, #tpu.memory_space<vmem>>, %arg8: memref<18x128xf32, #tpu.memory_space<vmem>>, %arg9: memref<1x4x128xf32, #tpu.memory_space<vmem>>, %arg10: memref<130x128xf32, #tpu.memory_space<vmem>>, %arg11: memref<66x128xf32, #tpu.memory_space<vmem>>, %arg12: memref<34x128xf32, #tpu.memory_space<vmem>>, %arg13: memref<18x128xf32, #tpu.memory_space<vmem>>, %arg14: memref<10x128xf32, #tpu.memory_space<vmem>>) attributes {dimension_semantics = [#tpu.dimension_semantics<parallel>], iteration_bounds = array<i64: 2>, scalar_prefetch = 0 : i64, scratch_operands = 5 : i64, tpu.core_type = #tpu.core_type<tc>, window_params = [{transform_indices = @transform_0, window_bounds = array<i64: 1, 386, 4>}, {pipeline_mode = #tpu.pipeline_mode<synchronous>, transform_indices = @transform_1, window_bounds = array<i64: 3, 4, 128>}, {pipeline_mode = #tpu.pipeline_mode<synchronous>, transform_indices = @transform_2, window_bounds = array<i64: 3, 128, 128>}, {pipeline_mode = #tpu.pipeline_mode<synchronous>, transform_indices = @transform_3, window_bounds = array<i64: 3, 128, 128>}, {pipeline_mode = #tpu.pipeline_mode<synchronous>, transform_indices = @transform_4, window_bounds = array<i64: 3, 128, 128>}, {pipeline_mode = #tpu.pipeline_mode<synchronous>, transform_indices = @transform_5, window_bounds = array<i64: 3, 128, 128>}, {pipeline_mode = #tpu.pipeline_mode<synchronous>, transform_indices = @transform_6, window_bounds = array<i64: 3, 128, 128>}, {pipeline_mode = #tpu.pipeline_mode<synchronous>, transform_indices = @transform_7, window_bounds = array<i64: 18, 128>}, {transform_indices = @transform_8, window_bounds = array<i64: 1, 4, 128>}]} {
    %0 = tpu.iota {dimensions = array<i32: 1>} : vector<1x128xi32>
    %c1_i32 = arith.constant 1 : i32
    %1 = vector.broadcast %c1_i32 : i32 to vector<1x128xi32>
    %2 = arith.andi %0, %1 : vector<1x128xi32>
    %c0_i32 = arith.constant 0 : i32
    %3 = vector.broadcast %c0_i32 : i32 to vector<1x128xi32>
    %4 = arith.cmpi eq, %2, %3 : vector<1x128xi32>
    %c0 = arith.constant 0 : index
    %c0_0 = arith.constant 0 : index
    %5 = vector.load %arg8[%c0, %c0_0] : memref<18x128xf32, #tpu.memory_space<vmem>>, vector<1x128xf32>
    %c6 = arith.constant 6 : index
    %c0_1 = arith.constant 0 : index
    %6 = vector.load %arg8[%c6, %c0_1] : memref<18x128xf32, #tpu.memory_space<vmem>>, vector<1x128xf32>
    %c12 = arith.constant 12 : index
    %c0_2 = arith.constant 0 : index
    %7 = vector.load %arg8[%c12, %c0_2] : memref<18x128xf32, #tpu.memory_space<vmem>>, vector<1x128xf32>
    %cst = arith.constant 0.000000e+00 : f32
    %8 = vector.broadcast %cst : f32 to vector<128x128xf32>
    %c0_3 = arith.constant 0 : index
    %c0_4 = arith.constant 0 : index
    %c0_5 = arith.constant 0 : index
    %9 = vector.load %arg2[%c0_3, %c0_4, %c0_5] : memref<3x4x128xbf16, #tpu.memory_space<vmem>>, vector<1x4x128xbf16>
    %10 = vector.shape_cast %9 : vector<1x4x128xbf16> to vector<4x128xbf16>
    %c0_6 = arith.constant 0 : index
    %c0_7 = arith.constant 0 : index
    %c0_8 = arith.constant 0 : index
    %11 = tpu.strided_load %arg1[%c0_6, %c0_7, %c0_8] {strides = array<i32: 1, 3, 1>} : memref<1x386x4xf32, #tpu.memory_space<vmem>>, vector<1x128x4xf32>
    %12 = vector.shape_cast %11 : vector<1x128x4xf32> to vector<128x4xf32>
    %13 = arith.truncf %12 : vector<128x4xf32> to vector<128x4xbf16>
    %cst_9 = arith.constant dense<0.000000e+00> : vector<128x128xf32>
    %14 = tpu.matmul %13, %10, %cst_9 {dimension_numbers = #tpu.dot_dimension_numbers<[1], [0], [0], [1], [0, 0, 1, 1], [], []>} : vector<128x4xbf16>, vector<4x128xbf16>, vector<128x128xf32> -> vector<128x128xf32>
    %15 = arith.addf %8, %14 : vector<128x128xf32>
    %c1 = arith.constant 1 : index
    %c0_10 = arith.constant 0 : index
    %c0_11 = arith.constant 0 : index
    %16 = vector.load %arg2[%c1, %c0_10, %c0_11] : memref<3x4x128xbf16, #tpu.memory_space<vmem>>, vector<1x4x128xbf16>
    %17 = vector.shape_cast %16 : vector<1x4x128xbf16> to vector<4x128xbf16>
    %c0_12 = arith.constant 0 : index
    %c1_13 = arith.constant 1 : index
    %c0_14 = arith.constant 0 : index
    %18 = tpu.strided_load %arg1[%c0_12, %c1_13, %c0_14] {strides = array<i32: 1, 3, 1>} : memref<1x386x4xf32, #tpu.memory_space<vmem>>, vector<1x128x4xf32>
    %19 = vector.shape_cast %18 : vector<1x128x4xf32> to vector<128x4xf32>
    %20 = arith.truncf %19 : vector<128x4xf32> to vector<128x4xbf16>
    %cst_15 = arith.constant dense<0.000000e+00> : vector<128x128xf32>
    %21 = tpu.matmul %20, %17, %cst_15 {dimension_numbers = #tpu.dot_dimension_numbers<[1], [0], [0], [1], [0, 0, 1, 1], [], []>} : vector<128x4xbf16>, vector<4x128xbf16>, vector<128x128xf32> -> vector<128x128xf32>
    %22 = arith.addf %15, %21 : vector<128x128xf32>
    %c2 = arith.constant 2 : index
    %c0_16 = arith.constant 0 : index
    %c0_17 = arith.constant 0 : index
    %23 = vector.load %arg2[%c2, %c0_16, %c0_17] : memref<3x4x128xbf16, #tpu.memory_space<vmem>>, vector<1x4x128xbf16>
    %24 = vector.shape_cast %23 : vector<1x4x128xbf16> to vector<4x128xbf16>
    %c0_18 = arith.constant 0 : index
    %c2_19 = arith.constant 2 : index
    %c0_20 = arith.constant 0 : index
    %25 = tpu.strided_load %arg1[%c0_18, %c2_19, %c0_20] {strides = array<i32: 1, 3, 1>} : memref<1x386x4xf32, #tpu.memory_space<vmem>>, vector<1x128x4xf32>
    %26 = vector.shape_cast %25 : vector<1x128x4xf32> to vector<128x4xf32>
    %27 = arith.truncf %26 : vector<128x4xf32> to vector<128x4xbf16>
    %cst_21 = arith.constant dense<0.000000e+00> : vector<128x128xf32>
    %28 = tpu.matmul %27, %24, %cst_21 {dimension_numbers = #tpu.dot_dimension_numbers<[1], [0], [0], [1], [0, 0, 1, 1], [], []>} : vector<128x4xbf16>, vector<4x128xbf16>, vector<128x128xf32> -> vector<128x128xf32>
    %29 = arith.addf %22, %28 : vector<128x128xf32>
    %30 = vector.broadcast %5 : vector<1x128xf32> to vector<128x128xf32>
    %31 = arith.addf %29, %30 : vector<128x128xf32>
    %cst_22 = arith.constant dense<0.000000e+00> : vector<128xf32>
    %32 = vector.multi_reduction <add>, %31, %cst_22 [0] : vector<128x128xf32> to vector<128xf32>
    %33 = vector.shape_cast %32 : vector<128xf32> to vector<1x128xf32>
    %c127_i32 = arith.constant 127 : i32
    %34 = tpu.dynamic_rotate %33 by %c127_i32 dim 1 : vector<1x128xf32>, i32 -> vector<1x128xf32>
    %c1_i32_23 = arith.constant 1 : i32
    %35 = tpu.dynamic_rotate %33 by %c1_i32_23 dim 1 : vector<1x128xf32>, i32 -> vector<1x128xf32>
    %36 = arith.select %4, %34, %35 : vector<1x128xi1>, vector<1x128xf32>
    %37 = arith.addf %33, %36 : vector<1x128xf32>
    %cst_24 = arith.constant 3.906250e-03 : f32
    %38 = vector.broadcast %cst_24 : f32 to vector<1x128xf32>
    %39 = arith.mulf %37, %38 : vector<1x128xf32>
    %40 = vector.broadcast %39 : vector<1x128xf32> to vector<128x128xf32>
    %41 = arith.subf %31, %40 : vector<128x128xf32>
    %42 = arith.mulf %41, %41 : vector<128x128xf32>
    %cst_25 = arith.constant dense<0.000000e+00> : vector<128xf32>
    %43 = vector.multi_reduction <add>, %42, %cst_25 [0] : vector<128x128xf32> to vector<128xf32>
    %44 = vector.shape_cast %43 : vector<128xf32> to vector<1x128xf32>
    %c127_i32_26 = arith.constant 127 : i32
    %45 = tpu.dynamic_rotate %44 by %c127_i32_26 dim 1 : vector<1x128xf32>, i32 -> vector<1x128xf32>
    %c1_i32_27 = arith.constant 1 : i32
    %46 = tpu.dynamic_rotate %44 by %c1_i32_27 dim 1 : vector<1x128xf32>, i32 -> vector<1x128xf32>
    %47 = arith.select %4, %45, %46 : vector<1x128xi1>, vector<1x128xf32>
    %48 = arith.addf %44, %47 : vector<1x128xf32>
    %cst_28 = arith.constant 3.906250e-03 : f32
    %49 = vector.broadcast %cst_28 : f32 to vector<1x128xf32>
    %50 = arith.mulf %48, %49 : vector<1x128xf32>
    %cst_29 = arith.constant 9.99999974E-6 : f32
    %51 = vector.broadcast %cst_29 : f32 to vector<1x128xf32>
    %52 = arith.addf %50, %51 : vector<1x128xf32>
    %53 = math.rsqrt %52 : vector<1x128xf32>
    %54 = vector.broadcast %53 : vector<1x128xf32> to vector<128x128xf32>
    %55 = arith.mulf %41, %54 : vector<128x128xf32>
    %56 = vector.broadcast %6 : vector<1x128xf32> to vector<128x128xf32>
    %57 = arith.mulf %55, %56 : vector<128x128xf32>
    %58 = vector.broadcast %7 : vector<1x128xf32> to vector<128x128xf32>
    %59 = arith.addf %57, %58 : vector<128x128xf32>
    %cst_30 = arith.constant 5.000000e-01 : f32
    %60 = vector.broadcast %cst_30 : f32 to vector<128x128xf32>
    %61 = arith.mulf %60, %59 : vector<128x128xf32>
    %cst_31 = arith.constant 0.707106769 : f32
    %62 = vector.broadcast %cst_31 : f32 to vector<128x128xf32>
    %63 = arith.mulf %59, %62 : vector<128x128xf32>
    %64 = math.erf %63 : vector<128x128xf32>
    %cst_32 = arith.constant 1.000000e+00 : f32
    %65 = vector.broadcast %cst_32 : f32 to vector<128x128xf32>
    %66 = arith.addf %65, %64 : vector<128x128xf32>
    %67 = arith.mulf %61, %66 : vector<128x128xf32>
    %cst_33 = arith.constant 0.000000e+00 : f32
    %68 = vector.broadcast %cst_33 : f32 to vector<1x128xf32>
    %c0_34 = arith.constant 0 : index
    %c0_35 = arith.constant 0 : index
    %69 = vector.load %arg10[%c0_34, %c0_35] : memref<130x128xf32, #tpu.memory_space<vmem>>, vector<1x128xf32>
    tpu.vector_store %arg10[%c0_34, %c0_35], %68 {strides = array<i32>} : memref<130x128xf32, #tpu.memory_space<vmem>>, vector<1x128xf32>,
    %c129 = arith.constant 129 : index
    %c0_36 = arith.constant 0 : index
    %70 = vector.load %arg10[%c129, %c0_36] : memref<130x128xf32, #tpu.memory_space<vmem>>, vector<1x128xf32>
    tpu.vector_store %arg10[%c129, %c0_36], %68 {strides = array<i32>} : memref<130x128xf32, #tpu.memory_space<vmem>>, vector<1x128xf32>,
    %c1_37 = arith.constant 1 : index
    %c0_38 = arith.constant 0 : index
    %71 = vector.load %arg10[%c1_37, %c0_38] : memref<130x128xf32, #tpu.memory_space<vmem>>, vector<128x128xf32>
    tpu.vector_store %arg10[%c1_37, %c0_38], %67 {strides = array<i32>} : memref<130x128xf32, #tpu.memory_space<vmem>>, vector<128x128xf32>,
    %c1_39 = arith.constant 1 : index
    %c0_40 = arith.constant 0 : index
    %72 = vector.load %arg8[%c1_39, %c0_40] : memref<18x128xf32, #tpu.memory_space<vmem>>, vector<1x128xf32>
    %c7 = arith.constant 7 : index
    %c0_41 = arith.constant 0 : index
    %73 = vector.load %arg8[%c7, %c0_41] : memref<18x128xf32, #tpu.memory_space<vmem>>, vector<1x128xf32>
    %c13 = arith.constant 13 : index
    %c0_42 = arith.constant 0 : index
    %74 = vector.load %arg8[%c13, %c0_42] : memref<18x128xf32, #tpu.memory_space<vmem>>, vector<1x128xf32>
    %cst_43 = arith.constant 0.000000e+00 : f32
    %75 = vector.broadcast %cst_43 : f32 to vector<64x128xf32>
    %c0_44 = arith.constant 0 : index
    %c0_45 = arith.constant 0 : index
    %c0_46 = arith.constant 0 : index
    %76 = vector.load %arg3[%c0_44, %c0_45, %c0_46] : memref<3x128x128xbf16, #tpu.memory_space<vmem>>, vector<1x128x128xbf16>
    %77 = vector.shape_cast %76 : vector<1x128x128xbf16> to vector<128x128xbf16>
    %c0_47 = arith.constant 0 : index
    %c0_48 = arith.constant 0 : index
    %78 = tpu.strided_load %arg10[%c0_47, %c0_48] {strides = array<i32: 2, 1>} : memref<130x128xf32, #tpu.memory_space<vmem>>, vector<64x128xf32>
    %79 = arith.truncf %78 : vector<64x128xf32> to vector<64x128xbf16>
    %cst_49 = arith.constant dense<0.000000e+00> : vector<64x128xf32>
    %80 = tpu.matmul %79, %77, %cst_49 {dimension_numbers = #tpu.dot_dimension_numbers<[1], [0], [0], [1], [0, 0, 1, 1], [], []>} : vector<64x128xbf16>, vector<128x128xbf16>, vector<64x128xf32> -> vector<64x128xf32>
    %81 = arith.addf %75, %80 : vector<64x128xf32>
    %c1_50 = arith.constant 1 : index
    %c0_51 = arith.constant 0 : index
    %c0_52 = arith.constant 0 : index
    %82 = vector.load %arg3[%c1_50, %c0_51, %c0_52] : memref<3x128x128xbf16, #tpu.memory_space<vmem>>, vector<1x128x128xbf16>
    %83 = vector.shape_cast %82 : vector<1x128x128xbf16> to vector<128x128xbf16>
    %c1_53 = arith.constant 1 : index
    %c0_54 = arith.constant 0 : index
    %84 = tpu.strided_load %arg10[%c1_53, %c0_54] {strides = array<i32: 2, 1>} : memref<130x128xf32, #tpu.memory_space<vmem>>, vector<64x128xf32>
    %85 = arith.truncf %84 : vector<64x128xf32> to vector<64x128xbf16>
    %cst_55 = arith.constant dense<0.000000e+00> : vector<64x128xf32>
    %86 = tpu.matmul %85, %83, %cst_55 {dimension_numbers = #tpu.dot_dimension_numbers<[1], [0], [0], [1], [0, 0, 1, 1], [], []>} : vector<64x128xbf16>, vector<128x128xbf16>, vector<64x128xf32> -> vector<64x128xf32>
    %87 = arith.addf %81, %86 : vector<64x128xf32>
    %c2_56 = arith.constant 2 : index
    %c0_57 = arith.constant 0 : index
    %c0_58 = arith.constant 0 : index
    %88 = vector.load %arg3[%c2_56, %c0_57, %c0_58] : memref<3x128x128xbf16, #tpu.memory_space<vmem>>, vector<1x128x128xbf16>
    %89 = vector.shape_cast %88 : vector<1x128x128xbf16> to vector<128x128xbf16>
    %c2_59 = arith.constant 2 : index
    %c0_60 = arith.constant 0 : index
    %90 = tpu.strided_load %arg10[%c2_59, %c0_60] {strides = array<i32: 2, 1>} : memref<130x128xf32, #tpu.memory_space<vmem>>, vector<64x128xf32>
    %91 = arith.truncf %90 : vector<64x128xf32> to vector<64x128xbf16>
    %cst_61 = arith.constant dense<0.000000e+00> : vector<64x128xf32>
    %92 = tpu.matmul %91, %89, %cst_61 {dimension_numbers = #tpu.dot_dimension_numbers<[1], [0], [0], [1], [0, 0, 1, 1], [], []>} : vector<64x128xbf16>, vector<128x128xbf16>, vector<64x128xf32> -> vector<64x128xf32>
    %93 = arith.addf %87, %92 : vector<64x128xf32>
    %94 = vector.broadcast %72 : vector<1x128xf32> to vector<64x128xf32>
    %95 = arith.addf %93, %94 : vector<64x128xf32>
    %cst_62 = arith.constant dense<0.000000e+00> : vector<128xf32>
    %96 = vector.multi_reduction <add>, %95, %cst_62 [0] : vector<64x128xf32> to vector<128xf32>
    %97 = vector.shape_cast %96 : vector<128xf32> to vector<1x128xf32>
    %c127_i32_63 = arith.constant 127 : i32
    %98 = tpu.dynamic_rotate %97 by %c127_i32_63 dim 1 : vector<1x128xf32>, i32 -> vector<1x128xf32>
    %c1_i32_64 = arith.constant 1 : i32
    %99 = tpu.dynamic_rotate %97 by %c1_i32_64 dim 1 : vector<1x128xf32>, i32 -> vector<1x128xf32>
    %100 = arith.select %4, %98, %99 : vector<1x128xi1>, vector<1x128xf32>
    %101 = arith.addf %97, %100 : vector<1x128xf32>
    %cst_65 = arith.constant 7.812500e-03 : f32
    %102 = vector.broadcast %cst_65 : f32 to vector<1x128xf32>
    %103 = arith.mulf %101, %102 : vector<1x128xf32>
    %104 = vector.broadcast %103 : vector<1x128xf32> to vector<64x128xf32>
    %105 = arith.subf %95, %104 : vector<64x128xf32>
    %106 = arith.mulf %105, %105 : vector<64x128xf32>
    %cst_66 = arith.constant dense<0.000000e+00> : vector<128xf32>
    %107 = vector.multi_reduction <add>, %106, %cst_66 [0] : vector<64x128xf32> to vector<128xf32>
    %108 = vector.shape_cast %107 : vector<128xf32> to vector<1x128xf32>
    %c127_i32_67 = arith.constant 127 : i32
    %109 = tpu.dynamic_rotate %108 by %c127_i32_67 dim 1 : vector<1x128xf32>, i32 -> vector<1x128xf32>
    %c1_i32_68 = arith.constant 1 : i32
    %110 = tpu.dynamic_rotate %108 by %c1_i32_68 dim 1 : vector<1x128xf32>, i32 -> vector<1x128xf32>
    %111 = arith.select %4, %109, %110 : vector<1x128xi1>, vector<1x128xf32>
    %112 = arith.addf %108, %111 : vector<1x128xf32>
    %cst_69 = arith.constant 7.812500e-03 : f32
    %113 = vector.broadcast %cst_69 : f32 to vector<1x128xf32>
    %114 = arith.mulf %112, %113 : vector<1x128xf32>
    %cst_70 = arith.constant 9.99999974E-6 : f32
    %115 = vector.broadcast %cst_70 : f32 to vector<1x128xf32>
    %116 = arith.addf %114, %115 : vector<1x128xf32>
    %117 = math.rsqrt %116 : vector<1x128xf32>
    %118 = vector.broadcast %117 : vector<1x128xf32> to vector<64x128xf32>
    %119 = arith.mulf %105, %118 : vector<64x128xf32>
    %120 = vector.broadcast %73 : vector<1x128xf32> to vector<64x128xf32>
    %121 = arith.mulf %119, %120 : vector<64x128xf32>
    %122 = vector.broadcast %74 : vector<1x128xf32> to vector<64x128xf32>
    %123 = arith.addf %121, %122 : vector<64x128xf32>
    %cst_71 = arith.constant 5.000000e-01 : f32
    %124 = vector.broadcast %cst_71 : f32 to vector<64x128xf32>
    %125 = arith.mulf %124, %123 : vector<64x128xf32>
    %cst_72 = arith.constant 0.707106769 : f32
    %126 = vector.broadcast %cst_72 : f32 to vector<64x128xf32>
    %127 = arith.mulf %123, %126 : vector<64x128xf32>
    %128 = math.erf %127 : vector<64x128xf32>
    %cst_73 = arith.constant 1.000000e+00 : f32
    %129 = vector.broadcast %cst_73 : f32 to vector<64x128xf32>
    %130 = arith.addf %129, %128 : vector<64x128xf32>
    %131 = arith.mulf %125, %130 : vector<64x128xf32>
    %cst_74 = arith.constant 0.000000e+00 : f32
    %132 = vector.broadcast %cst_74 : f32 to vector<1x128xf32>
    %c0_75 = arith.constant 0 : index
    %c0_76 = arith.constant 0 : index
    %133 = vector.load %arg11[%c0_75, %c0_76] : memref<66x128xf32, #tpu.memory_space<vmem>>, vector<1x128xf32>
    tpu.vector_store %arg11[%c0_75, %c0_76], %132 {strides = array<i32>} : memref<66x128xf32, #tpu.memory_space<vmem>>, vector<1x128xf32>,
    %c65 = arith.constant 65 : index
    %c0_77 = arith.constant 0 : index
    %134 = vector.load %arg11[%c65, %c0_77] : memref<66x128xf32, #tpu.memory_space<vmem>>, vector<1x128xf32>
    tpu.vector_store %arg11[%c65, %c0_77], %132 {strides = array<i32>} : memref<66x128xf32, #tpu.memory_space<vmem>>, vector<1x128xf32>,
    %c1_78 = arith.constant 1 : index
    %c0_79 = arith.constant 0 : index
    %135 = vector.load %arg11[%c1_78, %c0_79] : memref<66x128xf32, #tpu.memory_space<vmem>>, vector<64x128xf32>
    tpu.vector_store %arg11[%c1_78, %c0_79], %131 {strides = array<i32>} : memref<66x128xf32, #tpu.memory_space<vmem>>, vector<64x128xf32>,
    %c2_80 = arith.constant 2 : index
    %c0_81 = arith.constant 0 : index
    %136 = vector.load %arg8[%c2_80, %c0_81] : memref<18x128xf32, #tpu.memory_space<vmem>>, vector<1x128xf32>
    %c8 = arith.constant 8 : index
    %c0_82 = arith.constant 0 : index
    %137 = vector.load %arg8[%c8, %c0_82] : memref<18x128xf32, #tpu.memory_space<vmem>>, vector<1x128xf32>
    %c14 = arith.constant 14 : index
    %c0_83 = arith.constant 0 : index
    %138 = vector.load %arg8[%c14, %c0_83] : memref<18x128xf32, #tpu.memory_space<vmem>>, vector<1x128xf32>
    %cst_84 = arith.constant 0.000000e+00 : f32
    %139 = vector.broadcast %cst_84 : f32 to vector<32x128xf32>
    %c0_85 = arith.constant 0 : index
    %c0_86 = arith.constant 0 : index
    %c0_87 = arith.constant 0 : index
    %140 = vector.load %arg4[%c0_85, %c0_86, %c0_87] : memref<3x128x128xbf16, #tpu.memory_space<vmem>>, vector<1x128x128xbf16>
    %141 = vector.shape_cast %140 : vector<1x128x128xbf16> to vector<128x128xbf16>
    %c0_88 = arith.constant 0 : index
    %c0_89 = arith.constant 0 : index
    %142 = tpu.strided_load %arg11[%c0_88, %c0_89] {strides = array<i32: 2, 1>} : memref<66x128xf32, #tpu.memory_space<vmem>>, vector<32x128xf32>
    %143 = arith.truncf %142 : vector<32x128xf32> to vector<32x128xbf16>
    %cst_90 = arith.constant dense<0.000000e+00> : vector<32x128xf32>
    %144 = tpu.matmul %143, %141, %cst_90 {dimension_numbers = #tpu.dot_dimension_numbers<[1], [0], [0], [1], [0, 0, 1, 1], [], []>} : vector<32x128xbf16>, vector<128x128xbf16>, vector<32x128xf32> -> vector<32x128xf32>
    %145 = arith.addf %139, %144 : vector<32x128xf32>
    %c1_91 = arith.constant 1 : index
    %c0_92 = arith.constant 0 : index
    %c0_93 = arith.constant 0 : index
    %146 = vector.load %arg4[%c1_91, %c0_92, %c0_93] : memref<3x128x128xbf16, #tpu.memory_space<vmem>>, vector<1x128x128xbf16>
    %147 = vector.shape_cast %146 : vector<1x128x128xbf16> to vector<128x128xbf16>
    %c1_94 = arith.constant 1 : index
    %c0_95 = arith.constant 0 : index
    %148 = tpu.strided_load %arg11[%c1_94, %c0_95] {strides = array<i32: 2, 1>} : memref<66x128xf32, #tpu.memory_space<vmem>>, vector<32x128xf32>
    %149 = arith.truncf %148 : vector<32x128xf32> to vector<32x128xbf16>
    %cst_96 = arith.constant dense<0.000000e+00> : vector<32x128xf32>
    %150 = tpu.matmul %149, %147, %cst_96 {dimension_numbers = #tpu.dot_dimension_numbers<[1], [0], [0], [1], [0, 0, 1, 1], [], []>} : vector<32x128xbf16>, vector<128x128xbf16>, vector<32x128xf32> -> vector<32x128xf32>
    %151 = arith.addf %145, %150 : vector<32x128xf32>
    %c2_97 = arith.constant 2 : index
    %c0_98 = arith.constant 0 : index
    %c0_99 = arith.constant 0 : index
    %152 = vector.load %arg4[%c2_97, %c0_98, %c0_99] : memref<3x128x128xbf16, #tpu.memory_space<vmem>>, vector<1x128x128xbf16>
    %153 = vector.shape_cast %152 : vector<1x128x128xbf16> to vector<128x128xbf16>
    %c2_100 = arith.constant 2 : index
    %c0_101 = arith.constant 0 : index
    %154 = tpu.strided_load %arg11[%c2_100, %c0_101] {strides = array<i32: 2, 1>} : memref<66x128xf32, #tpu.memory_space<vmem>>, vector<32x128xf32>
    %155 = arith.truncf %154 : vector<32x128xf32> to vector<32x128xbf16>
    %cst_102 = arith.constant dense<0.000000e+00> : vector<32x128xf32>
    %156 = tpu.matmul %155, %153, %cst_102 {dimension_numbers = #tpu.dot_dimension_numbers<[1], [0], [0], [1], [0, 0, 1, 1], [], []>} : vector<32x128xbf16>, vector<128x128xbf16>, vector<32x128xf32> -> vector<32x128xf32>
    %157 = arith.addf %151, %156 : vector<32x128xf32>
    %158 = vector.broadcast %136 : vector<1x128xf32> to vector<32x128xf32>
    %159 = arith.addf %157, %158 : vector<32x128xf32>
    %cst_103 = arith.constant dense<0.000000e+00> : vector<128xf32>
    %160 = vector.multi_reduction <add>, %159, %cst_103 [0] : vector<32x128xf32> to vector<128xf32>
    %161 = vector.shape_cast %160 : vector<128xf32> to vector<1x128xf32>
    %c127_i32_104 = arith.constant 127 : i32
    %162 = tpu.dynamic_rotate %161 by %c127_i32_104 dim 1 : vector<1x128xf32>, i32 -> vector<1x128xf32>
    %c1_i32_105 = arith.constant 1 : i32
    %163 = tpu.dynamic_rotate %161 by %c1_i32_105 dim 1 : vector<1x128xf32>, i32 -> vector<1x128xf32>
    %164 = arith.select %4, %162, %163 : vector<1x128xi1>, vector<1x128xf32>
    %165 = arith.addf %161, %164 : vector<1x128xf32>
    %cst_106 = arith.constant 1.562500e-02 : f32
    %166 = vector.broadcast %cst_106 : f32 to vector<1x128xf32>
    %167 = arith.mulf %165, %166 : vector<1x128xf32>
    %168 = vector.broadcast %167 : vector<1x128xf32> to vector<32x128xf32>
    %169 = arith.subf %159, %168 : vector<32x128xf32>
    %170 = arith.mulf %169, %169 : vector<32x128xf32>
    %cst_107 = arith.constant dense<0.000000e+00> : vector<128xf32>
    %171 = vector.multi_reduction <add>, %170, %cst_107 [0] : vector<32x128xf32> to vector<128xf32>
    %172 = vector.shape_cast %171 : vector<128xf32> to vector<1x128xf32>
    %c127_i32_108 = arith.constant 127 : i32
    %173 = tpu.dynamic_rotate %172 by %c127_i32_108 dim 1 : vector<1x128xf32>, i32 -> vector<1x128xf32>
    %c1_i32_109 = arith.constant 1 : i32
    %174 = tpu.dynamic_rotate %172 by %c1_i32_109 dim 1 : vector<1x128xf32>, i32 -> vector<1x128xf32>
    %175 = arith.select %4, %173, %174 : vector<1x128xi1>, vector<1x128xf32>
    %176 = arith.addf %172, %175 : vector<1x128xf32>
    %cst_110 = arith.constant 1.562500e-02 : f32
    %177 = vector.broadcast %cst_110 : f32 to vector<1x128xf32>
    %178 = arith.mulf %176, %177 : vector<1x128xf32>
    %cst_111 = arith.constant 9.99999974E-6 : f32
    %179 = vector.broadcast %cst_111 : f32 to vector<1x128xf32>
    %180 = arith.addf %178, %179 : vector<1x128xf32>
    %181 = math.rsqrt %180 : vector<1x128xf32>
    %182 = vector.broadcast %181 : vector<1x128xf32> to vector<32x128xf32>
    %183 = arith.mulf %169, %182 : vector<32x128xf32>
    %184 = vector.broadcast %137 : vector<1x128xf32> to vector<32x128xf32>
    %185 = arith.mulf %183, %184 : vector<32x128xf32>
    %186 = vector.broadcast %138 : vector<1x128xf32> to vector<32x128xf32>
    %187 = arith.addf %185, %186 : vector<32x128xf32>
    %cst_112 = arith.constant 5.000000e-01 : f32
    %188 = vector.broadcast %cst_112 : f32 to vector<32x128xf32>
    %189 = arith.mulf %188, %187 : vector<32x128xf32>
    %cst_113 = arith.constant 0.707106769 : f32
    %190 = vector.broadcast %cst_113 : f32 to vector<32x128xf32>
    %191 = arith.mulf %187, %190 : vector<32x128xf32>
    %192 = math.erf %191 : vector<32x128xf32>
    %cst_114 = arith.constant 1.000000e+00 : f32
    %193 = vector.broadcast %cst_114 : f32 to vector<32x128xf32>
    %194 = arith.addf %193, %192 : vector<32x128xf32>
    %195 = arith.mulf %189, %194 : vector<32x128xf32>
    %cst_115 = arith.constant 0.000000e+00 : f32
    %196 = vector.broadcast %cst_115 : f32 to vector<1x128xf32>
    %c0_116 = arith.constant 0 : index
    %c0_117 = arith.constant 0 : index
    %197 = vector.load %arg12[%c0_116, %c0_117] : memref<34x128xf32, #tpu.memory_space<vmem>>, vector<1x128xf32>
    tpu.vector_store %arg12[%c0_116, %c0_117], %196 {strides = array<i32>} : memref<34x128xf32, #tpu.memory_space<vmem>>, vector<1x128xf32>,
    %c33 = arith.constant 33 : index
    %c0_118 = arith.constant 0 : index
    %198 = vector.load %arg12[%c33, %c0_118] : memref<34x128xf32, #tpu.memory_space<vmem>>, vector<1x128xf32>
    tpu.vector_store %arg12[%c33, %c0_118], %196 {strides = array<i32>} : memref<34x128xf32, #tpu.memory_space<vmem>>, vector<1x128xf32>,
    %c1_119 = arith.constant 1 : index
    %c0_120 = arith.constant 0 : index
    %199 = vector.load %arg12[%c1_119, %c0_120] : memref<34x128xf32, #tpu.memory_space<vmem>>, vector<32x128xf32>
    tpu.vector_store %arg12[%c1_119, %c0_120], %195 {strides = array<i32>} : memref<34x128xf32, #tpu.memory_space<vmem>>, vector<32x128xf32>,
    %c3 = arith.constant 3 : index
    %c0_121 = arith.constant 0 : index
    %200 = vector.load %arg8[%c3, %c0_121] : memref<18x128xf32, #tpu.memory_space<vmem>>, vector<1x128xf32>
    %c9 = arith.constant 9 : index
    %c0_122 = arith.constant 0 : index
    %201 = vector.load %arg8[%c9, %c0_122] : memref<18x128xf32, #tpu.memory_space<vmem>>, vector<1x128xf32>
    %c15 = arith.constant 15 : index
    %c0_123 = arith.constant 0 : index
    %202 = vector.load %arg8[%c15, %c0_123] : memref<18x128xf32, #tpu.memory_space<vmem>>, vector<1x128xf32>
    %cst_124 = arith.constant 0.000000e+00 : f32
    %203 = vector.broadcast %cst_124 : f32 to vector<16x128xf32>
    %c0_125 = arith.constant 0 : index
    %c0_126 = arith.constant 0 : index
    %c0_127 = arith.constant 0 : index
    %204 = vector.load %arg5[%c0_125, %c0_126, %c0_127] : memref<3x128x128xbf16, #tpu.memory_space<vmem>>, vector<1x128x128xbf16>
    %205 = vector.shape_cast %204 : vector<1x128x128xbf16> to vector<128x128xbf16>
    %c0_128 = arith.constant 0 : index
    %c0_129 = arith.constant 0 : index
    %206 = tpu.strided_load %arg12[%c0_128, %c0_129] {strides = array<i32: 2, 1>} : memref<34x128xf32, #tpu.memory_space<vmem>>, vector<16x128xf32>
    %207 = arith.truncf %206 : vector<16x128xf32> to vector<16x128xbf16>
    %cst_130 = arith.constant dense<0.000000e+00> : vector<16x128xf32>
    %208 = tpu.matmul %207, %205, %cst_130 {dimension_numbers = #tpu.dot_dimension_numbers<[1], [0], [0], [1], [0, 0, 1, 1], [], []>} : vector<16x128xbf16>, vector<128x128xbf16>, vector<16x128xf32> -> vector<16x128xf32>
    %209 = arith.addf %203, %208 : vector<16x128xf32>
    %c1_131 = arith.constant 1 : index
    %c0_132 = arith.constant 0 : index
    %c0_133 = arith.constant 0 : index
    %210 = vector.load %arg5[%c1_131, %c0_132, %c0_133] : memref<3x128x128xbf16, #tpu.memory_space<vmem>>, vector<1x128x128xbf16>
    %211 = vector.shape_cast %210 : vector<1x128x128xbf16> to vector<128x128xbf16>
    %c1_134 = arith.constant 1 : index
    %c0_135 = arith.constant 0 : index
    %212 = tpu.strided_load %arg12[%c1_134, %c0_135] {strides = array<i32: 2, 1>} : memref<34x128xf32, #tpu.memory_space<vmem>>, vector<16x128xf32>
    %213 = arith.truncf %212 : vector<16x128xf32> to vector<16x128xbf16>
    %cst_136 = arith.constant dense<0.000000e+00> : vector<16x128xf32>
    %214 = tpu.matmul %213, %211, %cst_136 {dimension_numbers = #tpu.dot_dimension_numbers<[1], [0], [0], [1], [0, 0, 1, 1], [], []>} : vector<16x128xbf16>, vector<128x128xbf16>, vector<16x128xf32> -> vector<16x128xf32>
    %215 = arith.addf %209, %214 : vector<16x128xf32>
    %c2_137 = arith.constant 2 : index
    %c0_138 = arith.constant 0 : index
    %c0_139 = arith.constant 0 : index
    %216 = vector.load %arg5[%c2_137, %c0_138, %c0_139] : memref<3x128x128xbf16, #tpu.memory_space<vmem>>, vector<1x128x128xbf16>
    %217 = vector.shape_cast %216 : vector<1x128x128xbf16> to vector<128x128xbf16>
    %c2_140 = arith.constant 2 : index
    %c0_141 = arith.constant 0 : index
    %218 = tpu.strided_load %arg12[%c2_140, %c0_141] {strides = array<i32: 2, 1>} : memref<34x128xf32, #tpu.memory_space<vmem>>, vector<16x128xf32>
    %219 = arith.truncf %218 : vector<16x128xf32> to vector<16x128xbf16>
    %cst_142 = arith.constant dense<0.000000e+00> : vector<16x128xf32>
    %220 = tpu.matmul %219, %217, %cst_142 {dimension_numbers = #tpu.dot_dimension_numbers<[1], [0], [0], [1], [0, 0, 1, 1], [], []>} : vector<16x128xbf16>, vector<128x128xbf16>, vector<16x128xf32> -> vector<16x128xf32>
    %221 = arith.addf %215, %220 : vector<16x128xf32>
    %222 = vector.broadcast %200 : vector<1x128xf32> to vector<16x128xf32>
    %223 = arith.addf %221, %222 : vector<16x128xf32>
    %cst_143 = arith.constant dense<0.000000e+00> : vector<128xf32>
    %224 = vector.multi_reduction <add>, %223, %cst_143 [0] : vector<16x128xf32> to vector<128xf32>
    %225 = vector.shape_cast %224 : vector<128xf32> to vector<1x128xf32>
    %c127_i32_144 = arith.constant 127 : i32
    %226 = tpu.dynamic_rotate %225 by %c127_i32_144 dim 1 : vector<1x128xf32>, i32 -> vector<1x128xf32>
    %c1_i32_145 = arith.constant 1 : i32
    %227 = tpu.dynamic_rotate %225 by %c1_i32_145 dim 1 : vector<1x128xf32>, i32 -> vector<1x128xf32>
    %228 = arith.select %4, %226, %227 : vector<1x128xi1>, vector<1x128xf32>
    %229 = arith.addf %225, %228 : vector<1x128xf32>
    %cst_146 = arith.constant 3.125000e-02 : f32
    %230 = vector.broadcast %cst_146 : f32 to vector<1x128xf32>
    %231 = arith.mulf %229, %230 : vector<1x128xf32>
    %232 = vector.broadcast %231 : vector<1x128xf32> to vector<16x128xf32>
    %233 = arith.subf %223, %232 : vector<16x128xf32>
    %234 = arith.mulf %233, %233 : vector<16x128xf32>
    %cst_147 = arith.constant dense<0.000000e+00> : vector<128xf32>
    %235 = vector.multi_reduction <add>, %234, %cst_147 [0] : vector<16x128xf32> to vector<128xf32>
    %236 = vector.shape_cast %235 : vector<128xf32> to vector<1x128xf32>
    %c127_i32_148 = arith.constant 127 : i32
    %237 = tpu.dynamic_rotate %236 by %c127_i32_148 dim 1 : vector<1x128xf32>, i32 -> vector<1x128xf32>
    %c1_i32_149 = arith.constant 1 : i32
    %238 = tpu.dynamic_rotate %236 by %c1_i32_149 dim 1 : vector<1x128xf32>, i32 -> vector<1x128xf32>
    %239 = arith.select %4, %237, %238 : vector<1x128xi1>, vector<1x128xf32>
    %240 = arith.addf %236, %239 : vector<1x128xf32>
    %cst_150 = arith.constant 3.125000e-02 : f32
    %241 = vector.broadcast %cst_150 : f32 to vector<1x128xf32>
    %242 = arith.mulf %240, %241 : vector<1x128xf32>
    %cst_151 = arith.constant 9.99999974E-6 : f32
    %243 = vector.broadcast %cst_151 : f32 to vector<1x128xf32>
    %244 = arith.addf %242, %243 : vector<1x128xf32>
    %245 = math.rsqrt %244 : vector<1x128xf32>
    %246 = vector.broadcast %245 : vector<1x128xf32> to vector<16x128xf32>
    %247 = arith.mulf %233, %246 : vector<16x128xf32>
    %248 = vector.broadcast %201 : vector<1x128xf32> to vector<16x128xf32>
    %249 = arith.mulf %247, %248 : vector<16x128xf32>
    %250 = vector.broadcast %202 : vector<1x128xf32> to vector<16x128xf32>
    %251 = arith.addf %249, %250 : vector<16x128xf32>
    %cst_152 = arith.constant 5.000000e-01 : f32
    %252 = vector.broadcast %cst_152 : f32 to vector<16x128xf32>
    %253 = arith.mulf %252, %251 : vector<16x128xf32>
    %cst_153 = arith.constant 0.707106769 : f32
    %254 = vector.broadcast %cst_153 : f32 to vector<16x128xf32>
    %255 = arith.mulf %251, %254 : vector<16x128xf32>
    %256 = math.erf %255 : vector<16x128xf32>
    %cst_154 = arith.constant 1.000000e+00 : f32
    %257 = vector.broadcast %cst_154 : f32 to vector<16x128xf32>
    %258 = arith.addf %257, %256 : vector<16x128xf32>
    %259 = arith.mulf %253, %258 : vector<16x128xf32>
    %cst_155 = arith.constant 0.000000e+00 : f32
    %260 = vector.broadcast %cst_155 : f32 to vector<1x128xf32>
    %c0_156 = arith.constant 0 : index
    %c0_157 = arith.constant 0 : index
    %261 = vector.load %arg13[%c0_156, %c0_157] : memref<18x128xf32, #tpu.memory_space<vmem>>, vector<1x128xf32>
    tpu.vector_store %arg13[%c0_156, %c0_157], %260 {strides = array<i32>} : memref<18x128xf32, #tpu.memory_space<vmem>>, vector<1x128xf32>,
    %c17 = arith.constant 17 : index
    %c0_158 = arith.constant 0 : index
    %262 = vector.load %arg13[%c17, %c0_158] : memref<18x128xf32, #tpu.memory_space<vmem>>, vector<1x128xf32>
    tpu.vector_store %arg13[%c17, %c0_158], %260 {strides = array<i32>} : memref<18x128xf32, #tpu.memory_space<vmem>>, vector<1x128xf32>,
    %c1_159 = arith.constant 1 : index
    %c0_160 = arith.constant 0 : index
    %263 = vector.load %arg13[%c1_159, %c0_160] : memref<18x128xf32, #tpu.memory_space<vmem>>, vector<16x128xf32>
    tpu.vector_store %arg13[%c1_159, %c0_160], %259 {strides = array<i32>} : memref<18x128xf32, #tpu.memory_space<vmem>>, vector<16x128xf32>,
    %c4 = arith.constant 4 : index
    %c0_161 = arith.constant 0 : index
    %264 = vector.load %arg8[%c4, %c0_161] : memref<18x128xf32, #tpu.memory_space<vmem>>, vector<1x128xf32>
    %c10 = arith.constant 10 : index
    %c0_162 = arith.constant 0 : index
    %265 = vector.load %arg8[%c10, %c0_162] : memref<18x128xf32, #tpu.memory_space<vmem>>, vector<1x128xf32>
    %c16 = arith.constant 16 : index
    %c0_163 = arith.constant 0 : index
    %266 = vector.load %arg8[%c16, %c0_163] : memref<18x128xf32, #tpu.memory_space<vmem>>, vector<1x128xf32>
    %cst_164 = arith.constant 0.000000e+00 : f32
    %267 = vector.broadcast %cst_164 : f32 to vector<8x128xf32>
    %c0_165 = arith.constant 0 : index
    %c0_166 = arith.constant 0 : index
    %c0_167 = arith.constant 0 : index
    %268 = vector.load %arg6[%c0_165, %c0_166, %c0_167] : memref<3x128x128xbf16, #tpu.memory_space<vmem>>, vector<1x128x128xbf16>
    %269 = vector.shape_cast %268 : vector<1x128x128xbf16> to vector<128x128xbf16>
    %c0_168 = arith.constant 0 : index
    %c0_169 = arith.constant 0 : index
    %270 = tpu.strided_load %arg13[%c0_168, %c0_169] {strides = array<i32: 2, 1>} : memref<18x128xf32, #tpu.memory_space<vmem>>, vector<8x128xf32>
    %271 = arith.truncf %270 : vector<8x128xf32> to vector<8x128xbf16>
    %cst_170 = arith.constant dense<0.000000e+00> : vector<8x128xf32>
    %272 = tpu.matmul %271, %269, %cst_170 {dimension_numbers = #tpu.dot_dimension_numbers<[1], [0], [0], [1], [0, 0, 1, 1], [], []>} : vector<8x128xbf16>, vector<128x128xbf16>, vector<8x128xf32> -> vector<8x128xf32>
    %273 = arith.addf %267, %272 : vector<8x128xf32>
    %c1_171 = arith.constant 1 : index
    %c0_172 = arith.constant 0 : index
    %c0_173 = arith.constant 0 : index
    %274 = vector.load %arg6[%c1_171, %c0_172, %c0_173] : memref<3x128x128xbf16, #tpu.memory_space<vmem>>, vector<1x128x128xbf16>
    %275 = vector.shape_cast %274 : vector<1x128x128xbf16> to vector<128x128xbf16>
    %c1_174 = arith.constant 1 : index
    %c0_175 = arith.constant 0 : index
    %276 = tpu.strided_load %arg13[%c1_174, %c0_175] {strides = array<i32: 2, 1>} : memref<18x128xf32, #tpu.memory_space<vmem>>, vector<8x128xf32>
    %277 = arith.truncf %276 : vector<8x128xf32> to vector<8x128xbf16>
    %cst_176 = arith.constant dense<0.000000e+00> : vector<8x128xf32>
    %278 = tpu.matmul %277, %275, %cst_176 {dimension_numbers = #tpu.dot_dimension_numbers<[1], [0], [0], [1], [0, 0, 1, 1], [], []>} : vector<8x128xbf16>, vector<128x128xbf16>, vector<8x128xf32> -> vector<8x128xf32>
    %279 = arith.addf %273, %278 : vector<8x128xf32>
    %c2_177 = arith.constant 2 : index
    %c0_178 = arith.constant 0 : index
    %c0_179 = arith.constant 0 : index
    %280 = vector.load %arg6[%c2_177, %c0_178, %c0_179] : memref<3x128x128xbf16, #tpu.memory_space<vmem>>, vector<1x128x128xbf16>
    %281 = vector.shape_cast %280 : vector<1x128x128xbf16> to vector<128x128xbf16>
    %c2_180 = arith.constant 2 : index
    %c0_181 = arith.constant 0 : index
    %282 = tpu.strided_load %arg13[%c2_180, %c0_181] {strides = array<i32: 2, 1>} : memref<18x128xf32, #tpu.memory_space<vmem>>, vector<8x128xf32>
    %283 = arith.truncf %282 : vector<8x128xf32> to vector<8x128xbf16>
    %cst_182 = arith.constant dense<0.000000e+00> : vector<8x128xf32>
    %284 = tpu.matmul %283, %281, %cst_182 {dimension_numbers = #tpu.dot_dimension_numbers<[1], [0], [0], [1], [0, 0, 1, 1], [], []>} : vector<8x128xbf16>, vector<128x128xbf16>, vector<8x128xf32> -> vector<8x128xf32>
    %285 = arith.addf %279, %284 : vector<8x128xf32>
    %286 = vector.broadcast %264 : vector<1x128xf32> to vector<8x128xf32>
    %287 = arith.addf %285, %286 : vector<8x128xf32>
    %cst_183 = arith.constant dense<0.000000e+00> : vector<128xf32>
    %288 = vector.multi_reduction <add>, %287, %cst_183 [0] : vector<8x128xf32> to vector<128xf32>
    %289 = vector.shape_cast %288 : vector<128xf32> to vector<1x128xf32>
    %c127_i32_184 = arith.constant 127 : i32
    %290 = tpu.dynamic_rotate %289 by %c127_i32_184 dim 1 : vector<1x128xf32>, i32 -> vector<1x128xf32>
    %c1_i32_185 = arith.constant 1 : i32
    %291 = tpu.dynamic_rotate %289 by %c1_i32_185 dim 1 : vector<1x128xf32>, i32 -> vector<1x128xf32>
    %292 = arith.select %4, %290, %291 : vector<1x128xi1>, vector<1x128xf32>
    %293 = arith.addf %289, %292 : vector<1x128xf32>
    %cst_186 = arith.constant 6.250000e-02 : f32
    %294 = vector.broadcast %cst_186 : f32 to vector<1x128xf32>
    %295 = arith.mulf %293, %294 : vector<1x128xf32>
    %296 = vector.broadcast %295 : vector<1x128xf32> to vector<8x128xf32>
    %297 = arith.subf %287, %296 : vector<8x128xf32>
    %298 = arith.mulf %297, %297 : vector<8x128xf32>
    %cst_187 = arith.constant dense<0.000000e+00> : vector<128xf32>
    %299 = vector.multi_reduction <add>, %298, %cst_187 [0] : vector<8x128xf32> to vector<128xf32>
    %300 = vector.shape_cast %299 : vector<128xf32> to vector<1x128xf32>
    %c127_i32_188 = arith.constant 127 : i32
    %301 = tpu.dynamic_rotate %300 by %c127_i32_188 dim 1 : vector<1x128xf32>, i32 -> vector<1x128xf32>
    %c1_i32_189 = arith.constant 1 : i32
    %302 = tpu.dynamic_rotate %300 by %c1_i32_189 dim 1 : vector<1x128xf32>, i32 -> vector<1x128xf32>
    %303 = arith.select %4, %301, %302 : vector<1x128xi1>, vector<1x128xf32>
    %304 = arith.addf %300, %303 : vector<1x128xf32>
    %cst_190 = arith.constant 6.250000e-02 : f32
    %305 = vector.broadcast %cst_190 : f32 to vector<1x128xf32>
    %306 = arith.mulf %304, %305 : vector<1x128xf32>
    %cst_191 = arith.constant 9.99999974E-6 : f32
    %307 = vector.broadcast %cst_191 : f32 to vector<1x128xf32>
    %308 = arith.addf %306, %307 : vector<1x128xf32>
    %309 = math.rsqrt %308 : vector<1x128xf32>
    %310 = vector.broadcast %309 : vector<1x128xf32> to vector<8x128xf32>
    %311 = arith.mulf %297, %310 : vector<8x128xf32>
    %312 = vector.broadcast %265 : vector<1x128xf32> to vector<8x128xf32>
    %313 = arith.mulf %311, %312 : vector<8x128xf32>
    %314 = vector.broadcast %266 : vector<1x128xf32> to vector<8x128xf32>
    %315 = arith.addf %313, %314 : vector<8x128xf32>
    %cst_192 = arith.constant 5.000000e-01 : f32
    %316 = vector.broadcast %cst_192 : f32 to vector<8x128xf32>
    %317 = arith.mulf %316, %315 : vector<8x128xf32>
    %cst_193 = arith.constant 0.707106769 : f32
    %318 = vector.broadcast %cst_193 : f32 to vector<8x128xf32>
    %319 = arith.mulf %315, %318 : vector<8x128xf32>
    %320 = math.erf %319 : vector<8x128xf32>
    %cst_194 = arith.constant 1.000000e+00 : f32
    %321 = vector.broadcast %cst_194 : f32 to vector<8x128xf32>
    %322 = arith.addf %321, %320 : vector<8x128xf32>
    %323 = arith.mulf %317, %322 : vector<8x128xf32>
    %cst_195 = arith.constant 0.000000e+00 : f32
    %324 = vector.broadcast %cst_195 : f32 to vector<1x128xf32>
    %c0_196 = arith.constant 0 : index
    %c0_197 = arith.constant 0 : index
    %325 = vector.load %arg14[%c0_196, %c0_197] : memref<10x128xf32, #tpu.memory_space<vmem>>, vector<1x128xf32>
    tpu.vector_store %arg14[%c0_196, %c0_197], %324 {strides = array<i32>} : memref<10x128xf32, #tpu.memory_space<vmem>>, vector<1x128xf32>,
    %c9_198 = arith.constant 9 : index
    %c0_199 = arith.constant 0 : index
    %326 = vector.load %arg14[%c9_198, %c0_199] : memref<10x128xf32, #tpu.memory_space<vmem>>, vector<1x128xf32>
    tpu.vector_store %arg14[%c9_198, %c0_199], %324 {strides = array<i32>} : memref<10x128xf32, #tpu.memory_space<vmem>>, vector<1x128xf32>,
    %c1_200 = arith.constant 1 : index
    %c0_201 = arith.constant 0 : index
    %327 = vector.load %arg14[%c1_200, %c0_201] : memref<10x128xf32, #tpu.memory_space<vmem>>, vector<8x128xf32>
    tpu.vector_store %arg14[%c1_200, %c0_201], %323 {strides = array<i32>} : memref<10x128xf32, #tpu.memory_space<vmem>>, vector<8x128xf32>,
    %c5 = arith.constant 5 : index
    %c0_202 = arith.constant 0 : index
    %328 = vector.load %arg8[%c5, %c0_202] : memref<18x128xf32, #tpu.memory_space<vmem>>, vector<1x128xf32>
    %c11 = arith.constant 11 : index
    %c0_203 = arith.constant 0 : index
    %329 = vector.load %arg8[%c11, %c0_203] : memref<18x128xf32, #tpu.memory_space<vmem>>, vector<1x128xf32>
    %c17_204 = arith.constant 17 : index
    %c0_205 = arith.constant 0 : index
    %330 = vector.load %arg8[%c17_204, %c0_205] : memref<18x128xf32, #tpu.memory_space<vmem>>, vector<1x128xf32>
    %cst_206 = arith.constant 0.000000e+00 : f32
    %331 = vector.broadcast %cst_206 : f32 to vector<4x128xf32>
    %c0_207 = arith.constant 0 : index
    %c0_208 = arith.constant 0 : index
    %c0_209 = arith.constant 0 : index
    %332 = vector.load %arg7[%c0_207, %c0_208, %c0_209] : memref<3x128x128xbf16, #tpu.memory_space<vmem>>, vector<1x128x128xbf16>
    %333 = vector.shape_cast %332 : vector<1x128x128xbf16> to vector<128x128xbf16>
    %c0_210 = arith.constant 0 : index
    %c0_211 = arith.constant 0 : index
    %334 = tpu.strided_load %arg14[%c0_210, %c0_211] {strides = array<i32: 2, 1>} : memref<10x128xf32, #tpu.memory_space<vmem>>, vector<4x128xf32>
    %335 = arith.truncf %334 : vector<4x128xf32> to vector<4x128xbf16>
    %cst_212 = arith.constant dense<0.000000e+00> : vector<4x128xf32>
    %336 = tpu.matmul %335, %333, %cst_212 {dimension_numbers = #tpu.dot_dimension_numbers<[1], [0], [0], [1], [0, 0, 1, 1], [], []>} : vector<4x128xbf16>, vector<128x128xbf16>, vector<4x128xf32> -> vector<4x128xf32>
    %337 = arith.addf %331, %336 : vector<4x128xf32>
    %c1_213 = arith.constant 1 : index
    %c0_214 = arith.constant 0 : index
    %c0_215 = arith.constant 0 : index
    %338 = vector.load %arg7[%c1_213, %c0_214, %c0_215] : memref<3x128x128xbf16, #tpu.memory_space<vmem>>, vector<1x128x128xbf16>
    %339 = vector.shape_cast %338 : vector<1x128x128xbf16> to vector<128x128xbf16>
    %c1_216 = arith.constant 1 : index
    %c0_217 = arith.constant 0 : index
    %340 = tpu.strided_load %arg14[%c1_216, %c0_217] {strides = array<i32: 2, 1>} : memref<10x128xf32, #tpu.memory_space<vmem>>, vector<4x128xf32>
    %341 = arith.truncf %340 : vector<4x128xf32> to vector<4x128xbf16>
    %cst_218 = arith.constant dense<0.000000e+00> : vector<4x128xf32>
    %342 = tpu.matmul %341, %339, %cst_218 {dimension_numbers = #tpu.dot_dimension_numbers<[1], [0], [0], [1], [0, 0, 1, 1], [], []>} : vector<4x128xbf16>, vector<128x128xbf16>, vector<4x128xf32> -> vector<4x128xf32>
    %343 = arith.addf %337, %342 : vector<4x128xf32>
    %c2_219 = arith.constant 2 : index
    %c0_220 = arith.constant 0 : index
    %c0_221 = arith.constant 0 : index
    %344 = vector.load %arg7[%c2_219, %c0_220, %c0_221] : memref<3x128x128xbf16, #tpu.memory_space<vmem>>, vector<1x128x128xbf16>
    %345 = vector.shape_cast %344 : vector<1x128x128xbf16> to vector<128x128xbf16>
    %c2_222 = arith.constant 2 : index
    %c0_223 = arith.constant 0 : index
    %346 = tpu.strided_load %arg14[%c2_222, %c0_223] {strides = array<i32: 2, 1>} : memref<10x128xf32, #tpu.memory_space<vmem>>, vector<4x128xf32>
    %347 = arith.truncf %346 : vector<4x128xf32> to vector<4x128xbf16>
    %cst_224 = arith.constant dense<0.000000e+00> : vector<4x128xf32>
    %348 = tpu.matmul %347, %345, %cst_224 {dimension_numbers = #tpu.dot_dimension_numbers<[1], [0], [0], [1], [0, 0, 1, 1], [], []>} : vector<4x128xbf16>, vector<128x128xbf16>, vector<4x128xf32> -> vector<4x128xf32>
    %349 = arith.addf %343, %348 : vector<4x128xf32>
    %350 = vector.broadcast %328 : vector<1x128xf32> to vector<4x128xf32>
    %351 = arith.addf %349, %350 : vector<4x128xf32>
    %cst_225 = arith.constant dense<0.000000e+00> : vector<128xf32>
    %352 = vector.multi_reduction <add>, %351, %cst_225 [0] : vector<4x128xf32> to vector<128xf32>
    %353 = vector.shape_cast %352 : vector<128xf32> to vector<1x128xf32>
    %c127_i32_226 = arith.constant 127 : i32
    %354 = tpu.dynamic_rotate %353 by %c127_i32_226 dim 1 : vector<1x128xf32>, i32 -> vector<1x128xf32>
    %c1_i32_227 = arith.constant 1 : i32
    %355 = tpu.dynamic_rotate %353 by %c1_i32_227 dim 1 : vector<1x128xf32>, i32 -> vector<1x128xf32>
    %356 = arith.select %4, %354, %355 : vector<1x128xi1>, vector<1x128xf32>
    %357 = arith.addf %353, %356 : vector<1x128xf32>
    %cst_228 = arith.constant 1.250000e-01 : f32
    %358 = vector.broadcast %cst_228 : f32 to vector<1x128xf32>
    %359 = arith.mulf %357, %358 : vector<1x128xf32>
    %360 = vector.broadcast %359 : vector<1x128xf32> to vector<4x128xf32>
    %361 = arith.subf %351, %360 : vector<4x128xf32>
    %362 = arith.mulf %361, %361 : vector<4x128xf32>
    %cst_229 = arith.constant dense<0.000000e+00> : vector<128xf32>
    %363 = vector.multi_reduction <add>, %362, %cst_229 [0] : vector<4x128xf32> to vector<128xf32>
    %364 = vector.shape_cast %363 : vector<128xf32> to vector<1x128xf32>
    %c127_i32_230 = arith.constant 127 : i32
    %365 = tpu.dynamic_rotate %364 by %c127_i32_230 dim 1 : vector<1x128xf32>, i32 -> vector<1x128xf32>
    %c1_i32_231 = arith.constant 1 : i32
    %366 = tpu.dynamic_rotate %364 by %c1_i32_231 dim 1 : vector<1x128xf32>, i32 -> vector<1x128xf32>
    %367 = arith.select %4, %365, %366 : vector<1x128xi1>, vector<1x128xf32>
    %368 = arith.addf %364, %367 : vector<1x128xf32>
    %cst_232 = arith.constant 1.250000e-01 : f32
    %369 = vector.broadcast %cst_232 : f32 to vector<1x128xf32>
    %370 = arith.mulf %368, %369 : vector<1x128xf32>
    %cst_233 = arith.constant 9.99999974E-6 : f32
    %371 = vector.broadcast %cst_233 : f32 to vector<1x128xf32>
    %372 = arith.addf %370, %371 : vector<1x128xf32>
    %373 = math.rsqrt %372 : vector<1x128xf32>
    %374 = vector.broadcast %373 : vector<1x128xf32> to vector<4x128xf32>
    %375 = arith.mulf %361, %374 : vector<4x128xf32>
    %376 = vector.broadcast %329 : vector<1x128xf32> to vector<4x128xf32>
    %377 = arith.mulf %375, %376 : vector<4x128xf32>
    %378 = vector.broadcast %330 : vector<1x128xf32> to vector<4x128xf32>
    %379 = arith.addf %377, %378 : vector<4x128xf32>
    %cst_234 = arith.constant 5.000000e-01 : f32
    %380 = vector.broadcast %cst_234 : f32 to vector<4x128xf32>
    %381 = arith.mulf %380, %379 : vector<4x128xf32>
    %cst_235 = arith.constant 0.707106769 : f32
    %382 = vector.broadcast %cst_235 : f32 to vector<4x128xf32>
    %383 = arith.mulf %379, %382 : vector<4x128xf32>
    %384 = math.erf %383 : vector<4x128xf32>
    %cst_236 = arith.constant 1.000000e+00 : f32
    %385 = vector.broadcast %cst_236 : f32 to vector<4x128xf32>
    %386 = arith.addf %385, %384 : vector<4x128xf32>
    %387 = arith.mulf %381, %386 : vector<4x128xf32>
    %c0_237 = arith.constant 0 : index
    %c0_238 = arith.constant 0 : index
    %c0_239 = arith.constant 0 : index
    %388 = vector.load %arg9[%c0_237, %c0_238, %c0_239] : memref<1x4x128xf32, #tpu.memory_space<vmem>>, vector<1x4x128xf32>
    %389 = vector.shape_cast %388 : vector<1x4x128xf32> to vector<4x128xf32>
    %390 = vector.shape_cast %387 : vector<4x128xf32> to vector<1x4x128xf32>
    tpu.vector_store %arg9[%c0_237, %c0_238, %c0_239], %390 {strides = array<i32>} : memref<1x4x128xf32, #tpu.memory_space<vmem>>, vector<1x4x128xf32>,
    return
  }
  func.func @transform_0(%arg0: i32) -> (i32, i32, i32) {
    %c0_i32 = arith.constant 0 : i32
    %c0_i32_0 = arith.constant 0 : i32
    %c0_i32_1 = arith.constant 0 : i32
    return %arg0, %c0_i32, %c0_i32_0 : i32, i32, i32
  }
  func.func @transform_1(%arg0: i32) -> (i32, i32, i32) {
    %c0_i32 = arith.constant 0 : i32
    %c0_i32_0 = arith.constant 0 : i32
    %c0_i32_1 = arith.constant 0 : i32
    %c0_i32_2 = arith.constant 0 : i32
    return %c0_i32, %c0_i32_0, %c0_i32_1 : i32, i32, i32
  }
  func.func @transform_2(%arg0: i32) -> (i32, i32, i32) {
    %c0_i32 = arith.constant 0 : i32
    %c0_i32_0 = arith.constant 0 : i32
    %c0_i32_1 = arith.constant 0 : i32
    %c0_i32_2 = arith.constant 0 : i32
    return %c0_i32, %c0_i32_0, %c0_i32_1 : i32, i32, i32
  }
  func.func @transform_3(%arg0: i32) -> (i32, i32, i32) {
    %c0_i32 = arith.constant 0 : i32
    %c0_i32_0 = arith.constant 0 : i32
    %c0_i32_1 = arith.constant 0 : i32
    %c0_i32_2 = arith.constant 0 : i32
    return %c0_i32, %c0_i32_0, %c0_i32_1 : i32, i32, i32
  }
  func.func @transform_4(%arg0: i32) -> (i32, i32, i32) {
    %c0_i32 = arith.constant 0 : i32
    %c0_i32_0 = arith.constant 0 : i32
    %c0_i32_1 = arith.constant 0 : i32
    %c0_i32_2 = arith.constant 0 : i32
    return %c0_i32, %c0_i32_0, %c0_i32_1 : i32, i32, i32
  }
  func.func @transform_5(%arg0: i32) -> (i32, i32, i32) {
    %c0_i32 = arith.constant 0 : i32
    %c0_i32_0 = arith.constant 0 : i32
    %c0_i32_1 = arith.constant 0 : i32
    %c0_i32_2 = arith.constant 0 : i32
    return %c0_i32, %c0_i32_0, %c0_i32_1 : i32, i32, i32
  }
  func.func @transform_6(%arg0: i32) -> (i32, i32, i32) {
    %c0_i32 = arith.constant 0 : i32
    %c0_i32_0 = arith.constant 0 : i32
    %c0_i32_1 = arith.constant 0 : i32
    %c0_i32_2 = arith.constant 0 : i32
    return %c0_i32, %c0_i32_0, %c0_i32_1 : i32, i32, i32
  }
  func.func @transform_7(%arg0: i32) -> (i32, i32) {
    %c0_i32 = arith.constant 0 : i32
    %c0_i32_0 = arith.constant 0 : i32
    %c0_i32_1 = arith.constant 0 : i32
    return %c0_i32, %c0_i32_0 : i32, i32
  }
  func.func @transform_8(%arg0: i32) -> (i32, i32, i32) {
    %c0_i32 = arith.constant 0 : i32
    %c0_i32_0 = arith.constant 0 : i32
    %c0_i32_1 = arith.constant 0 : i32
    return %arg0, %c0_i32, %c0_i32_0 : i32, i32, i32
  }
}

</mosaic_0001>

<bundles_post_ra>
// kernel: tpu_custom_call.1
= control target key start
LH: loop header
LB: loop body
LE: loop exit
PB: predicated region body
PF: predicated region fallthrough
CT: control target
= control target key end

     0   :  { %13 = vsyncpa [#allocation8], 0  ;;  %s5823_s0 = inlined_call_operand.vmem [shape: f32[2,386,4], index: 0, kind: input, shape index: {}]   ;;  %s5824_s1 = inlined_call_operand.vmem [shape: bf16[3,4,128], index: 1, kind: input, shape index: {}]   ;;  %s5825_s2 = inlined_call_operand.vmem [shape: bf16[3,128,128], index: 2, kind: input, shape index: {}]   ;;  %s5826_s3 = inlined_call_operand.vmem [shape: bf16[3,128,128], index: 3, kind: input, shape index: {}]   ;;  %s5827_s4 = inlined_call_operand.vmem [shape: bf16[3,128,128], index: 4, kind: input, shape index: {}]   ;;  %s5828_s5 = inlined_call_operand.vmem [shape: bf16[3,128,128], index: 5, kind: input, shape index: {}]   ;;  %s5829_s6 = inlined_call_operand.hbm [shape: bf16[3,128,128], index: 6, kind: input, shape index: {}]   ;;  %s5830_s7 = inlined_call_operand.vmem [shape: f32[18,128], index: 7, kind: input, shape index: {}]   ;;  %s5831_s8 = inlined_call_operand.hbm [shape: f32[2,4,128], index: 8, kind: output, shape index: {}]  }
   0x1   :  { %14 = vsyncpa [#allocation9], 0 }
   0x2   :  { %16 = vsyncpa [#allocation9 + $0x1], 0  ;;  %s4779_s27 = smov 0   ;;  %s4781_s28 = smov 0  }
   0x3   :  { %s4783_s29 = smov 0   ;;  %s4785_s30 = smov 0  }
   0x4 LB: > { %s4800_s9 = sadd.s32 4294967295, %s4724_s30   ;;  %s3487_s10 = sadd.s32 4294967294, %s4724_s30   ;;  %s4724_s30 = sphi %s4785_s30, %s5841_s30   ;;  %s4720_s29 = sphi %s4783_s29, %s5840_s29   ;;  %s4716_s28 = sphi %s4781_s28, %s5839_s28   ;;  %s4712_s27 = sphi %s4779_s27, %s5838_s27  }
   0x5   : > { %s4804_s11 = sadd.s32 1, %s4724_s30   ;;  %s202_s12 = sadd.s32 1, %s4720_s29 }
   0x6   : > { %s199_s13 = ssub.s32 %s4724_s30, %s4804_s11  ;;  %p212_p0 = scmp.ne.s32.totalorder %s4720_s29, %s4716_s28 }
   0x7   : > { %p200_p1 = scmp.eq.s32.totalorder %s199_s13, 0  ;;  %p213_p2 = scmp.eq.s32.totalorder %s4800_s9, 1 }
   0x8   : > { %p218_p3 = scmp.ne.s32.totalorder %s4716_s28, %s4712_s27  ;;  %p219_p4 = scmp.eq.s32.totalorder %s3487_s10, 1 }
   0x9   : > { %s4815_s14 = scalar_select %p200_p1, %s4720_s29, %s202_s12  }
   0xa   : > { %p4817_p5 = por %p213_p2, %p212_p0  ;;  %p4821_p6 = por %p219_p4, %p218_p3 }
   0xb   : > { %p3488_p7 = scmp.ge.s32.totalorder %s4724_s30, 1  ;;  %p226_p8 = scmp.lt.s32.totalorder %s4724_s30, 3 }
   0xc   : > { %s5833_s16 = scalar_select %p4821_p6, 1, 0 }
   0xd   : > { %p4396_p9 = scmp.eq.s32.totalorder %s4800_s9, 0  ;;  %p4828_p10 = pnand %p3488_p7, %p226_p8 }
   0xe   : > { %s4726_s18 = smov [#allocation7]  }
   0xf   : > { %s253_s19 = sshll.u32 %s4726_s18, 4  ;;  %p4388_p11 = pneg %p4828_p10  ;;  %s254_s19 = int_to_ptr.vmem [resolvable:$true] %s253_s19 }
  0x10   : > { %s4645_s20 = scalar_lea.vmem %s254_s19, 3072  ;;  %p4653_p3 = scmp.lt.s32.totalorder %s254_s19, %s254_s19 }
  0x11   : > { %p4389_p12 = pnand %p4396_p9, %p4388_p11  ;;  %p4646_p0 = scmp.ne.s32.totalorder %s254_s19, %s4645_s20 }
  0x12   : > { %p4654_p4 = scmp.lt.s32.totalorder %s4645_s20, %s4645_s20 }
  0x13   : > { %p4636_p13 = pneg %p4389_p12 }
  0x14   : > { %p4655_p6 = por %p4654_p4, %p4653_p3 }
  0x15   : > { %p4648_p1 = pnand %p4646_p0, %p4636_p13 }
  0x17   : > { %p4649_p2 = pneg %p4648_p1 }
  0x19   : > { %p4656_p7 = pnand %p4655_p6, %p4649_p2 }
  0x1b   : > { %4659 = shalt.err (!%p4656_p7)
}
  0x1c   : > { %s4727_s21 = smov 64   ;;  %s4728_s22 = smov 4  }
  0x1d   : > { %4391 = dma.hbm_to_vmem [thread:$0]  (!%p4389_p12), %s5829_s6, 3072, %s254_s19, [#allocation8], %s4727_s21, %s4727_s21, %s4728_s22  }
  0x1e   : > { %280 = sbr.rel (%p4828_p10) target bundleno = 3524 (0xdc4), region = 52 }
  0x23   : > { %4703 = dma.done.wait (%p4396_p9), [#allocation8], 3072  }
  0x24   : > { %4705 = vsyncadd (%p4396_p9), [#allocation8], 4294964224  ;;  %p314_p8 = scmp.lt.s32.totalorder %s4800_s9, 1  ;;  %v4729_v0 = vmov 0.0   ;;  %vm434_vm0 = vcmask 1041408   ;;  %vm409_vm1 = vcmask 31744  }
  0x25   : > { %1095 = vst [vmem:[#allocation2] sm:$0x1] %v4729_v0  ;;  %1722 = vst [vmem:[#allocation3] sm:$0x1] %v4729_v0  ;;  %v3510_v1 = vld [vmem:[%s5824_s1 + $0x2] sm:$0x3] }
  0x26   : > { %2207 = vst [vmem:[#allocation4] sm:$0x1] %v4729_v0  ;;  %2621 = vst [vmem:[#allocation5] sm:$0x1] %v4729_v0  ;;  %s315_s25 = scalar_select %p314_p8, %s4800_s9, 1  ;;  %4378 = vmatprep.subr.msk.bf16.mxu0 %vm434_vm0, %v3510_v1  ;;  %v436_v4 = vsel %vm434_vm0, %v3510_v1, 0 }
  0x27   : > { %3010 = vst [vmem:[#allocation6] sm:$0x1] %v4729_v0  ;;  %v327_v2 = vld [vmem:[%s5824_s1] sm:$0x3]  ;;  %4013 = vmatpush3.bf16.msra.mxu0 %v436_v4  ;;  %v3543_v16 = vld [vmem:[%s5824_s1 + $0x4] sm:$0x3] }
  0x28   : > { %s4381_s26 = smul.u32 392, %s315_s25  ;;  %4379 = vmatprep.subr.msk.bf16.mxu1 %vm434_vm0, %v327_v2  ;;  %v560_v5 = vsel %vm434_vm0, %v327_v2, 0  ;;  %4380 = vmatprep.subr.msk.bf16.mxu0 %vm434_vm0, %v3543_v16  ;;  %v726_v18 = vsel %vm434_vm0, %v3543_v16, 0  ;;  %s4730_s25 = smov 127   ;;  %vm4732_vm3 = vmmov 0   ;;  %vm3344_vm4 = vcmask 1043456  }
  0x29   : > { %4031 = vmatpush3.bf16.msra.mxu1 %v560_v5  ;;  %s311_s18 = sand.u32 1, %s4716_s28   ;;  %s3835_s20 = sshll.u32 %s4800_s9, 6 }
  0x2a   : > { %s4855_s13 = scalar_lea.vmem %s5823_s0, %s4381_s26  ;;  %s4731_s26 = smov 1  }
  0x2b   : > { %v3511_v3 = vld [vmem:[%s4855_s13 + $0x1] ss:$3 sm:$0xff]  ;;  %v3512_v6 = vld [vmem:[%s4855_s13 + $0x19] ss:$3 sm:$0xff]  ;;  %v328_v7 = vld [vmem:[%s4855_s13] ss:$3 sm:$0xff]  ;;  %s3414_s10 = scalar_lea.hbm %s5831_s8, %s3835_s20 }
  0x2c   : > { %v401_v8 = vpack.c.bf16 %v3512_v6, %v3511_v3  ;;  %v3495_v9 = vld [vmem:[%s4855_s13 + $0x18] ss:$3 sm:$0xff]  ;;  %v3513_v10 = vld [vmem:[%s4855_s13 + $0x31] ss:$3 sm:$0xff]  ;;  %v3496_v14 = vld [vmem:[%s4855_s13 + $0x30] ss:$3 sm:$0xff] }
  0x2d   : > { %v3514_v11 = vld [vmem:[%s4855_s13 + $0x49] ss:$3 sm:$0xff]  ;;  %v359_v12 = vpack.c.bf16 %v3495_v9, %v328_v7  ;;  %v3497_v15 = vld [vmem:[%s4855_s13 + $0x48] ss:$3 sm:$0xff]  ;;  %v3515_v19 = vld [vmem:[%s4855_s13 + $0x61] ss:$3 sm:$0xff] }
  0x2e   : > { %v402_v13 = vpack.c.bf16 %v3514_v11, %v3513_v10  ;;  %4014 = vmatprep.mubr.msk.bf16.mxu0 %vm409_vm1, %v401_v8  ;;  %v360_v17 = vpack.c.bf16 %v3497_v15, %v3496_v14  ;;  %v3516_v20 = vld [vmem:[%s4855_s13 + $0x79] ss:$3 sm:$0xff]  ;;  %v3498_v22 = vld [vmem:[%s4855_s13 + $0x60] ss:$3 sm:$0xff]  ;;  %v3499_v23 = vld [vmem:[%s4855_s13 + $0x78] ss:$3 sm:$0xff] }
  0x2f   : > { %4032 = vmatprep.mubr.msk.bf16.mxu1 %vm409_vm1, %v359_v12  ;;  %v403_v21 = vpack.c.bf16 %v3516_v20, %v3515_v19  ;;  %v361_v24 = vpack.c.bf16 %v3499_v23, %v3498_v22  ;;  %v3517_v25 = vld [vmem:[%s4855_s13 + $0x91] ss:$3 sm:$0xff]  ;;  %v3518_v26 = vld [vmem:[%s4855_s13 + $0xa9] ss:$3 sm:$0xff]  ;;  %v3500_v27 = vld [vmem:[%s4855_s13 + $0x90] ss:$3 sm:$0xff] }
  0x30   : > { %4015 = vmatmul.mubr.msk.bf16.vlgmr.msra.gmra.mxu0 %vm409_vm1, %v402_v13  ;;  %4033 = vmatmul.mubr.msk.bf16.vlgmr.msra.gmra.mxu1 %vm409_vm1, %v360_v17  ;;  %v3501_v28 = vld [vmem:[%s4855_s13 + $0xa8] ss:$3 sm:$0xff]  ;;  %v3519_v29 = vld [vmem:[%s4855_s13 + $0xc1] ss:$3 sm:$0xff]  ;;  %v3502_v31 = vld [vmem:[%s4855_s13 + $0xc0] ss:$3 sm:$0xff]  ;;  %v404_v33 = vpack.c.bf16 %v3518_v26, %v3517_v25 }
  0x31   : > { %4049 = vmatpush3.bf16.msra.mxu0 %v726_v18  ;;  %4018 = vmatprep.mubr.msk.bf16.mxu0 %vm409_vm1, %v403_v21  ;;  %v3520_v30 = vld [vmem:[%s4855_s13 + $0xd9] ss:$3 sm:$0xff]  ;;  %v3503_v32 = vld [vmem:[%s4855_s13 + $0xd8] ss:$3 sm:$0xff]  ;;  %v362_v34 = vpack.c.bf16 %v3501_v28, %v3500_v27  ;;  %v3521_v37 = vld [vmem:[%s4855_s13 + $0xf1] ss:$3 sm:$0xff] }
  0x32   : > { %4036 = vmatprep.mubr.msk.bf16.mxu1 %vm409_vm1, %v361_v24  ;;  %v405_v35 = vpack.c.bf16 %v3520_v30, %v3519_v29  ;;  %v363_v36 = vpack.c.bf16 %v3503_v32, %v3502_v31  ;;  %v3522_v38 = vld [vmem:[%s4855_s13 + $0x109] ss:$3 sm:$0xff]  ;;  %v3504_v39 = vld [vmem:[%s4855_s13 + $0xf0] ss:$3 sm:$0xff]  ;;  %v3505_v40 = vld [vmem:[%s4855_s13 + $0x108] ss:$3 sm:$0xff] }
  0x33   : > { %v3523_v41 = vld [vmem:[%s4855_s13 + $0x121] ss:$3 sm:$0xff]  ;;  %v3524_v42 = vld [vmem:[%s4855_s13 + $0x139] ss:$3 sm:$0xff]  ;;  %v3506_v43 = vld [vmem:[%s4855_s13 + $0x120] ss:$3 sm:$0xff]  ;;  %v406_v45 = vpack.c.bf16 %v3522_v38, %v3521_v37  ;;  %v364_v46 = vpack.c.bf16 %v3505_v40, %v3504_v39 }
  0x34   : > { %v3507_v44 = vld [vmem:[%s4855_s13 + $0x138] ss:$3 sm:$0xff]  ;;  %v407_v47 = vpack.c.bf16 %v3524_v42, %v3523_v41  ;;  %v3525_v49 = vld [vmem:[%s4855_s13 + $0x151] ss:$3 sm:$0xff]  ;;  %v3508_v51 = vld [vmem:[%s4855_s13 + $0x150] ss:$3 sm:$0xff] }
  0x35   : > { %v365_v48 = vpack.c.bf16 %v3507_v44, %v3506_v43  ;;  %v3526_v50 = vld [vmem:[%s4855_s13 + $0x169] ss:$3 sm:$0xff]  ;;  %v3509_v52 = vld [vmem:[%s4855_s13 + $0x168] ss:$3 sm:$0xff]  ;;  %v3547_v59 = vld [vmem:[%s4855_s13 + $0x4a] ss:$3 sm:$0xff] }
  0x36   : > { %v3544_v53 = vld [vmem:[%s4855_s13 + $0x2] ss:$3 sm:$0xff]  ;;  %v3545_v54 = vld [vmem:[%s4855_s13 + $0x1a] ss:$3 sm:$0xff]  ;;  %v408_v55 = vpack.c.bf16 %v3526_v50, %v3525_v49  ;;  %v366_v56 = vpack.c.bf16 %v3509_v52, %v3508_v51  ;;  %v3546_v58 = vld [vmem:[%s4855_s13 + $0x32] ss:$3 sm:$0xff] }
  0x37   : > { %v693_v57 = vpack.c.bf16 %v3545_v54, %v3544_v53  ;;  %v3548_v60 = vld [vmem:[%s4855_s13 + $0x62] ss:$3 sm:$0xff]  ;;  %v3549_v61 = vld [vmem:[%s4855_s13 + $0x7a] ss:$3 sm:$0xff]  ;;  %v694_v62 = vpack.c.bf16 %v3547_v59, %v3546_v58  ;;  %v3550_v1 = vld [vmem:[%s4855_s13 + $0x92] ss:$3 sm:$0xff] }
  0x38   : > { %4019 = vmatmul.mubr.msk.bf16.gmra.mxu0 %vm409_vm1, %v404_v33  ;;  %4037 = vmatmul.mubr.msk.bf16.gmra.mxu1 %vm409_vm1, %v362_v34  ;;  %v695_v63 = vpack.c.bf16 %v3549_v61, %v3548_v60  ;;  %v3551_v2 = vld [vmem:[%s4855_s13 + $0xaa] ss:$3 sm:$0xff]  ;;  %v3552_v3 = vld [vmem:[%s4855_s13 + $0xc2] ss:$3 sm:$0xff]  ;;  %v3553_v4 = vld [vmem:[%s4855_s13 + $0xda] ss:$3 sm:$0xff] }
  0x39   : > { %4022 = vmatprep.mubr.msk.bf16.mxu0 %vm409_vm1, %v405_v35  ;;  %4040 = vmatprep.mubr.msk.bf16.mxu1 %vm409_vm1, %v363_v36  ;;  %v696_v5 = vpack.c.bf16 %v3551_v2, %v3550_v1  ;;  %v697_v6 = vpack.c.bf16 %v3553_v4, %v3552_v3  ;;  %v3554_v7 = vld [vmem:[%s4855_s13 + $0xf2] ss:$3 sm:$0xff]  ;;  %v3555_v8 = vld [vmem:[%s4855_s13 + $0x10a] ss:$3 sm:$0xff]  ;;  %v3556_v9 = vld [vmem:[%s4855_s13 + $0x122] ss:$3 sm:$0xff] }
  0x3a   : > { %v3557_v10 = vld [vmem:[%s4855_s13 + $0x13a] ss:$3 sm:$0xff]  ;;  %v698_v11 = vpack.c.bf16 %v3555_v8, %v3554_v7  ;;  %v3558_v13 = vld [vmem:[%s4855_s13 + $0x152] ss:$3 sm:$0xff]  ;;  %v3559_v14 = vld [vmem:[%s4855_s13 + $0x16a] ss:$3 sm:$0xff] }
  0x3b   : > { %v699_v12 = vpack.c.bf16 %v3557_v10, %v3556_v9  ;;  %v700_v15 = vpack.c.bf16 %v3559_v14, %v3558_v13  ;;  %v4955_v54 = vld [vmem:[%s5830_s7] ss:$0 sm:$0xff]  ;;  %s3493_s19 = sshll.u32 %s311_s18, 2  ;;  %s3403_s12 = scalar_lea.sflag [#allocation9], %s311_s18 }
  0x3c   : > { %s313_s21 = scalar_lea.vmem [#allocation10], %s3493_s19  ;;  %s4733_s17 = smov [#allocation10]  }
  0x3d   : > { %s3416_s22 = sshll.u32 %s313_s21, 4  ;;  %s3417_s22 = int_to_ptr.vmem [resolvable:$true] %s3416_s22 }
  0x3e   : > { %s4660_s13 = scalar_lea.vmem %s3417_s22, 64 }
  0x3f   : > { %p4661_p6 = scmp.ne.s32.totalorder %s3417_s22, %s4660_s13 }
  0x40   : > { %4023 = vmatmul.mubr.msk.bf16.gmra.mxu0 %vm409_vm1, %v406_v45  ;;  %4041 = vmatmul.mubr.msk.bf16.gmra.mxu1 %vm409_vm1, %v364_v46 }
  0x41   : > { %4026 = vmatprep.mubr.msk.bf16.mxu0 %vm409_vm1, %v407_v47  ;;  %4044 = vmatprep.mubr.msk.bf16.mxu1 %vm409_vm1, %v365_v48  ;;  %p4662_p9 = pnand %p4661_p6, %p4817_p5 }
  0x43   : > { %p4663_p10 = pneg %p4662_p9 }
  0x48   : > { %4027 = vmatmul.mubr.msk.bf16.gmra.mxu0 %vm409_vm1, %v408_v55  ;;  %4045 = vmatmul.mubr.msk.bf16.gmra.mxu1 %vm409_vm1, %v366_v56 }
  0x49   : > { %4050 = vmatprep.mubr.msk.bf16.mxu0 %vm409_vm1, %v693_v57 }
  0x50   : > { %4051 = vmatmul.mubr.msk.bf16.vlgmr.msra.gmra.mxu0 %vm409_vm1, %v694_v62 }
  0x51   : > { %4054 = vmatprep.mubr.msk.bf16.mxu0 %vm409_vm1, %v695_v63 }
  0x58   : > { %4055 = vmatmul.mubr.msk.bf16.gmra.mxu0 %vm409_vm1, %v696_v5 }
  0x59   : > { %4058 = vmatprep.mubr.msk.bf16.mxu0 %vm409_vm1, %v697_v6 }
  0x60   : > { %4059 = vmatmul.mubr.msk.bf16.gmra.mxu0 %vm409_vm1, %v698_v11 }
  0x61   : > { %4062 = vmatprep.mubr.msk.bf16.mxu0 %vm409_vm1, %v699_v12 }
  0x68   : > { %4063 = vmatmul.mubr.msk.bf16.gmra.mxu0 %vm409_vm1, %v700_v15 }
  0xf0   : > { %v4016_v16 = vpop.f32.mrf.mxu0  ;;  %v4034_v17 = vpop.f32.mrf.mxu1 }
  0xf1   : > { %v605_v46 = vadd.f32 %v4034_v17, %v4016_v16 }
  0xf2   : > { %v472_v18 = vpop.f32.mrf.mxu0  ;;  %v596_v19 = vpop.f32.mrf.mxu1 }
  0xf3   : > { %v597_v44 = vadd.f32 %v596_v19, %v472_v18 }
  0xf4   : > { %v4017_v20 = vpop.f32.mrf.mxu0  ;;  %v4035_v21 = vpop.f32.mrf.mxu1 }
  0xf5   : > { %v608_v51 = vadd.f32 %v4035_v21, %v4017_v20 }
  0xf6   : > { %v475_v22 = vpop.f32.mrf.mxu0  ;;  %v599_v24 = vpop.f32.mrf.mxu1 }
  0xf7   : > { %v600_v47 = vadd.f32 %v599_v24, %v475_v22 }
  0xf8   : > { %v4020_v23 = vpop.f32.mrf.mxu0  ;;  %v4038_v27 = vpop.f32.mrf.mxu1 }
  0xf9   : > { %v621_v3 = vadd.f32 %v4038_v27, %v4020_v23 }
  0xfa   : > { %v488_v25 = vpop.f32.mrf.mxu0  ;;  %v612_v30 = vpop.f32.mrf.mxu1 }
  0xfb   : > { %v613_v56 = vadd.f32 %v612_v30, %v488_v25 }
  0xfc   : > { %v4021_v26 = vpop.f32.mrf.mxu0  ;;  %v4039_v33 = vpop.f32.mrf.mxu1 }
  0xfd   : > { %v624_v7 = vadd.f32 %v4039_v33, %v4021_v26 }
  0xfe   : > { %v491_v28 = vpop.f32.mrf.mxu0  ;;  %v615_v36 = vpop.f32.mrf.mxu1 }
  0xff   : > { %v616_v4 = vadd.f32 %v615_v36, %v491_v28 }
 0x100   : > { %v4024_v29 = vpop.f32.mrf.mxu0  ;;  %v4042_v39 = vpop.f32.mrf.mxu1 }
 0x101   : > { %v637_v25 = vadd.f32 %v4042_v39, %v4024_v29 }
 0x102   : > { %v504_v31 = vpop.f32.mrf.mxu0  ;;  %v628_v42 = vpop.f32.mrf.mxu1 }
 0x103   : > { %v629_v15 = vadd.f32 %v628_v42, %v504_v31 }
 0x104   : > { %v4025_v32 = vpop.f32.mrf.mxu0  ;;  %v4043_v49 = vpop.f32.mrf.mxu1 }
 0x105   : > { %v640_v30 = vadd.f32 %v4043_v49, %v4025_v32 }
 0x106   : > { %v507_v34 = vpop.f32.mrf.mxu0  ;;  %v631_v60 = vpop.f32.mrf.mxu1 }
 0x107   : > { %v632_v26 = vadd.f32 %v631_v60, %v507_v34 }
 0x108   : > { %v4944_v35 = vpop.f32.mrf.mxu0  ;;  %v4046_v8 = vpop.f32.mrf.mxu1 }
 0x10a   : > { %v4946_v37 = vpop.f32.mrf.mxu0  ;;  %v644_v19 = vpop.f32.mrf.mxu1 }
 0x10c   : > { %v4948_v38 = vpop.f32.mrf.mxu0  ;;  %v4047_v31 = vpop.f32.mrf.mxu1 }
 0x10e   : > { %v4950_v40 = vpop.f32.mrf.mxu0 }
 0x110   : > { %v4052_v41 = vpop.f32.mrf.mxu0 }
 0x111   : > { %v827_v52 = vadd.f32 %v4052_v41, %v605_v46  ;;  %v647_v46 = vpop.f32.mrf.mxu1 }
 0x112   : > { %v762_v43 = vpop.f32.mrf.mxu0 }
 0x113   : > { %v825_v48 = vadd.f32 %v762_v43, %v597_v44  ;;  %v4964_v62 = vadd.f32 %v4955_v54, %v827_v52  ;;  %v648_v52 = vadd.f32 %v647_v46, %v4950_v40 }
 0x114   : > { %v4053_v45 = vpop.f32.mrf.mxu0 }
 0x115   : > { %v4958_v57 = vadd.f32 %v4955_v54, %v825_v48  ;;  %v828_v58 = vadd.f32 %v4053_v45, %v608_v51  ;;  %v645_v45 = vadd.f32 %v644_v19, %v4946_v37  ;;  %v653_v51 = vadd.f32 %v4046_v8, %v4944_v35 }
 0x116   : > { %v765_v50 = vpop.f32.mrf.mxu0 }
 0x117   : > { %v826_v53 = vadd.f32 %v765_v50, %v600_v47  ;;  %v4969_v5 = vadd.f32 %v4955_v54, %v828_v58 }
 0x118   : > { %v4056_v55 = vpop.f32.mrf.mxu0 }
 0x119   : > { %v4961_v59 = vadd.f32 %v4955_v54, %v826_v53  ;;  %v831_v10 = vadd.f32 %v4056_v55, %v621_v3  ;;  %v656_v55 = vadd.f32 %v4047_v31, %v4948_v38 }
 0x11a   : > { %v778_v61 = vpop.f32.mrf.mxu0 }
 0x11b   : > { %v861_v63 = vadd.f32 %v4961_v59, %v4958_v57  ;;  %v829_v1 = vadd.f32 %v778_v61, %v613_v56  ;;  %v4981_v21 = vadd.f32 %v4955_v54, %v831_v10 }
 0x11c   : > { %v4057_v2 = vpop.f32.mrf.mxu0 }
 0x11d   : > { %v862_v6 = vadd.f32 %v861_v63, %v4964_v62  ;;  %v4973_v11 = vadd.f32 %v4955_v54, %v829_v1  ;;  %v832_v17 = vadd.f32 %v4057_v2, %v624_v7 }
 0x11e   : > { %v781_v9 = vpop.f32.mrf.mxu0 }
 0x11f   : > { %v863_v12 = vadd.f32 %v862_v6, %v4969_v5  ;;  %v830_v13 = vadd.f32 %v781_v9, %v616_v4  ;;  %v4985_v27 = vadd.f32 %v4955_v54, %v832_v17 }
 0x120   : > { %v4060_v14 = vpop.f32.mrf.mxu0 }
 0x121   : > { %v864_v16 = vadd.f32 %v863_v12, %v4973_v11  ;;  %v4978_v18 = vadd.f32 %v4955_v54, %v830_v13  ;;  %v835_v36 = vadd.f32 %v4060_v14, %v637_v25  ;;  %v320_v14 = vlaneseq }
 0x122   : > { %v794_v20 = vpop.f32.mrf.mxu0 }
 0x123   : > { %v865_v22 = vadd.f32 %v864_v16, %v4978_v18  ;;  %v833_v23 = vadd.f32 %v794_v20, %v629_v15  ;;  %v4998_v47 = vadd.f32 %v4955_v54, %v835_v36  ;;  %v321_v15 = vand.u32 127, %v320_v14 }
 0x124   : > { %v4061_v24 = vpop.f32.mrf.mxu0  ;;  %v890_v19 = vshrl.u32 %v320_v14, 7 }
 0x125   : > { %v866_v28 = vadd.f32 %v865_v22, %v4981_v21  ;;  %v4989_v41 = vadd.f32 %v4955_v54, %v833_v23  ;;  %v836_v34 = vadd.f32 %v4061_v24, %v640_v30 }
 0x126   : > { %v797_v33 = vpop.f32.mrf.mxu0  ;;  %v5030_v23 = vsub.s32 0, %v890_v19  ;;  %v4440_v19 = vld [vmem:[%s5825_s2 + $0x70] sm:$0xff]  }
 0x127   : > { %v867_v42 = vadd.f32 %v866_v28, %v4985_v27  ;;  %v834_v43 = vadd.f32 %v797_v33, %v632_v26  ;;  %v5004_v37 = vadd.f32 %v4955_v54, %v836_v34 }
 0x128   : > { %v4064_v44 = vpop.f32.mrf.mxu0 }
 0x129   : > { %v868_v29 = vadd.f32 %v867_v42, %v4989_v41  ;;  %v4995_v39 = vadd.f32 %v4955_v54, %v834_v43  ;;  %v839_v58 = vadd.f32 %v4064_v44, %v653_v51 }
 0x12a   : > { %v810_v32 = vpop.f32.mrf.mxu0 }
 0x12b   : > { %v869_v48 = vadd.f32 %v868_v29, %v4995_v39  ;;  %v837_v49 = vadd.f32 %v810_v32, %v645_v45  ;;  %v5015_v2 = vadd.f32 %v4955_v54, %v839_v58 }
 0x12c   : > { %v4065_v50 = vpop.f32.mrf.mxu0 }
 0x12d   : > { %v870_v53 = vadd.f32 %v869_v48, %v4998_v47  ;;  %v5009_v60 = vadd.f32 %v4955_v54, %v837_v49  ;;  %v840_v35 = vadd.f32 %v4065_v50, %v656_v55 }
 0x12e   : > { %v813_v56 = vpop.f32.mrf.mxu0 }
 0x12f   : > { %v871_v61 = vadd.f32 %v870_v53, %v5004_v37  ;;  %v838_v63 = vadd.f32 %v813_v56, %v648_v52  ;;  %v5018_v4 = vadd.f32 %v4955_v54, %v840_v35 }
 0x131   : > { %v872_v1 = vadd.f32 %v871_v61, %v5009_v60  ;;  %v858_v40 = vadd.f32 %v4955_v54, %v838_v63  ;;  %v322_v54 = vand.u32 1, %v321_v15 }
 0x133   : > { %v873_v3 = vadd.f32 %v872_v1, %v858_v40  ;;  %vm5024_vm2 = vcmp.eq.s32.totalorder %v322_v54, 0  ;;  %v4438_v54 = vld [vmem:[%s5825_s2 + $0x78] sm:$0xff]  }
 0x134   : > { %4066 = vmatprep.subr.bf16.mxu1 %v4438_v54 }
 0x135   : > { %v874_v38 = vadd.f32 %v873_v3, %v5015_v2  ;;  %4067 = vmatpush3.bf16.msra.mxu1 %v4438_v54 }
 0x136   : > { %4068 = vmatprep.subr.bf16.mxu1 %v4440_v19 }
 0x137   : > { %v875_v6 = vadd.f32 %v874_v38, %v5018_v4 }
 0x139   : > { %v876_v7 = vrot.slane %v875_v6, 4  ;;  %4069 = vmatpush3.bf16.msra.mxu1 %v4440_v19 }
 0x13b   : > { %v877_v8 = vadd.f32 %v876_v7, %v875_v6 }
 0x13d   : > { %v878_v9 = vrot.slane %v877_v8, 2 }
 0x13f   : > { %v879_v10 = vadd.f32 %v878_v9, %v877_v8 }
 0x141   : > { %v880_v12 = vrot.slane %v879_v10, 1 }
 0x143   : > { %v881_v13 = vadd.f32 %v880_v12, %v879_v10 }
 0x145   : > { %882 = vrot.lane.b32.xlu0 %v881_v13, %s4730_s25 }
 0x149   : > { %884 = vrot.lane.b32.xlu0 %v881_v13, %s4731_s26 }
 0x1b7   : > { %v883_v16 = vpop.permute.xlu0 %882 }
 0x1bb   : > { %v885_v20 = vpop.permute.xlu0 %884 }
 0x1bc   : > { %v886_v22 = vsel %vm5024_vm2, %v883_v16, %v885_v20  ;;  %v4439_v16 = vld [vmem:[%s5825_s2 + $0x38] sm:$0xff]   ;;  %v4441_v20 = vld [vmem:[%s5825_s2 + $0x30] sm:$0xff]  }
 0x1bd   : > { %v887_v24 = vadd.f32 %v886_v22, %v881_v13  ;;  %4090 = vmatprep.subr.bf16.mxu0 %v4439_v16  ;;  %v4442_v22 = vld [vmem:[%s5825_s2 + $0x68] sm:$0xff]  }
 0x1be   : > { %4091 = vmatpush3.bf16.msra.mxu0 %v4439_v16  ;;  %4070 = vmatprep.subr.bf16.mxu1 %v4442_v22 }
 0x1bf   : > { %v888_v25 = vmul.f32 0.00390625, %v887_v24  ;;  %4092 = vmatprep.subr.bf16.mxu0 %v4441_v20  ;;  %v4443_v24 = vld [vmem:[%s5825_s2 + $0x28] sm:$0xff]   ;;  %4071 = vmatpush3.bf16.msra.mxu1 %v4442_v22 }
 0x1c1   : > { %v892_v26 = vrot.slane %v888_v25, %v5030_v23  ;;  %v4444_v25 = vld [vmem:[%s5825_s2 + $0x60] sm:$0xff]  }
 0x1c2   : > { %4093 = vmatpush3.bf16.msra.mxu0 %v4441_v20  ;;  %4072 = vmatprep.subr.bf16.mxu1 %v4444_v25 }
 0x1c3   : > { %v5034_v28 = vsub.f32 %v4958_v57, %v892_v26  ;;  %v5037_v30 = vsub.f32 %v4961_v59, %v892_v26  ;;  %v5040_v31 = vsub.f32 %v4964_v62, %v892_v26  ;;  %v5047_v42 = vsub.f32 %v4969_v5, %v892_v26  ;;  %4094 = vmatprep.subr.bf16.mxu0 %v4443_v24 }
 0x1c4   : > { %v5050_v43 = vsub.f32 %v4973_v11, %v892_v26  ;;  %v5055_v44 = vsub.f32 %v4978_v18, %v892_v26  ;;  %v5060_v29 = vsub.f32 %v4981_v21, %v892_v26  ;;  %v5065_v11 = vsub.f32 %v4985_v27, %v892_v26  ;;  %4073 = vmatpush3.bf16.msra.mxu1 %v4444_v25 }
 0x1c5   : > { %v909_v33 = vmul.f32 %v5034_v28, %v5034_v28  ;;  %v910_v36 = vmul.f32 %v5037_v30, %v5037_v30  ;;  %v911_v57 = vmul.f32 %v5040_v31, %v5040_v31  ;;  %v912_v62 = vmul.f32 %v5047_v42, %v5047_v42 }
 0x1c6   : > { %v913_v5 = vmul.f32 %v5050_v43, %v5050_v43  ;;  %v914_v46 = vmul.f32 %v5055_v44, %v5055_v44  ;;  %v5070_v18 = vsub.f32 %v4989_v41, %v892_v26  ;;  %v915_v48 = vmul.f32 %v5060_v29, %v5060_v29  ;;  %4095 = vmatpush3.bf16.msra.mxu0 %v4443_v24 }
 0x1c7   : > { %v925_v59 = vadd.f32 %v910_v36, %v909_v33  ;;  %v5075_v21 = vsub.f32 %v4995_v39, %v892_v26  ;;  %v916_v50 = vmul.f32 %v5065_v11, %v5065_v11  ;;  %v5080_v27 = vsub.f32 %v4998_v47, %v892_v26  ;;  %v4446_v33 = vld [vmem:[%s5825_s2 + $0x58] sm:$0xff]  }
 0x1c8   : > { %v917_v52 = vmul.f32 %v5070_v18, %v5070_v18  ;;  %v5085_v41 = vsub.f32 %v5004_v37, %v892_v26  ;;  %v5090_v39 = vsub.f32 %v5009_v60, %v892_v26  ;;  %v5094_v47 = vsub.f32 %v858_v40, %v892_v26  ;;  %v4447_v36 = vld [vmem:[%s5825_s2 + $0x18] sm:$0xff]   ;;  %4074 = vmatprep.subr.bf16.mxu1 %v4446_v33 }
 0x1c9   : > { %v926_v45 = vadd.f32 %v925_v59, %v911_v57  ;;  %v918_v55 = vmul.f32 %v5075_v21, %v5075_v21  ;;  %v919_v58 = vmul.f32 %v5080_v27, %v5080_v27  ;;  %v5099_v37 = vsub.f32 %v5015_v2, %v892_v26  ;;  %v4448_v57 = vld [vmem:[%s5825_s2 + $0x50] sm:$0xff]   ;;  %4075 = vmatpush3.bf16.msra.mxu1 %v4446_v33 }
 0x1ca   : > { %v920_v63 = vmul.f32 %v5085_v41, %v5085_v41  ;;  %v921_v35 = vmul.f32 %v5090_v39, %v5090_v39  ;;  %v5104_v60 = vsub.f32 %v5018_v4, %v892_v26  ;;  %v922_v38 = vmul.f32 %v5094_v47, %v5094_v47  ;;  %v4445_v26 = vld [vmem:[%s5825_s2 + $0x20] sm:$0xff]   ;;  %v4449_v59 = vld [vmem:[%s5825_s2 + $0x10] sm:$0xff]   ;;  %4076 = vmatprep.subr.bf16.mxu1 %v4448_v57 }
 0x1cb   : > { %v927_v34 = vadd.f32 %v926_v45, %v912_v62  ;;  %v923_v40 = vmul.f32 %v5099_v37, %v5099_v37  ;;  %4096 = vmatprep.subr.bf16.mxu0 %v4445_v26  ;;  %v4450_v62 = vld [vmem:[%s5825_s2 + $0x48] sm:$0xff]  }
 0x1cc   : > { %v924_v8 = vmul.f32 %v5104_v60, %v5104_v60  ;;  %4097 = vmatpush3.bf16.msra.mxu0 %v4445_v26  ;;  %v4451_v45 = vld [vmem:[%s5825_s2 + $0x8] sm:$0xff]  }
 0x1cd   : > { %v928_v32 = vadd.f32 %v927_v34, %v913_v5  ;;  %4098 = vmatprep.subr.bf16.mxu0 %v4447_v36  ;;  %4077 = vmatpush3.bf16.msra.mxu1 %v4448_v57  ;;  %v4452_v5 = vld [vmem:[%s5825_s2 + $0x40] sm:$0xff]  }
 0x1ce   : > { %4078 = vmatprep.subr.bf16.mxu1 %v4450_v62  ;;  %v4453_v34 = vld [vmem:[%s5825_s2] sm:$0xff]  }
 0x1cf   : > { %v929_v49 = vadd.f32 %v928_v32, %v914_v46  ;;  %v5165_v46 = vld [vmem:[%s5825_s2 + $0xb8] sm:$0xff]  }
 0x1d0   : > { %4099 = vmatpush3.bf16.msra.mxu0 %v4447_v36 }
 0x1d1   : > { %v930_v51 = vadd.f32 %v929_v49, %v915_v48  ;;  %4100 = vmatprep.subr.bf16.mxu0 %v4449_v59  ;;  %4079 = vmatpush3.bf16.msra.mxu1 %v4450_v62 }
 0x1d2   : > { %4080 = vmatprep.subr.bf16.mxu1 %v4452_v5 }
 0x1d3   : > { %v931_v53 = vadd.f32 %v930_v51, %v916_v50 }
 0x1d4   : > { %4101 = vmatpush3.bf16.msra.mxu0 %v4449_v59 }
 0x1d5   : > { %v932_v56 = vadd.f32 %v931_v53, %v917_v52  ;;  %4102 = vmatprep.subr.bf16.mxu0 %v4451_v45  ;;  %4081 = vmatpush3.bf16.msra.mxu1 %v4452_v5 }
 0x1d6   : > { %4114 = vmatprep.subr.bf16.mxu1 %v5165_v46 }
 0x1d7   : > { %v933_v61 = vadd.f32 %v932_v56, %v918_v55  ;;  %v5174_v56 = vld [vmem:[%s5830_s7 + $0x6] ss:$0 sm:$0xff] }
 0x1d8   : > { %4103 = vmatpush3.bf16.msra.mxu0 %v4451_v45 }
 0x1d9   : > { %v934_v1 = vadd.f32 %v933_v61, %v919_v58  ;;  %4104 = vmatprep.subr.bf16.mxu0 %v4453_v34 }
 0x1db   : > { %v935_v3 = vadd.f32 %v934_v1, %v920_v63 }
 0x1dc   : > { %4105 = vmatpush3.bf16.msra.mxu0 %v4453_v34 }
 0x1dd   : > { %v936_v6 = vadd.f32 %v935_v3, %v921_v35  ;;  %v5183_v35 = vld [vmem:[%s5830_s7 + $0xc] ss:$0 sm:$0xff] }
 0x1df   : > { %v937_v7 = vadd.f32 %v936_v6, %v922_v38 }
 0x1e1   : > { %v938_v2 = vadd.f32 %v937_v7, %v923_v40 }
 0x1e3   : > { %v939_v9 = vadd.f32 %v938_v2, %v924_v8 }
 0x1e5   : > { %v940_v10 = vrot.slane %v939_v9, 4 }
 0x1e7   : > { %v941_v12 = vadd.f32 %v940_v10, %v939_v9 }
 0x1e9   : > { %v942_v13 = vrot.slane %v941_v12, 2 }
 0x1eb   : > { %v943_v14 = vadd.f32 %v942_v13, %v941_v12 }
 0x1ed   : > { %v944_v15 = vrot.slane %v943_v14, 1 }
 0x1ef   : > { %v945_v4 = vadd.f32 %v944_v15, %v943_v14 }
 0x1f1   : > { %946 = vrot.lane.b32.xlu1 %v945_v4, %s4730_s25 }
 0x1f5   : > { %948 = vrot.lane.b32.xlu1 %v945_v4, %s4731_s26 }
 0x263   : > { %v947_v32 = vpop.permute.xlu1 %946 }
 0x267   : > { %v949_v48 = vpop.permute.xlu1 %948 }
 0x268   : > { %v950_v49 = vsel %vm5024_vm2, %v947_v32, %v949_v48 }
 0x269   : > { %v951_v50 = vadd.f32 %v950_v49, %v945_v4 }
 0x26b   : > { %v952_v51 = vmul.f32 0.00390625, %v951_v50 }
 0x26d   : > { %v953_v52 = vadd.f32 1e-05, %v952_v51 }
 0x26f   : > { %4558 = vrsqrt.f32 %v953_v52 }
 0x27c   : > { %v4559_v53 = vpop.eup %4558 }
 0x27d   : > { %v958_v55 = vrot.slane %v4559_v53, %v5030_v23 }
 0x27f   : > { %v959_v58 = vmul.f32 %v958_v55, %v5034_v28  ;;  %v960_v61 = vmul.f32 %v958_v55, %v5037_v30  ;;  %v961_v63 = vmul.f32 %v958_v55, %v5040_v31  ;;  %v962_v1 = vmul.f32 %v958_v55, %v5047_v42 }
 0x280   : > { %v963_v3 = vmul.f32 %v958_v55, %v5050_v43  ;;  %v964_v38 = vmul.f32 %v958_v55, %v5055_v44  ;;  %v965_v6 = vmul.f32 %v958_v55, %v5060_v29  ;;  %v966_v40 = vmul.f32 %v958_v55, %v5065_v11 }
 0x281   : > { %v979_v28 = vmul.f32 %v5174_v56, %v959_v58  ;;  %v980_v30 = vmul.f32 %v5174_v56, %v960_v61  ;;  %v981_v31 = vmul.f32 %v5174_v56, %v961_v63  ;;  %v982_v42 = vmul.f32 %v5174_v56, %v962_v1 }
 0x282   : > { %v983_v7 = vmul.f32 %v5174_v56, %v963_v3  ;;  %v984_v8 = vmul.f32 %v5174_v56, %v964_v38  ;;  %v985_v43 = vmul.f32 %v5174_v56, %v965_v6  ;;  %v986_v44 = vmul.f32 %v5174_v56, %v966_v40 }
 0x283   : > { %v999_v29 = vadd.f32 %v5183_v35, %v979_v28  ;;  %v1000_v11 = vadd.f32 %v5183_v35, %v980_v30  ;;  %v5200_v2 = vadd.f32 %v5183_v35, %v981_v31  ;;  %v5203_v9 = vadd.f32 %v5183_v35, %v982_v42 }
 0x284   : > { %v5206_v10 = vadd.f32 %v5183_v35, %v983_v7  ;;  %v5209_v12 = vadd.f32 %v5183_v35, %v984_v8  ;;  %v5212_v13 = vadd.f32 %v5183_v35, %v985_v43  ;;  %v967_v54 = vmul.f32 %v958_v55, %v5070_v18 }
 0x285   : > { %v1031_v14 = vmul.f32 0.70710677, %v999_v29  ;;  %v1032_v15 = vmul.f32 0.70710677, %v1000_v11  ;;  %v1033_v4 = vmul.f32 0.70710677, %v5200_v2  ;;  %v5218_v19 = vadd.f32 %v5183_v35, %v986_v44 }
 0x286   : > { %v1034_v16 = vmul.f32 0.70710677, %v5203_v9  ;;  %v1035_v20 = vmul.f32 0.70710677, %v5206_v10  ;;  %v1036_v22 = vmul.f32 0.70710677, %v5209_v12  ;;  %v968_v25 = vmul.f32 %v958_v55, %v5075_v21 }
 0x287   : > { %4560 = verf.f32 %v1031_v14  ;;  %v1037_v24 = vmul.f32 0.70710677, %v5212_v13  ;;  %v969_v26 = vmul.f32 %v958_v55, %v5080_v27  ;;  %v970_v18 = vmul.f32 %v958_v55, %v5085_v41 }
 0x288   : > { %4562 = verf.f32 %v1032_v15  ;;  %v987_v33 = vmul.f32 %v5174_v56, %v967_v54  ;;  %v1038_v36 = vmul.f32 0.70710677, %v5218_v19  ;;  %v988_v57 = vmul.f32 %v5174_v56, %v968_v25 }
 0x289   : > { %4564 = verf.f32 %v1033_v4  ;;  %v971_v59 = vmul.f32 %v958_v55, %v5090_v39  ;;  %v989_v62 = vmul.f32 %v5174_v56, %v969_v26  ;;  %v990_v45 = vmul.f32 %v5174_v56, %v970_v18 }
 0x28a   : > { %4566 = verf.f32 %v1034_v16  ;;  %v5233_v21 = vadd.f32 %v5183_v35, %v987_v33  ;;  %v5236_v27 = vadd.f32 %v5183_v35, %v988_v57  ;;  %v972_v41 = vmul.f32 %v958_v55, %v5094_v47 }
 0x28b   : > { %4568 = verf.f32 %v1035_v20  ;;  %v973_v5 = vmul.f32 %v958_v55, %v5099_v37  ;;  %v5241_v34 = vadd.f32 %v5183_v35, %v989_v62  ;;  %v5244_v39 = vadd.f32 %v5183_v35, %v990_v45 }
 0x28c   : > { %4570 = verf.f32 %v1036_v22  ;;  %v974_v32 = vmul.f32 %v958_v55, %v5104_v60  ;;  %v1039_v48 = vmul.f32 0.70710677, %v5233_v21  ;;  %v1040_v49 = vmul.f32 0.70710677, %v5236_v27 }
 0x28d   : > { %4572 = verf.f32 %v1037_v24  ;;  %v1041_v50 = vmul.f32 0.70710677, %v5241_v34  ;;  %v1042_v47 = vmul.f32 0.70710677, %v5244_v39  ;;  %v991_v37 = vmul.f32 %v5174_v56, %v971_v59 }
 0x28e   : > { %4574 = verf.f32 %v1038_v36  ;;  %v992_v51 = vmul.f32 %v5174_v56, %v972_v41  ;;  %v993_v52 = vmul.f32 %v5174_v56, %v973_v5  ;;  %v994_v53 = vmul.f32 %v5174_v56, %v974_v32 }
 0x28f   : > { %4576 = verf.f32 %v1039_v48  ;;  %v5256_v60 = vadd.f32 %v5183_v35, %v991_v37  ;;  %v1015_v38 = vmul.f32 0.5, %v999_v29  ;;  %v1016_v30 = vmul.f32 0.5, %v1000_v11 }
 0x290   : > { %4578 = verf.f32 %v1040_v49  ;;  %v5259_v55 = vadd.f32 %v5183_v35, %v992_v51  ;;  %v5262_v58 = vadd.f32 %v5183_v35, %v993_v52  ;;  %v5265_v61 = vadd.f32 %v5183_v35, %v994_v53 }
 0x291   : > { %4580 = verf.f32 %v1041_v50  ;;  %v1043_v1 = vmul.f32 0.70710677, %v5256_v60  ;;  %v1017_v35 = vmul.f32 0.5, %v5200_v2  ;;  %v1018_v29 = vmul.f32 0.5, %v5203_v9 }
 0x292   : > { %4582 = verf.f32 %v1042_v47  ;;  %v1044_v6 = vmul.f32 0.70710677, %v5259_v55  ;;  %v1045_v40 = vmul.f32 0.70710677, %v5262_v58  ;;  %v1046_v42 = vmul.f32 0.70710677, %v5265_v61 }
 0x293   : > { %4584 = verf.f32 %v1043_v1  ;;  %v1019_v11 = vmul.f32 0.5, %v5206_v10  ;;  %v1020_v2 = vmul.f32 0.5, %v5209_v12  ;;  %v1021_v9 = vmul.f32 0.5, %v5212_v13 }
 0x294   : > { %v4561_v63 = vpop.eup %4560  ;;  %4586 = verf.f32 %v1044_v6  ;;  %v1022_v33 = vmul.f32 0.5, %v5218_v19  ;;  %v1023_v12 = vmul.f32 0.5, %v5233_v21  ;;  %v1024_v13 = vmul.f32 0.5, %v5236_v27 }
 0x295   : > { %v4563_v3 = vpop.eup %4562  ;;  %v1063_v56 = vadd.f32 1.0, %v4561_v63  ;;  %4588 = verf.f32 %v1045_v40  ;;  %v1025_v19 = vmul.f32 0.5, %v5241_v34  ;;  %v1026_v51 = vmul.f32 0.5, %v5244_v39 }
 0x296   : > { %v4565_v28 = vpop.eup %4564  ;;  %v1064_v31 = vadd.f32 1.0, %v4563_v3  ;;  %4590 = verf.f32 %v1046_v42  ;;  %v1027_v34 = vmul.f32 0.5, %v5256_v60  ;;  %v1028_v39 = vmul.f32 0.5, %v5259_v55  ;;  %v4455_v55 = vld [vmem:[%s5825_s2 + $0xb0] sm:$0xff]  }
 0x297   : > { %v4567_v7 = vpop.eup %4566  ;;  %v1065_v8 = vadd.f32 1.0, %v4565_v28  ;;  %v1079_v43 = vmul.f32 %v1063_v56, %v1015_v38 }
 0x298   : > { %v4569_v44 = vpop.eup %4568  ;;  %v1066_v14 = vadd.f32 1.0, %v4567_v7  ;;  %v1080_v15 = vmul.f32 %v1064_v31, %v1016_v30 }
 0x299   : > { %v4571_v4 = vpop.eup %4570  ;;  %v1081_v54 = vmul.f32 %v1065_v8, %v1017_v35  ;;  %1097 = vst [vmem:[#allocation2 + $0x1] sm:$0xff] %v1079_v43  ;;  %v1067_v16 = vadd.f32 1.0, %v4569_v44  ;;  %v1029_v35 = vmul.f32 0.5, %v5262_v58 }
 0x29a   : > { %v4573_v20 = vpop.eup %4572  ;;  %v1082_v22 = vmul.f32 %v1066_v14, %v1018_v29  ;;  %1098 = vst [vmem:[#allocation2 + $0x9] sm:$0xff] %v1080_v15  ;;  %v1068_v24 = vadd.f32 1.0, %v4571_v4  ;;  %v1030_v14 = vmul.f32 0.5, %v5265_v61 }
 0x29b   : > { %v4575_v25 = vpop.eup %4574  ;;  %1099 = vst [vmem:[#allocation2 + $0x11] sm:$0xff] %v1081_v54  ;;  %v1069_v26 = vadd.f32 1.0, %v4573_v20  ;;  %v1083_v18 = vmul.f32 %v1067_v16, %v1019_v11 }
 0x29c   : > { %1100 = vst [vmem:[#allocation2 + $0x19] sm:$0xff] %v1082_v22  ;;  %v1070_v36 = vadd.f32 1.0, %v4575_v25  ;;  %v1084_v57 = vmul.f32 %v1068_v24, %v1020_v2  ;;  %v4577_v10 = vpop.eup %4576  ;;  %v4456_v25 = vld [vmem:[%s5825_s2 + $0xa8] sm:$0xff]  }
 0x29d   : > { %v1085_v59 = vmul.f32 %v1069_v26, %v1021_v9  ;;  %1101 = vst [vmem:[#allocation2 + $0x21] sm:$0xff] %v1083_v18  ;;  %v4579_v62 = vpop.eup %4578  ;;  %v1071_v41 = vadd.f32 1.0, %v4577_v10 }
 0x29e   : > { %v1086_v45 = vmul.f32 %v1070_v36, %v1022_v33  ;;  %1102 = vst [vmem:[#allocation2 + $0x29] sm:$0xff] %v1084_v57  ;;  %v4581_v5 = vpop.eup %4580  ;;  %v1072_v32 = vadd.f32 1.0, %v4579_v62  ;;  %v4457_v57 = vld [vmem:[%s5825_s2 + $0xa0] sm:$0xff]  }
 0x29f   : > { %1103 = vst [vmem:[#allocation2 + $0x31] sm:$0xff] %v1085_v59  ;;  %v4583_v48 = vpop.eup %4582  ;;  %v1073_v49 = vadd.f32 1.0, %v4581_v5  ;;  %v1087_v50 = vmul.f32 %v1071_v41, %v1023_v12  ;;  %v4459_v12 = vld [vmem:[%s5825_s2 + $0x90] sm:$0xff]   ;;  %v4460_v41 = vld [vmem:[%s5825_s2 + $0x88] sm:$0xff]   ;;  %v4461_v5 = vld [vmem:[%s5825_s2 + $0x80] sm:$0xff]  }
 0x2a0   : > { %1104 = vst [vmem:[#allocation2 + $0x39] sm:$0xff] %v1086_v45  ;;  %v1074_v52 = vadd.f32 1.0, %v4583_v48  ;;  %v1088_v53 = vmul.f32 %v1072_v32, %v1024_v13  ;;  %v4585_v21 = vpop.eup %4584  ;;  %v4458_v45 = vld [vmem:[%s5825_s2 + $0x98] sm:$0xff]  }
 0x2a1   : > { %v1169_v47 = vld [vmem:[#allocation2 + $0x1] ss:$2 sm:$0xff]  ;;  %v1132_v37 = vld [vmem:[#allocation2] ss:$2 sm:$0xff]  ;;  %v1089_v63 = vmul.f32 %v1073_v49, %v1025_v19  ;;  %1105 = vst [vmem:[#allocation2 + $0x41] sm:$0xff] %v1087_v50  ;;  %v4587_v27 = vpop.eup %4586  ;;  %v1075_v40 = vadd.f32 1.0, %v4585_v21 }
 0x2a2   : > { %v1090_v38 = vmul.f32 %v1074_v52, %v1026_v51  ;;  %1106 = vst [vmem:[#allocation2 + $0x49] sm:$0xff] %v1088_v53  ;;  %v4589_v28 = vpop.eup %4588  ;;  %v1076_v42 = vadd.f32 1.0, %v4587_v27  ;;  %v1432_v18 = vld [vmem:[#allocation2 + $0x2] ss:$2 sm:$0xff] }
 0x2a3   : > { %v1171_v1 = vld [vmem:[#allocation2 + $0x11] ss:$2 sm:$0xff]  ;;  %v1134_v3 = vld [vmem:[#allocation2 + $0x10] ss:$2 sm:$0xff]  ;;  %1107 = vst [vmem:[#allocation2 + $0x51] sm:$0xff] %v1089_v63  ;;  %v4591_v7 = vpop.eup %4590  ;;  %v1077_v8 = vadd.f32 1.0, %v4589_v28  ;;  %v1091_v43 = vmul.f32 %v1075_v40, %v1027_v34 }
 0x2a4   : > { %v1184_v56 = vpack.c.bf16 %v1171_v1, %v1169_v47  ;;  %v1147_v6 = vpack.c.bf16 %v1134_v3, %v1132_v37  ;;  %1108 = vst [vmem:[#allocation2 + $0x59] sm:$0xff] %v1090_v38  ;;  %v1078_v60 = vadd.f32 1.0, %v4591_v7  ;;  %v1092_v15 = vmul.f32 %v1076_v42, %v1028_v39  ;;  %v1434_v33 = vld [vmem:[#allocation2 + $0x12] ss:$2 sm:$0xff] }
 0x2a5   : > { %v1173_v30 = vld [vmem:[#allocation2 + $0x21] ss:$2 sm:$0xff]  ;;  %v1136_v31 = vld [vmem:[#allocation2 + $0x20] ss:$2 sm:$0xff]  ;;  %v1093_v11 = vmul.f32 %v1077_v8, %v1029_v35  ;;  %1109 = vst [vmem:[#allocation2 + $0x61] sm:$0xff] %v1091_v43  ;;  %v1447_v62 = vpack.c.bf16 %v1434_v33, %v1432_v18 }
 0x2a6   : > { %4082 = vmatprep.mubr.bf16.mxu1 %v1184_v56  ;;  %4106 = vmatprep.mubr.bf16.mxu0 %v1147_v6  ;;  %v1094_v16 = vmul.f32 %v1078_v60, %v1030_v14  ;;  %1110 = vst [vmem:[#allocation2 + $0x69] sm:$0xff] %v1092_v15  ;;  %v1436_v13 = vld [vmem:[#allocation2 + $0x22] ss:$2 sm:$0xff] }
 0x2a7   : > { %v1175_v44 = vld [vmem:[#allocation2 + $0x31] ss:$2 sm:$0xff]  ;;  %v1138_v29 = vld [vmem:[#allocation2 + $0x30] ss:$2 sm:$0xff]  ;;  %1111 = vst [vmem:[#allocation2 + $0x71] sm:$0xff] %v1093_v11 }
 0x2a8   : > { %v1185_v4 = vpack.c.bf16 %v1175_v44, %v1173_v30  ;;  %v1148_v54 = vpack.c.bf16 %v1138_v29, %v1136_v31  ;;  %1112 = vst [vmem:[#allocation2 + $0x79] sm:$0xff] %v1094_v16  ;;  %v1438_v32 = vld [vmem:[#allocation2 + $0x32] ss:$2 sm:$0xff] }
 0x2a9   : > { %v1177_v58 = vld [vmem:[#allocation2 + $0x41] ss:$2 sm:$0xff]  ;;  %v1140_v20 = vld [vmem:[#allocation2 + $0x40] ss:$2 sm:$0xff]  ;;  %v1448_v49 = vpack.c.bf16 %v1438_v32, %v1436_v13 }
 0x2aa   : > { %4083 = vmatmul.mubr.bf16.vlgmr.msra.gmra.mxu1 %v1185_v4  ;;  %4107 = vmatmul.mubr.bf16.vlgmr.msra.gmra.mxu0 %v1148_v54  ;;  %v1440_v48 = vld [vmem:[#allocation2 + $0x42] ss:$2 sm:$0xff]  ;;  %v3627_v4 = vld [vmem:[%s5830_s7 + $0x1] ss:$0 sm:$0xff] }
 0x2ab   : > { %4115 = vmatpush3.bf16.msra.mxu1 %v5165_v46  ;;  %v1179_v61 = vld [vmem:[#allocation2 + $0x51] ss:$2 sm:$0xff]  ;;  %v1142_v22 = vld [vmem:[#allocation2 + $0x50] ss:$2 sm:$0xff] }
 0x2ac   : > { %4116 = vmatprep.subr.bf16.mxu1 %v4455_v55  ;;  %v1186_v2 = vpack.c.bf16 %v1179_v61, %v1177_v58  ;;  %v1149_v24 = vpack.c.bf16 %v1142_v22, %v1140_v20  ;;  %v1442_v19 = vld [vmem:[#allocation2 + $0x52] ss:$2 sm:$0xff] }
 0x2ad   : > { %v1181_v9 = vld [vmem:[#allocation2 + $0x61] ss:$2 sm:$0xff]  ;;  %v1144_v26 = vld [vmem:[#allocation2 + $0x60] ss:$2 sm:$0xff]  ;;  %v1449_v50 = vpack.c.bf16 %v1442_v19, %v1440_v48 }
 0x2ae   : > { %4086 = vmatprep.mubr.bf16.mxu1 %v1186_v2  ;;  %4110 = vmatprep.mubr.bf16.mxu0 %v1149_v24  ;;  %v1444_v47 = vld [vmem:[#allocation2 + $0x62] ss:$2 sm:$0xff] }
 0x2af   : > { %4117 = vmatpush3.bf16.msra.mxu1 %v4455_v55  ;;  %v1183_v36 = vld [vmem:[#allocation2 + $0x71] ss:$2 sm:$0xff]  ;;  %v1146_v46 = vld [vmem:[#allocation2 + $0x70] ss:$2 sm:$0xff] }
 0x2b0   : > { %4118 = vmatprep.subr.bf16.mxu1 %v4456_v25  ;;  %v1187_v10 = vpack.c.bf16 %v1183_v36, %v1181_v9  ;;  %v1150_v59 = vpack.c.bf16 %v1146_v46, %v1144_v26  ;;  %v1446_v37 = vld [vmem:[#allocation2 + $0x72] ss:$2 sm:$0xff] }
 0x2b1   : > { %v1450_v51 = vpack.c.bf16 %v1446_v37, %v1444_v47 }
 0x2b2   : > { %4087 = vmatmul.mubr.bf16.gmra.mxu1 %v1187_v10  ;;  %4111 = vmatmul.mubr.bf16.gmra.mxu0 %v1150_v59 }
 0x2b3   : > { %4119 = vmatpush3.bf16.msra.mxu1 %v4456_v25  ;;  %4130 = vmatprep.mubr.bf16.mxu1 %v1447_v62 }
 0x2b4   : > { %4120 = vmatprep.subr.bf16.mxu1 %v4457_v57 }
 0x2b7   : > { %4121 = vmatpush3.bf16.msra.mxu1 %v4457_v57 }
 0x2b8   : > { %4122 = vmatprep.subr.bf16.mxu1 %v4458_v45 }
 0x2bb   : > { %4123 = vmatpush3.bf16.msra.mxu1 %v4458_v45 }
 0x2bc   : > { %4124 = vmatprep.subr.bf16.mxu1 %v4459_v12 }
 0x2bf   : > { %4125 = vmatpush3.bf16.msra.mxu1 %v4459_v12 }
 0x2c0   : > { %4126 = vmatprep.subr.bf16.mxu1 %v4460_v41 }
 0x2c3   : > { %4127 = vmatpush3.bf16.msra.mxu1 %v4460_v41 }
 0x2c4   : > { %4128 = vmatprep.subr.bf16.mxu1 %v4461_v5 }
 0x2c7   : > { %4129 = vmatpush3.bf16.msra.mxu1 %v4461_v5 }
 0x2ca   : > { %4131 = vmatmul.mubr.bf16.vlgmr.msra.gmra.mxu1 %v1448_v49 }
 0x2cb   : > { %4134 = vmatprep.mubr.bf16.mxu1 %v1449_v50 }
 0x2d2   : > { %4135 = vmatmul.mubr.bf16.gmra.mxu1 %v1450_v51 }
 0x36a   : > { %v4084_v52 = vpop.f32.mrf.mxu1  ;;  %v4108_v21 = vpop.f32.mrf.mxu0 }
 0x36b   : > { %v1392_v35 = vadd.f32 %v4108_v21, %v4084_v52 }
 0x36c   : > { %v1270_v53 = vpop.f32.mrf.mxu1  ;;  %v1383_v3 = vpop.f32.mrf.mxu0 }
 0x36d   : > { %v1384_v42 = vadd.f32 %v1383_v3, %v1270_v53 }
 0x36e   : > { %v4085_v63 = vpop.f32.mrf.mxu1  ;;  %v4109_v27 = vpop.f32.mrf.mxu0 }
 0x36f   : > { %v1395_v14 = vadd.f32 %v4109_v27, %v4085_v63 }
 0x370   : > { %v1273_v1 = vpop.f32.mrf.mxu1  ;;  %v1386_v6 = vpop.f32.mrf.mxu0 }
 0x371   : > { %v1387_v8 = vadd.f32 %v1386_v6, %v1273_v1 }
 0x372   : > { %v4088_v38 = vpop.f32.mrf.mxu1  ;;  %v4112_v40 = vpop.f32.mrf.mxu0 }
 0x373   : > { %v1408_v9 = vadd.f32 %v4112_v40, %v4088_v38 }
 0x374   : > { %v1286_v56 = vpop.f32.mrf.mxu1  ;;  %v1399_v31 = vpop.f32.mrf.mxu0 }
 0x375   : > { %v1400_v55 = vadd.f32 %v1399_v31, %v1286_v56 }
 0x376   : > { %v4089_v34 = vpop.f32.mrf.mxu1  ;;  %v4113_v44 = vpop.f32.mrf.mxu0 }
 0x377   : > { %v1411_v36 = vadd.f32 %v4113_v44, %v4089_v34 }
 0x378   : > { %v1289_v28 = vpop.f32.mrf.mxu1  ;;  %v1402_v20 = vpop.f32.mrf.mxu0 }
 0x379   : > { %v1403_v26 = vadd.f32 %v1402_v20, %v1289_v28 }
 0x38a   : > { %v4132_v30 = vpop.f32.mrf.mxu1 }
 0x38b   : > { %v1566_v60 = vadd.f32 %v4132_v30, %v1392_v35 }
 0x38c   : > { %v1533_v39 = vpop.f32.mrf.mxu1 }
 0x38d   : > { %v1564_v43 = vadd.f32 %v1533_v39, %v1384_v42  ;;  %v1578_v22 = vadd.f32 %v3627_v4, %v1566_v60 }
 0x38e   : > { %v4133_v7 = vpop.f32.mrf.mxu1 }
 0x38f   : > { %v1576_v11 = vadd.f32 %v3627_v4, %v1564_v43  ;;  %v1567_v16 = vadd.f32 %v4133_v7, %v1395_v14 }
 0x390   : > { %v1536_v29 = vpop.f32.mrf.mxu1 }
 0x391   : > { %v1565_v15 = vadd.f32 %v1536_v29, %v1387_v8  ;;  %v1579_v18 = vadd.f32 %v3627_v4, %v1567_v16 }
 0x392   : > { %v4136_v54 = vpop.f32.mrf.mxu1 }
 0x393   : > { %v1577_v58 = vadd.f32 %v3627_v4, %v1565_v15  ;;  %v1570_v57 = vadd.f32 %v4136_v54, %v1408_v9  ;;  %v4464_v9 = vld [vmem:[%s5826_s3 + $0x70] sm:$0xff]  }
 0x394   : > { %v1549_v61 = vpop.f32.mrf.mxu1 }
 0x395   : > { %v1584_v2 = vadd.f32 %v1577_v58, %v1576_v11  ;;  %v1568_v24 = vadd.f32 %v1549_v61, %v1400_v55  ;;  %v1582_v5 = vadd.f32 %v3627_v4, %v1570_v57  ;;  %v4470_v57 = vld [vmem:[%s5826_s3 + $0x58] sm:$0xff]  }
 0x396   : > { %v4137_v25 = vpop.f32.mrf.mxu1 }
 0x397   : > { %v1585_v33 = vadd.f32 %v1584_v2, %v1578_v22  ;;  %v1580_v10 = vadd.f32 %v3627_v4, %v1568_v24  ;;  %v1571_v12 = vadd.f32 %v4137_v25, %v1411_v36  ;;  %v4462_v24 = vld [vmem:[%s5826_s3 + $0x78] sm:$0xff]   ;;  %v4468_v36 = vld [vmem:[%s5826_s3 + $0x60] sm:$0xff]  }
 0x398   : > { %v1552_v46 = vpop.f32.mrf.mxu1  ;;  %v4463_v25 = vld [vmem:[%s5826_s3 + $0x38] sm:$0xff]   ;;  %4138 = vmatprep.subr.bf16.mxu0 %v4462_v24 }
 0x399   : > { %v1586_v59 = vadd.f32 %v1585_v33, %v1579_v18  ;;  %v1569_v62 = vadd.f32 %v1552_v46, %v1403_v26  ;;  %v1583_v32 = vadd.f32 %v3627_v4, %v1571_v12  ;;  %v4465_v26 = vld [vmem:[%s5826_s3 + $0x30] sm:$0xff]   ;;  %4158 = vmatprep.subr.bf16.mxu1 %v4463_v25  ;;  %4139 = vmatpush3.bf16.msra.mxu0 %v4462_v24  ;;  %v4467_v33 = vld [vmem:[%s5826_s3 + $0x28] sm:$0xff]   ;;  %v4469_v46 = vld [vmem:[%s5826_s3 + $0x20] sm:$0xff]  }
 0x39a   : > { %4159 = vmatpush3.bf16.msra.mxu1 %v4463_v25  ;;  %4140 = vmatprep.subr.bf16.mxu0 %v4464_v9  ;;  %v4475_v12 = vld [vmem:[%s5826_s3 + $0x8] sm:$0xff]  }
 0x39b   : > { %v1587_v45 = vadd.f32 %v1586_v59, %v1580_v10  ;;  %v1581_v41 = vadd.f32 %v3627_v4, %v1569_v62  ;;  %4160 = vmatprep.subr.bf16.mxu1 %v4465_v26  ;;  %v4472_v59 = vld [vmem:[%s5826_s3 + $0x50] sm:$0xff]  }
 0x39c   : > { %v4473_v62 = vld [vmem:[%s5826_s3 + $0x10] sm:$0xff]  }
 0x39d   : > { %v1588_v13 = vadd.f32 %v1587_v45, %v1581_v41  ;;  %4141 = vmatpush3.bf16.msra.mxu0 %v4464_v9  ;;  %v4474_v45 = vld [vmem:[%s5826_s3 + $0x48] sm:$0xff]  }
 0x39e   : > { %4161 = vmatpush3.bf16.msra.mxu1 %v4465_v26 }
 0x39f   : > { %v1589_v48 = vadd.f32 %v1588_v13, %v1582_v5  ;;  %4162 = vmatprep.subr.bf16.mxu1 %v4467_v33  ;;  %v5401_v13 = vld [vmem:[%s5826_s3 + $0xb8] sm:$0xff]  }
 0x3a1   : > { %v1590_v19 = vadd.f32 %v1589_v48, %v1583_v32 }
 0x3a2   : > { %4163 = vmatpush3.bf16.msra.mxu1 %v4467_v33 }
 0x3a3   : > { %v1591_v49 = vrot.slane %v1590_v19, 4  ;;  %4164 = vmatprep.subr.bf16.mxu1 %v4469_v46 }
 0x3a5   : > { %v1592_v50 = vadd.f32 %v1591_v49, %v1590_v19 }
 0x3a6   : > { %4165 = vmatpush3.bf16.msra.mxu1 %v4469_v46 }
 0x3a7   : > { %v1593_v47 = vrot.slane %v1592_v50, 2 }
 0x3a9   : > { %v1594_v37 = vadd.f32 %v1593_v47, %v1592_v50 }
 0x3ab   : > { %v1595_v51 = vrot.slane %v1594_v37, 1 }
 0x3ad   : > { %v1596_v52 = vadd.f32 %v1595_v51, %v1594_v37 }
 0x3af   : > { %1599 = vrot.lane.b32.xlu1 %v1596_v52, %s4731_s26  ;;  %1597 = vrot.lane.b32.xlu0 %v1596_v52, %s4730_s25 }
 0x421   : > { %v1600_v53 = vpop.permute.xlu1 %1599  ;;  %v1598_v63 = vpop.permute.xlu0 %1597 }
 0x422   : > { %v1601_v21 = vsel %vm5024_vm2, %v1598_v63, %v1600_v53 }
 0x423   : > { %v1602_v1 = vadd.f32 %v1601_v21, %v1596_v52  ;;  %v3628_v52 = vld [vmem:[%s5830_s7 + $0x7] ss:$0 sm:$0xff] }
 0x425   : > { %v1603_v3 = vmul.f32 0.0078125, %v1602_v1 }
 0x427   : > { %v1607_v38 = vrot.slane %v1603_v3, %v5030_v23 }
 0x429   : > { %v5315_v27 = vsub.f32 %v1576_v11, %v1607_v38  ;;  %v5317_v56 = vsub.f32 %v1577_v58, %v1607_v38  ;;  %v5319_v6 = vsub.f32 %v1578_v22, %v1607_v38  ;;  %v5321_v34 = vsub.f32 %v1579_v18, %v1607_v38  ;;  %v4466_v18 = vld [vmem:[%s5826_s3 + $0x68] sm:$0xff]  }
 0x42a   : > { %v5327_v30 = vsub.f32 %v1580_v10, %v1607_v38  ;;  %v5331_v42 = vsub.f32 %v1581_v41, %v1607_v38  ;;  %v5335_v8 = vsub.f32 %v1582_v5, %v1607_v38  ;;  %v5339_v29 = vsub.f32 %v1583_v32, %v1607_v38  ;;  %4142 = vmatprep.subr.bf16.mxu0 %v4466_v18  ;;  %v4471_v10 = vld [vmem:[%s5826_s3 + $0x18] sm:$0xff]   ;;  %v4476_v41 = vld [vmem:[%s5826_s3 + $0x40] sm:$0xff]  }
 0x42b   : > { %v1616_v40 = vmul.f32 %v5315_v27, %v5315_v27  ;;  %v1617_v28 = vmul.f32 %v5317_v56, %v5317_v56  ;;  %v1618_v31 = vmul.f32 %v5319_v6, %v5319_v6  ;;  %v1619_v7 = vmul.f32 %v5321_v34, %v5321_v34  ;;  %4143 = vmatpush3.bf16.msra.mxu0 %v4466_v18  ;;  %v4477_v5 = vld [vmem:[%s5826_s3] sm:$0xff]  }
 0x42c   : > { %v1620_v43 = vmul.f32 %v5327_v30, %v5327_v30  ;;  %v1621_v14 = vmul.f32 %v5331_v42, %v5331_v42  ;;  %v1622_v15 = vmul.f32 %v5335_v8, %v5335_v8  ;;  %v1623_v54 = vmul.f32 %v5339_v29, %v5339_v29  ;;  %4144 = vmatprep.subr.bf16.mxu0 %v4468_v36 }
 0x42d   : > { %v1624_v39 = vadd.f32 %v1617_v28, %v1616_v40  ;;  %4166 = vmatprep.subr.bf16.mxu1 %v4471_v10 }
 0x42e   : > { %4167 = vmatpush3.bf16.msra.mxu1 %v4471_v10 }
 0x42f   : > { %v1625_v35 = vadd.f32 %v1624_v39, %v1618_v31  ;;  %4145 = vmatpush3.bf16.msra.mxu0 %v4468_v36  ;;  %4168 = vmatprep.subr.bf16.mxu1 %v4473_v62 }
 0x430   : > { %4146 = vmatprep.subr.bf16.mxu0 %v4470_v57 }
 0x431   : > { %v1626_v44 = vadd.f32 %v1625_v35, %v1619_v7 }
 0x432   : > { %4169 = vmatpush3.bf16.msra.mxu1 %v4473_v62 }
 0x433   : > { %v1627_v60 = vadd.f32 %v1626_v44, %v1620_v43  ;;  %4147 = vmatpush3.bf16.msra.mxu0 %v4470_v57  ;;  %4170 = vmatprep.subr.bf16.mxu1 %v4475_v12 }
 0x434   : > { %4148 = vmatprep.subr.bf16.mxu0 %v4472_v59 }
 0x435   : > { %v1628_v4 = vadd.f32 %v1627_v60, %v1621_v14 }
 0x436   : > { %4171 = vmatpush3.bf16.msra.mxu1 %v4475_v12 }
 0x437   : > { %v1629_v55 = vadd.f32 %v1628_v4, %v1622_v15  ;;  %4149 = vmatpush3.bf16.msra.mxu0 %v4472_v59  ;;  %4172 = vmatprep.subr.bf16.mxu1 %v4477_v5 }
 0x438   : > { %4150 = vmatprep.subr.bf16.mxu0 %v4474_v45 }
 0x439   : > { %v1630_v11 = vadd.f32 %v1629_v55, %v1623_v54 }
 0x43a   : > { %4173 = vmatpush3.bf16.msra.mxu1 %v4477_v5 }
 0x43b   : > { %v1631_v16 = vrot.slane %v1630_v11, 4  ;;  %4151 = vmatpush3.bf16.msra.mxu0 %v4474_v45  ;;  %4198 = vmatprep.subr.bf16.mxu1 %v4729_v0 }
 0x43c   : > { %4152 = vmatprep.subr.bf16.mxu0 %v4476_v41 }
 0x43d   : > { %v1632_v58 = vadd.f32 %v1631_v16, %v1630_v11 }
 0x43f   : > { %v1633_v20 = vrot.slane %v1632_v58, 2  ;;  %4153 = vmatpush3.bf16.msra.mxu0 %v4476_v41 }
 0x440   : > { %4178 = vmatprep.subr.bf16.mxu0 %v5401_v13 }
 0x441   : > { %v1634_v61 = vadd.f32 %v1633_v20, %v1632_v58 }
 0x443   : > { %v1635_v22 = vrot.slane %v1634_v61, 1 }
 0x445   : > { %v1636_v2 = vadd.f32 %v1635_v22, %v1634_v61 }
 0x447   : > { %1639 = vrot.lane.b32.xlu1 %v1636_v2, %s4731_s26  ;;  %1637 = vrot.lane.b32.xlu0 %v1636_v2, %s4730_s25 }
 0x4b9   : > { %v1640_v32 = vpop.permute.xlu1 %1639  ;;  %v1638_v48 = vpop.permute.xlu0 %1637 }
 0x4ba   : > { %v1641_v19 = vsel %vm5024_vm2, %v1638_v48, %v1640_v32 }
 0x4bb   : > { %v1642_v49 = vadd.f32 %v1641_v19, %v1636_v2 }
 0x4bd   : > { %v1643_v50 = vmul.f32 0.0078125, %v1642_v49 }
 0x4bf   : > { %v1644_v47 = vadd.f32 1e-05, %v1643_v50 }
 0x4c1   : > { %4592 = vrsqrt.f32 %v1644_v47 }
 0x4ce   : > { %v4593_v37 = vpop.eup %4592 }
 0x4cf   : > { %v1649_v51 = vrot.slane %v4593_v37, %v5030_v23 }
 0x4d1   : > { %v1654_v53 = vmul.f32 %v1649_v51, %v5327_v30  ;;  %v1655_v63 = vmul.f32 %v1649_v51, %v5331_v42  ;;  %v1656_v21 = vmul.f32 %v1649_v51, %v5335_v8  ;;  %v1657_v1 = vmul.f32 %v1649_v51, %v5339_v29  ;;  %v3629_v30 = vld [vmem:[%s5830_s7 + $0xd] ss:$0 sm:$0xff] }
 0x4d2   : > { %v1650_v3 = vmul.f32 %v1649_v51, %v5315_v27  ;;  %v1651_v38 = vmul.f32 %v1649_v51, %v5317_v56  ;;  %v1652_v40 = vmul.f32 %v1649_v51, %v5319_v6  ;;  %v1653_v28 = vmul.f32 %v1649_v51, %v5321_v34 }
 0x4d3   : > { %v1666_v31 = vmul.f32 %v3628_v52, %v1654_v53  ;;  %v1667_v39 = vmul.f32 %v3628_v52, %v1655_v63  ;;  %v1668_v43 = vmul.f32 %v3628_v52, %v1656_v21  ;;  %v1669_v44 = vmul.f32 %v3628_v52, %v1657_v1 }
 0x4d4   : > { %v1662_v7 = vmul.f32 %v3628_v52, %v1650_v3  ;;  %v1663_v42 = vmul.f32 %v3628_v52, %v1651_v38  ;;  %v1664_v35 = vmul.f32 %v3628_v52, %v1652_v40  ;;  %v1665_v8 = vmul.f32 %v3628_v52, %v1653_v28 }
 0x4d5   : > { %v1678_v60 = vadd.f32 %v3629_v30, %v1666_v31  ;;  %v1679_v6 = vadd.f32 %v3629_v30, %v1667_v39  ;;  %v1680_v54 = vadd.f32 %v3629_v30, %v1668_v43  ;;  %v1681_v11 = vadd.f32 %v3629_v30, %v1669_v44 }
 0x4d6   : > { %v1674_v29 = vadd.f32 %v3629_v30, %v1662_v7  ;;  %v1675_v27 = vadd.f32 %v3629_v30, %v1663_v42  ;;  %v1676_v14 = vadd.f32 %v3629_v30, %v1664_v35  ;;  %v1677_v56 = vadd.f32 %v3629_v30, %v1665_v8 }
 0x4d7   : > { %v1694_v16 = vmul.f32 0.70710677, %v1678_v60  ;;  %v1695_v58 = vmul.f32 0.70710677, %v1679_v6  ;;  %v1696_v20 = vmul.f32 0.70710677, %v1680_v54 }
 0x4d8   : > { %v1690_v15 = vmul.f32 0.70710677, %v1674_v29  ;;  %v1691_v34 = vmul.f32 0.70710677, %v1675_v27  ;;  %v1692_v4 = vmul.f32 0.70710677, %v1676_v14 }
 0x4d9   : > { %v1693_v55 = vmul.f32 0.70710677, %v1677_v56  ;;  %v1697_v61 = vmul.f32 0.70710677, %v1681_v11  ;;  %v1682_v24 = vmul.f32 0.5, %v1674_v29  ;;  %v1683_v26 = vmul.f32 0.5, %v1675_v27 }
 0x4da   : > { %4594 = verf.f32 %v1690_v15  ;;  %v1684_v36 = vmul.f32 0.5, %v1676_v14  ;;  %v1685_v59 = vmul.f32 0.5, %v1677_v56  ;;  %v1686_v5 = vmul.f32 0.5, %v1678_v60  ;;  %v4479_v14 = vld [vmem:[%s5826_s3 + $0xb0] sm:$0xff]   ;;  %v4480_v60 = vld [vmem:[%s5826_s3 + $0xa8] sm:$0xff]   ;;  %v4482_v15 = vld [vmem:[%s5826_s3 + $0x98] sm:$0xff]  }
 0x4db   : > { %4596 = verf.f32 %v1691_v34  ;;  %v1687_v49 = vmul.f32 0.5, %v1679_v6  ;;  %v1688_v37 = vmul.f32 0.5, %v1680_v54  ;;  %v1689_v53 = vmul.f32 0.5, %v1681_v11  ;;  %v4481_v6 = vld [vmem:[%s5826_s3 + $0xa0] sm:$0xff]   ;;  %v4484_v34 = vld [vmem:[%s5826_s3 + $0x88] sm:$0xff]  }
 0x4dc   : > { %4598 = verf.f32 %v1692_v4  ;;  %v4485_v4 = vld [vmem:[%s5826_s3 + $0x80] sm:$0xff]  }
 0x4dd   : > { %4600 = verf.f32 %v1693_v55 }
 0x4de   : > { %4602 = verf.f32 %v1694_v16 }
 0x4df   : > { %4604 = verf.f32 %v1695_v58 }
 0x4e0   : > { %4606 = verf.f32 %v1696_v20 }
 0x4e1   : > { %4608 = verf.f32 %v1697_v61 }
 0x4e7   : > { %v4595_v22 = vpop.eup %4594 }
 0x4e8   : > { %v4597_v2 = vpop.eup %4596  ;;  %v1706_v25 = vadd.f32 1.0, %v4595_v22 }
 0x4e9   : > { %v4599_v9 = vpop.eup %4598  ;;  %v1707_v18 = vadd.f32 1.0, %v4597_v2 }
 0x4ea   : > { %v4601_v33 = vpop.eup %4600  ;;  %v1708_v46 = vadd.f32 1.0, %v4599_v9  ;;  %v1714_v57 = vmul.f32 %v1706_v25, %v1682_v24 }
 0x4eb   : > { %v4603_v10 = vpop.eup %4602  ;;  %v1709_v62 = vadd.f32 1.0, %v4601_v33  ;;  %v1715_v45 = vmul.f32 %v1707_v18, %v1683_v26 }
 0x4ec   : > { %v4605_v12 = vpop.eup %4604  ;;  %v1716_v41 = vmul.f32 %v1708_v46, %v1684_v36  ;;  %1724 = vst [vmem:[#allocation3 + $0x1] sm:$0xff] %v1714_v57  ;;  %v1710_v32 = vadd.f32 1.0, %v4603_v10 }
 0x4ed   : > { %v4607_v48 = vpop.eup %4606  ;;  %v1717_v19 = vmul.f32 %v1709_v62, %v1685_v59  ;;  %1725 = vst [vmem:[#allocation3 + $0x9] sm:$0xff] %v1715_v45  ;;  %v1711_v50 = vadd.f32 1.0, %v4605_v12  ;;  %v3686_v12 = vld [vmem:[%s5830_s7 + $0x2] ss:$0 sm:$0xff] }
 0x4ee   : > { %v4609_v47 = vpop.eup %4608  ;;  %1726 = vst [vmem:[#allocation3 + $0x11] sm:$0xff] %v1716_v41  ;;  %v1712_v51 = vadd.f32 1.0, %v4607_v48  ;;  %v1718_v52 = vmul.f32 %v1710_v32, %v1686_v5 }
 0x4ef   : > { %1727 = vst [vmem:[#allocation3 + $0x19] sm:$0xff] %v1717_v19  ;;  %v1713_v63 = vadd.f32 1.0, %v4609_v47  ;;  %v1719_v21 = vmul.f32 %v1711_v50, %v1687_v49 }
 0x4f0   : > { %v1720_v1 = vmul.f32 %v1712_v51, %v1688_v37  ;;  %1728 = vst [vmem:[#allocation3 + $0x21] sm:$0xff] %v1718_v52 }
 0x4f1   : > { %v1721_v3 = vmul.f32 %v1713_v63, %v1689_v53  ;;  %1729 = vst [vmem:[#allocation3 + $0x29] sm:$0xff] %v1719_v21 }
 0x4f2   : > { %1730 = vst [vmem:[#allocation3 + $0x31] sm:$0xff] %v1720_v1 }
 0x4f3   : > { %1731 = vst [vmem:[#allocation3 + $0x39] sm:$0xff] %v1721_v3 }
 0x4f4   : > { %v1778_v38 = vld [vmem:[#allocation3 + $0x1] ss:$2 sm:$0xff]  ;;  %v1751_v40 = vld [vmem:[#allocation3] ss:$2 sm:$0xff] }
 0x4f5   : > { %v1999_v35 = vld [vmem:[#allocation3 + $0x2] ss:$2 sm:$0xff] }
 0x4f6   : > { %v1780_v28 = vld [vmem:[#allocation3 + $0x11] ss:$2 sm:$0xff]  ;;  %v1753_v31 = vld [vmem:[#allocation3 + $0x10] ss:$2 sm:$0xff] }
 0x4f7   : > { %v1785_v39 = vpack.c.bf16 %v1780_v28, %v1778_v38  ;;  %v1758_v30 = vpack.c.bf16 %v1753_v31, %v1751_v40  ;;  %v2001_v8 = vld [vmem:[#allocation3 + $0x12] ss:$2 sm:$0xff] }
 0x4f8   : > { %v1782_v7 = vld [vmem:[#allocation3 + $0x21] ss:$2 sm:$0xff]  ;;  %v1755_v42 = vld [vmem:[#allocation3 + $0x20] ss:$2 sm:$0xff]  ;;  %v2006_v56 = vpack.c.bf16 %v2001_v8, %v1999_v35 }
 0x4f9   : > { %4154 = vmatprep.mubr.bf16.mxu0 %v1785_v39  ;;  %4174 = vmatprep.mubr.bf16.mxu1 %v1758_v30  ;;  %v2003_v54 = vld [vmem:[#allocation3 + $0x22] ss:$2 sm:$0xff] }
 0x4fa   : > { %v1784_v43 = vld [vmem:[#allocation3 + $0x31] ss:$2 sm:$0xff]  ;;  %v1757_v44 = vld [vmem:[#allocation3 + $0x30] ss:$2 sm:$0xff] }
 0x4fb   : > { %v1786_v29 = vpack.c.bf16 %v1784_v43, %v1782_v7  ;;  %v1759_v27 = vpack.c.bf16 %v1757_v44, %v1755_v42  ;;  %v2005_v55 = vld [vmem:[#allocation3 + $0x32] ss:$2 sm:$0xff] }
 0x4fc   : > { %v2007_v11 = vpack.c.bf16 %v2005_v55, %v2003_v54  ;;  %v4487_v54 = vld [vmem:[%s5827_s4 + $0x38] sm:$0xff]   ;;  %v4488_v55 = vld [vmem:[%s5827_s4 + $0x70] sm:$0xff]  }
 0x4fd   : > { %4155 = vmatmul.mubr.bf16.vlgmr.msra.gmra.mxu0 %v1786_v29  ;;  %4175 = vmatmul.mubr.bf16.vlgmr.msra.gmra.mxu1 %v1759_v27 }
 0x4fe   : > { %4179 = vmatpush3.bf16.msra.mxu0 %v5401_v13  ;;  %4194 = vmatprep.mubr.bf16.mxu0 %v2006_v56  ;;  %v4483_v13 = vld [vmem:[%s5826_s3 + $0x90] sm:$0xff]  }
 0x4ff   : > { %4180 = vmatprep.subr.bf16.mxu0 %v4479_v14  ;;  %4214 = vmatprep.mubr.msk.bf16.mxu1 %vm4732_vm3, %v4729_v0 }
 0x502   : > { %4181 = vmatpush3.bf16.msra.mxu0 %v4479_v14 }
 0x503   : > { %4182 = vmatprep.subr.bf16.mxu0 %v4480_v60 }
 0x506   : > { %4183 = vmatpush3.bf16.msra.mxu0 %v4480_v60 }
 0x507   : > { %4184 = vmatprep.subr.bf16.mxu0 %v4481_v6 }
 0x50a   : > { %4185 = vmatpush3.bf16.msra.mxu0 %v4481_v6 }
 0x50b   : > { %4186 = vmatprep.subr.bf16.mxu0 %v4482_v15 }
 0x50e   : > { %4187 = vmatpush3.bf16.msra.mxu0 %v4482_v15 }
 0x50f   : > { %4188 = vmatprep.subr.bf16.mxu0 %v4483_v13 }
 0x512   : > { %4189 = vmatpush3.bf16.msra.mxu0 %v4483_v13 }
 0x513   : > { %4190 = vmatprep.subr.bf16.mxu0 %v4484_v34 }
 0x516   : > { %4191 = vmatpush3.bf16.msra.mxu0 %v4484_v34 }
 0x517   : > { %4192 = vmatprep.subr.bf16.mxu0 %v4485_v4 }
 0x51a   : > { %4193 = vmatpush3.bf16.msra.mxu0 %v4485_v4  ;;  %v4486_v4 = vld [vmem:[%s5827_s4 + $0x78] sm:$0xff]  }
 0x51b   : > { %4218 = vmatprep.subr.bf16.mxu0 %v4729_v0  ;;  %4199 = vmatpush3.bf16.msra.mxu1 %v4486_v4 }
 0x51c   : > { %4200 = vmatprep.subr.bf16.mxu1 %v4729_v0 }
 0x51d   : > { %4195 = vmatmul.mubr.bf16.vlgmr.msra.gmra.mxu0 %v2007_v11  ;;  %v4489_v11 = vld [vmem:[%s5827_s4 + $0x30] sm:$0xff]  }
 0x51e   : > { %4219 = vmatpush3.bf16.msra.mxu0 %v4487_v54  ;;  %4234 = vmatprep.mubr.msk.bf16.mxu0 %vm4732_vm3, %v4729_v0  ;;  %v4502_v54 = vld [vmem:[%s5827_s4 + $0xb8] sm:$0xff]  }
 0x51f   : > { %4220 = vmatprep.subr.bf16.mxu0 %v4729_v0  ;;  %4201 = vmatpush3.bf16.msra.mxu1 %v4488_v55 }
 0x520   : > { %4202 = vmatprep.subr.bf16.mxu1 %v4729_v0 }
 0x522   : > { %4221 = vmatpush3.bf16.msra.mxu0 %v4489_v11 }
 0x523   : > { %4222 = vmatprep.subr.bf16.mxu0 %v4729_v0 }
 0x5bd   : > { %v4156_v16 = vpop.f32.mrf.mxu0  ;;  %v4176_v58 = vpop.f32.mrf.mxu1 }
 0x5be   : > { %v1975_v36 = vadd.f32 %v4176_v58, %v4156_v16  ;;  %v4490_v16 = vld [vmem:[%s5827_s4 + $0x68] sm:$0xff]  }
 0x5bf   : > { %v1869_v20 = vpop.f32.mrf.mxu0  ;;  %v1966_v61 = vpop.f32.mrf.mxu1  ;;  %v4491_v58 = vld [vmem:[%s5827_s4 + $0x28] sm:$0xff]   ;;  %4203 = vmatpush3.bf16.msra.mxu1 %v4490_v16  ;;  %v4503_v16 = vld [vmem:[%s5827_s4 + $0xb0] sm:$0xff]  }
 0x5c0   : > { %v1967_v18 = vadd.f32 %v1966_v61, %v1869_v20  ;;  %4223 = vmatpush3.bf16.msra.mxu0 %v4491_v58  ;;  %4204 = vmatprep.subr.bf16.mxu1 %v4729_v0  ;;  %v4492_v20 = vld [vmem:[%s5827_s4 + $0x60] sm:$0xff]   ;;  %v4504_v58 = vld [vmem:[%s5827_s4 + $0xa8] sm:$0xff]  }
 0x5c1   : > { %v4157_v22 = vpop.f32.mrf.mxu0  ;;  %v4177_v2 = vpop.f32.mrf.mxu1  ;;  %4224 = vmatprep.subr.bf16.mxu0 %v4729_v0  ;;  %v4493_v61 = vld [vmem:[%s5827_s4 + $0x20] sm:$0xff]  }
 0x5c2   : > { %v1978_v59 = vadd.f32 %v4177_v2, %v4157_v22  ;;  %v4494_v22 = vld [vmem:[%s5827_s4 + $0x58] sm:$0xff]  }
 0x5c3   : > { %v1872_v24 = vpop.f32.mrf.mxu0  ;;  %v1969_v9 = vpop.f32.mrf.mxu1  ;;  %4205 = vmatpush3.bf16.msra.mxu1 %v4492_v20  ;;  %v4495_v2 = vld [vmem:[%s5827_s4 + $0x18] sm:$0xff]   ;;  %v4505_v20 = vld [vmem:[%s5827_s4 + $0xa0] sm:$0xff]  }
 0x5c4   : > { %v1970_v46 = vadd.f32 %v1969_v9, %v1872_v24  ;;  %4225 = vmatpush3.bf16.msra.mxu0 %v4493_v61  ;;  %4206 = vmatprep.subr.bf16.mxu1 %v4729_v0  ;;  %v4496_v24 = vld [vmem:[%s5827_s4 + $0x50] sm:$0xff]   ;;  %v4498_v9 = vld [vmem:[%s5827_s4 + $0x48] sm:$0xff]   ;;  %v4506_v61 = vld [vmem:[%s5827_s4 + $0x98] sm:$0xff]  }
 0x5c5   : > { %4226 = vmatprep.subr.bf16.mxu0 %v4729_v0 }
 0x5c7   : > { %4207 = vmatpush3.bf16.msra.mxu1 %v4494_v22  ;;  %v4507_v22 = vld [vmem:[%s5827_s4 + $0x90] sm:$0xff]  }
 0x5c8   : > { %4227 = vmatpush3.bf16.msra.mxu0 %v4495_v2  ;;  %4208 = vmatprep.subr.bf16.mxu1 %v4729_v0  ;;  %v4508_v2 = vld [vmem:[%s5827_s4 + $0x88] sm:$0xff]  }
 0x5c9   : > { %4228 = vmatprep.subr.bf16.mxu0 %v4729_v0 }
 0x5cb   : > { %4209 = vmatpush3.bf16.msra.mxu1 %v4496_v24  ;;  %v4509_v24 = vld [vmem:[%s5827_s4 + $0x80] sm:$0xff]  }
 0x5cc   : > { %4210 = vmatprep.subr.bf16.mxu1 %v4729_v0 }
 0x5cf   : > { %4211 = vmatpush3.bf16.msra.mxu1 %v4498_v9 }
 0x5d0   : > { %4212 = vmatprep.subr.bf16.mxu1 %v4729_v0 }
 0x5dd   : > { %v4196_v25 = vpop.f32.mrf.mxu0 }
 0x5de   : > { %v2107_v62 = vadd.f32 %v4196_v25, %v1975_v36  ;;  %v4497_v25 = vld [vmem:[%s5827_s4 + $0x10] sm:$0xff]  }
 0x5df   : > { %v2090_v26 = vpop.f32.mrf.mxu0  ;;  %4229 = vmatpush3.bf16.msra.mxu0 %v4497_v25 }
 0x5e0   : > { %v2105_v57 = vadd.f32 %v2090_v26, %v1967_v18  ;;  %v2115_v48 = vadd.f32 %v3686_v12, %v2107_v62  ;;  %4230 = vmatprep.subr.bf16.mxu0 %v4729_v0  ;;  %v4499_v26 = vld [vmem:[%s5827_s4 + $0x8] sm:$0xff]   ;;  %v4500_v18 = vld [vmem:[%s5827_s4 + $0x40] sm:$0xff]  }
 0x5e1   : > { %v4197_v33 = vpop.f32.mrf.mxu0  ;;  %4213 = vmatpush3.bf16.msra.mxu1 %v4500_v18 }
 0x5e2   : > { %v2113_v41 = vadd.f32 %v3686_v12, %v2105_v57  ;;  %v2108_v5 = vadd.f32 %v4197_v33, %v1978_v59  ;;  %v4501_v33 = vld [vmem:[%s5827_s4] sm:$0xff]   ;;  %4238 = vmatprep.subr.bf16.mxu1 %v4729_v0 }
 0x5e3   : > { %v2093_v10 = vpop.f32.mrf.mxu0  ;;  %4231 = vmatpush3.bf16.msra.mxu0 %v4499_v26 }
 0x5e4   : > { %v2106_v45 = vadd.f32 %v2093_v10, %v1970_v46  ;;  %v2116_v49 = vadd.f32 %v3686_v12, %v2108_v5  ;;  %4232 = vmatprep.subr.bf16.mxu0 %v4729_v0 }
 0x5e6   : > { %v2114_v32 = vadd.f32 %v3686_v12, %v2106_v45 }
 0x5e7   : > { %4233 = vmatpush3.bf16.msra.mxu0 %v4501_v33 }
 0x5e8   : > { %v2117_v19 = vadd.f32 %v2114_v32, %v2113_v41  ;;  %4258 = vmatprep.subr.bf16.mxu0 %v4729_v0 }
 0x5ea   : > { %v2118_v50 = vadd.f32 %v2117_v19, %v2115_v48 }
 0x5ec   : > { %v2119_v47 = vadd.f32 %v2118_v50, %v2116_v49 }
 0x5ee   : > { %v2120_v37 = vrot.slane %v2119_v47, 4 }
 0x5f0   : > { %v2121_v51 = vadd.f32 %v2120_v37, %v2119_v47 }
 0x5f2   : > { %v2122_v52 = vrot.slane %v2121_v51, 2 }
 0x5f4   : > { %v2123_v53 = vadd.f32 %v2122_v52, %v2121_v51 }
 0x5f6   : > { %v2124_v63 = vrot.slane %v2123_v53, 1 }
 0x5f8   : > { %v2125_v21 = vadd.f32 %v2124_v63, %v2123_v53 }
 0x5fa   : > { %2128 = vrot.lane.b32.xlu1 %v2125_v21, %s4731_s26  ;;  %2126 = vrot.lane.b32.xlu0 %v2125_v21, %s4730_s25 }
 0x66c   : > { %v2129_v1 = vpop.permute.xlu1 %2128  ;;  %v2127_v3 = vpop.permute.xlu0 %2126 }
 0x66d   : > { %v2130_v38 = vsel %vm5024_vm2, %v2127_v3, %v2129_v1 }
 0x66e   : > { %v2131_v40 = vadd.f32 %v2130_v38, %v2125_v21 }
 0x670   : > { %v2132_v28 = vmul.f32 0.015625, %v2131_v40 }
 0x672   : > { %v2136_v31 = vrot.slane %v2132_v28, %v5030_v23 }
 0x674   : > { %v5452_v39 = vsub.f32 %v2113_v41, %v2136_v31  ;;  %v5454_v30 = vsub.f32 %v2114_v32, %v2136_v31  ;;  %v5456_v7 = vsub.f32 %v2115_v48, %v2136_v31  ;;  %v5458_v42 = vsub.f32 %v2116_v49, %v2136_v31  ;;  %v3687_v41 = vld [vmem:[%s5830_s7 + $0x8] ss:$0 sm:$0xff]  ;;  %v3688_v49 = vld [vmem:[%s5830_s7 + $0xe] ss:$0 sm:$0xff] }
 0x676   : > { %v2141_v35 = vmul.f32 %v5452_v39, %v5452_v39  ;;  %v2142_v8 = vmul.f32 %v5454_v30, %v5454_v30  ;;  %v2143_v43 = vmul.f32 %v5456_v7, %v5456_v7  ;;  %v2144_v29 = vmul.f32 %v5458_v42, %v5458_v42 }
 0x678   : > { %v2145_v44 = vadd.f32 %v2142_v8, %v2141_v35 }
 0x67a   : > { %v2146_v27 = vadd.f32 %v2145_v44, %v2143_v43 }
 0x67c   : > { %v2147_v14 = vadd.f32 %v2146_v27, %v2144_v29 }
 0x67e   : > { %v2148_v56 = vrot.slane %v2147_v14, 4 }
 0x680   : > { %v2149_v60 = vadd.f32 %v2148_v56, %v2147_v14 }
 0x682   : > { %v2150_v6 = vrot.slane %v2149_v60, 2 }
 0x684   : > { %v2151_v15 = vadd.f32 %v2150_v6, %v2149_v60 }
 0x686   : > { %v2152_v13 = vrot.slane %v2151_v15, 1 }
 0x688   : > { %v2153_v34 = vadd.f32 %v2152_v13, %v2151_v15 }
 0x68a   : > { %2156 = vrot.lane.b32.xlu1 %v2153_v34, %s4731_s26  ;;  %2154 = vrot.lane.b32.xlu0 %v2153_v34, %s4730_s25 }
 0x6fc   : > { %v2157_v36 = vpop.permute.xlu1 %2156  ;;  %v2155_v46 = vpop.permute.xlu0 %2154 }
 0x6fd   : > { %v2158_v57 = vsel %vm5024_vm2, %v2155_v46, %v2157_v36 }
 0x6fe   : > { %v2159_v10 = vadd.f32 %v2158_v57, %v2153_v34 }
 0x700   : > { %v2160_v59 = vmul.f32 0.015625, %v2159_v10 }
 0x702   : > { %v2161_v62 = vadd.f32 1e-05, %v2160_v59 }
 0x704   : > { %4610 = vrsqrt.f32 %v2161_v62 }
 0x711   : > { %v4611_v45 = vpop.eup %4610 }
 0x712   : > { %v2166_v12 = vrot.slane %v4611_v45, %v5030_v23 }
 0x714   : > { %v2167_v5 = vmul.f32 %v2166_v12, %v5452_v39  ;;  %v2168_v32 = vmul.f32 %v2166_v12, %v5454_v30  ;;  %v2169_v48 = vmul.f32 %v2166_v12, %v5456_v7  ;;  %v2170_v19 = vmul.f32 %v2166_v12, %v5458_v42 }
 0x716   : > { %v2175_v50 = vmul.f32 %v3687_v41, %v2167_v5  ;;  %v2176_v47 = vmul.f32 %v3687_v41, %v2168_v32  ;;  %v2177_v37 = vmul.f32 %v3687_v41, %v2169_v48  ;;  %v2178_v51 = vmul.f32 %v3687_v41, %v2170_v19  ;;  %v3745_v48 = vld [vmem:[%s5830_s7 + $0x3] ss:$0 sm:$0xff] }
 0x718   : > { %v2183_v52 = vadd.f32 %v3688_v49, %v2175_v50  ;;  %v2184_v53 = vadd.f32 %v3688_v49, %v2176_v47  ;;  %v2185_v63 = vadd.f32 %v3688_v49, %v2177_v37  ;;  %v2186_v21 = vadd.f32 %v3688_v49, %v2178_v51 }
 0x71a   : > { %v2191_v1 = vmul.f32 0.70710677, %v2183_v52  ;;  %v2192_v3 = vmul.f32 0.70710677, %v2184_v53  ;;  %v2193_v38 = vmul.f32 0.70710677, %v2185_v63 }
 0x71b   : > { %v2194_v40 = vmul.f32 0.70710677, %v2186_v21  ;;  %v2187_v39 = vmul.f32 0.5, %v2183_v52  ;;  %v2188_v42 = vmul.f32 0.5, %v2184_v53  ;;  %v2189_v43 = vmul.f32 0.5, %v2185_v63 }
 0x71c   : > { %4612 = verf.f32 %v2191_v1  ;;  %v2190_v27 = vmul.f32 0.5, %v2186_v21 }
 0x71d   : > { %4614 = verf.f32 %v2192_v3 }
 0x71e   : > { %4616 = verf.f32 %v2193_v38 }
 0x71f   : > { %4618 = verf.f32 %v2194_v40 }
 0x729   : > { %v4613_v28 = vpop.eup %4612 }
 0x72a   : > { %v4615_v31 = vpop.eup %4614  ;;  %v2199_v30 = vadd.f32 1.0, %v4613_v28 }
 0x72b   : > { %v4617_v7 = vpop.eup %4616  ;;  %v2200_v35 = vadd.f32 1.0, %v4615_v31 }
 0x72c   : > { %v4619_v8 = vpop.eup %4618  ;;  %v2201_v44 = vadd.f32 1.0, %v4617_v7  ;;  %v2203_v29 = vmul.f32 %v2199_v30, %v2187_v39 }
 0x72d   : > { %v2202_v14 = vadd.f32 1.0, %v4619_v8  ;;  %v2204_v56 = vmul.f32 %v2200_v35, %v2188_v42 }
 0x72e   : > { %v2205_v60 = vmul.f32 %v2201_v44, %v2189_v43  ;;  %2209 = vst [vmem:[#allocation4 + $0x1] sm:$0xff] %v2203_v29 }
 0x72f   : > { %v2206_v6 = vmul.f32 %v2202_v14, %v2190_v27  ;;  %2210 = vst [vmem:[#allocation4 + $0x9] sm:$0xff] %v2204_v56 }
 0x730   : > { %2211 = vst [vmem:[#allocation4 + $0x11] sm:$0xff] %v2205_v60 }
 0x731   : > { %2212 = vst [vmem:[#allocation4 + $0x19] sm:$0xff] %v2206_v6  ;;  %v4510_v6 = vld [vmem:[%s5828_s5 + $0x78] sm:$0xff]  }
 0x736   : > { %v2254_v15 = vld [vmem:[#allocation4 + $0x1] ss:$2 sm:$0xff]  ;;  %v2232_v13 = vld [vmem:[#allocation4] ss:$2 sm:$0xff] }
 0x737   : > { %v2454_v25 = vld [vmem:[#allocation4 + $0x2] ss:$2 sm:$0xff] }
 0x738   : > { %v2256_v34 = vld [vmem:[#allocation4 + $0x11] ss:$2 sm:$0xff]  ;;  %v2234_v4 = vld [vmem:[#allocation4 + $0x10] ss:$2 sm:$0xff] }
 0x739   : > { %v2257_v55 = vpack.c.bf16 %v2256_v34, %v2254_v15  ;;  %v2235_v11 = vpack.c.bf16 %v2234_v4, %v2232_v13  ;;  %v2456_v9 = vld [vmem:[#allocation4 + $0x12] ss:$2 sm:$0xff]  ;;  %v4511_v15 = vld [vmem:[%s5828_s5 + $0x38] sm:$0xff]  }
 0x73a   : > { %v2457_v26 = vpack.c.bf16 %v2456_v9, %v2454_v25  ;;  %v4512_v13 = vld [vmem:[%s5828_s5 + $0x70] sm:$0xff]   ;;  %v4514_v4 = vld [vmem:[%s5828_s5 + $0x68] sm:$0xff]   ;;  %v4525_v25 = vld [vmem:[%s5828_s5] sm:$0xff]  }
 0x73b   : > { %4215 = vmatmul.mubr.bf16.vlgmr.msra.gmra.mxu1 %v2257_v55  ;;  %4235 = vmatmul.mubr.bf16.vlgmr.msra.gmra.mxu0 %v2235_v11  ;;  %v4513_v34 = vld [vmem:[%s5828_s5 + $0x30] sm:$0xff]   ;;  %v4516_v55 = vld [vmem:[%s5828_s5 + $0x60] sm:$0xff]  }
 0x73c   : > { %4239 = vmatpush3.bf16.msra.mxu1 %v4502_v54  ;;  %4254 = vmatprep.mubr.msk.bf16.mxu1 %vm4732_vm3, %v4729_v0  ;;  %v4515_v54 = vld [vmem:[%s5828_s5 + $0x28] sm:$0xff]   ;;  %v4517_v11 = vld [vmem:[%s5828_s5 + $0x20] sm:$0xff]  }
 0x73d   : > { %4240 = vmatprep.subr.bf16.mxu1 %v4729_v0  ;;  %4274 = vmatprep.mubr.msk.bf16.mxu0 %vm4732_vm3, %v4729_v0 }
 0x73e   : > { %4259 = vmatpush3.bf16.msra.mxu0 %v4510_v6 }
 0x73f   : > { %4260 = vmatprep.subr.bf16.mxu0 %v4729_v0 }
 0x740   : > { %4241 = vmatpush3.bf16.msra.mxu1 %v4503_v16  ;;  %v4518_v16 = vld [vmem:[%s5828_s5 + $0x58] sm:$0xff]  }
 0x741   : > { %4242 = vmatprep.subr.bf16.mxu1 %v4729_v0 }
 0x742   : > { %4261 = vmatpush3.bf16.msra.mxu0 %v4512_v13 }
 0x743   : > { %4262 = vmatprep.subr.bf16.mxu0 %v4729_v0 }
 0x744   : > { %4243 = vmatpush3.bf16.msra.mxu1 %v4504_v58  ;;  %v4519_v58 = vld [vmem:[%s5828_s5 + $0x18] sm:$0xff]  }
 0x745   : > { %4244 = vmatprep.subr.bf16.mxu1 %v4729_v0 }
 0x746   : > { %4263 = vmatpush3.bf16.msra.mxu0 %v4514_v4  ;;  %v3804_v4 = vld [vmem:[%s5830_s7 + $0x4] ss:$0 sm:$0xff] }
 0x747   : > { %4264 = vmatprep.subr.bf16.mxu0 %v4729_v0 }
 0x748   : > { %4245 = vmatpush3.bf16.msra.mxu1 %v4505_v20  ;;  %v4520_v20 = vld [vmem:[%s5828_s5 + $0x50] sm:$0xff]  }
 0x749   : > { %4246 = vmatprep.subr.bf16.mxu1 %v4729_v0 }
 0x74a   : > { %4265 = vmatpush3.bf16.msra.mxu0 %v4516_v55 }
 0x74b   : > { %4266 = vmatprep.subr.bf16.mxu0 %v4729_v0 }
 0x74c   : > { %4247 = vmatpush3.bf16.msra.mxu1 %v4506_v61  ;;  %v4521_v61 = vld [vmem:[%s5828_s5 + $0x10] sm:$0xff]  }
 0x74d   : > { %4248 = vmatprep.subr.bf16.mxu1 %v4729_v0 }
 0x74e   : > { %4267 = vmatpush3.bf16.msra.mxu0 %v4518_v16 }
 0x74f   : > { %4268 = vmatprep.subr.bf16.mxu0 %v4729_v0 }
 0x750   : > { %4249 = vmatpush3.bf16.msra.mxu1 %v4507_v22  ;;  %v4522_v22 = vld [vmem:[%s5828_s5 + $0x48] sm:$0xff]  }
 0x751   : > { %4250 = vmatprep.subr.bf16.mxu1 %v4729_v0 }
 0x752   : > { %4269 = vmatpush3.bf16.msra.mxu0 %v4520_v20 }
 0x753   : > { %4270 = vmatprep.subr.bf16.mxu0 %v4729_v0 }
 0x754   : > { %4251 = vmatpush3.bf16.msra.mxu1 %v4508_v2  ;;  %v4523_v2 = vld [vmem:[%s5828_s5 + $0x8] sm:$0xff]  }
 0x755   : > { %4252 = vmatprep.subr.bf16.mxu1 %v4729_v0 }
 0x756   : > { %4271 = vmatpush3.bf16.msra.mxu0 %v4522_v22 }
 0x757   : > { %4272 = vmatprep.subr.bf16.mxu0 %v4729_v0 }
 0x758   : > { %4253 = vmatpush3.bf16.msra.mxu1 %v4509_v24  ;;  %v4524_v24 = vld [vmem:[%s5828_s5 + $0x40] sm:$0xff]  }
 0x759   : > { %4278 = vmatprep.subr.bf16.mxu1 %v4729_v0 }
 0x75a   : > { %4273 = vmatpush3.bf16.msra.mxu0 %v4524_v24 }
 0x75b   : > { %4255 = vmatmul.mubr.bf16.vlgmr.msra.gmra.mxu1 %v2457_v26  ;;  %4298 = vmatprep.subr.bf16.mxu0 %v4729_v0 }
 0x75c   : > { %4294 = vmatprep.mubr.msk.bf16.mxu1 %vm4732_vm3, %v4729_v0  ;;  %4279 = vmatpush3.bf16.msra.mxu1 %v4511_v15 }
 0x75d   : > { %4280 = vmatprep.subr.bf16.mxu1 %v4729_v0 }
 0x760   : > { %4281 = vmatpush3.bf16.msra.mxu1 %v4513_v34 }
 0x761   : > { %4282 = vmatprep.subr.bf16.mxu1 %v4729_v0 }
 0x764   : > { %4283 = vmatpush3.bf16.msra.mxu1 %v4515_v54 }
 0x765   : > { %4284 = vmatprep.subr.bf16.mxu1 %v4729_v0 }
 0x768   : > { %4285 = vmatpush3.bf16.msra.mxu1 %v4517_v11 }
 0x769   : > { %4286 = vmatprep.subr.bf16.mxu1 %v4729_v0 }
 0x76c   : > { %4287 = vmatpush3.bf16.msra.mxu1 %v4519_v58 }
 0x76d   : > { %4288 = vmatprep.subr.bf16.mxu1 %v4729_v0 }
 0x770   : > { %4289 = vmatpush3.bf16.msra.mxu1 %v4521_v61 }
 0x771   : > { %4290 = vmatprep.subr.bf16.mxu1 %v4729_v0 }
 0x774   : > { %4291 = vmatpush3.bf16.msra.mxu1 %v4523_v2 }
 0x775   : > { %4292 = vmatprep.subr.bf16.mxu1 %v4729_v0 }
 0x778   : > { %4293 = vmatpush3.bf16.msra.mxu1 %v4525_v25 }
 0x779   : > { %4318 = vmatprep.subr.bf16.mxu1 %v4729_v0 }
 0x7fb   : > { %v2340_v18 = vpop.f32.mrf.mxu1  ;;  %v2429_v33 = vpop.f32.mrf.mxu0 }
 0x7fc   : > { %v2430_v12 = vadd.f32 %v2429_v33, %v2340_v18 }
 0x7fd   : > { %v4216_v36 = vpop.f32.mrf.mxu1  ;;  %v4236_v46 = vpop.f32.mrf.mxu0 }
 0x7ff   : > { %v2343_v57 = vpop.f32.mrf.mxu1  ;;  %v2432_v10 = vpop.f32.mrf.mxu0 }
 0x800   : > { %v2433_v5 = vadd.f32 %v2432_v10, %v2343_v57 }
 0x801   : > { %v4217_v59 = vpop.f32.mrf.mxu1  ;;  %v4237_v62 = vpop.f32.mrf.mxu0 }
 0x802   : > { %v3746_v59 = vld [vmem:[%s5830_s7 + $0x9] ss:$0 sm:$0xff] }
 0x81b   : > { %v2540_v45 = vpop.f32.mrf.mxu1 }
 0x81c   : > { %v2547_v32 = vadd.f32 %v2540_v45, %v2430_v12  ;;  %v3747_v12 = vld [vmem:[%s5830_s7 + $0xf] ss:$0 sm:$0xff] }
 0x81d   : > { %v4256_v41 = vpop.f32.mrf.mxu1 }
 0x81e   : > { %v2553_v47 = vadd.f32 %v3745_v48, %v2547_v32 }
 0x81f   : > { %v2543_v19 = vpop.f32.mrf.mxu1 }
 0x820   : > { %v2548_v49 = vadd.f32 %v2543_v19, %v2433_v5 }
 0x821   : > { %v4257_v50 = vpop.f32.mrf.mxu1 }
 0x822   : > { %v2554_v37 = vadd.f32 %v3745_v48, %v2548_v49 }
 0x824   : > { %v2555_v51 = vadd.f32 %v2554_v37, %v2553_v47 }
 0x826   : > { %v2556_v52 = vrot.slane %v2555_v51, 4 }
 0x828   : > { %v2557_v53 = vadd.f32 %v2556_v52, %v2555_v51 }
 0x82a   : > { %v2558_v63 = vrot.slane %v2557_v53, 2 }
 0x82c   : > { %v2559_v21 = vadd.f32 %v2558_v63, %v2557_v53 }
 0x82e   : > { %v2560_v1 = vrot.slane %v2559_v21, 1 }
 0x830   : > { %v2561_v3 = vadd.f32 %v2560_v1, %v2559_v21 }
 0x832   : > { %2564 = vrot.lane.b32.xlu1 %v2561_v3, %s4731_s26  ;;  %2562 = vrot.lane.b32.xlu0 %v2561_v3, %s4730_s25 }
 0x8a4   : > { %v2565_v38 = vpop.permute.xlu1 %2564  ;;  %v2563_v40 = vpop.permute.xlu0 %2562 }
 0x8a5   : > { %v2566_v28 = vsel %vm5024_vm2, %v2563_v40, %v2565_v38  ;;  %v4526_v38 = vld [vmem:[%s5828_s5 + $0xb8] sm:$0xff]  }
 0x8a6   : > { %v2567_v31 = vadd.f32 %v2566_v28, %v2561_v3 }
 0x8a8   : > { %v2568_v39 = vmul.f32 0.03125, %v2567_v31  ;;  %v4527_v31 = vld [vmem:[%s5828_s5 + $0xb0] sm:$0xff]  }
 0x8aa   : > { %v2572_v30 = vrot.slane %v2568_v39, %v5030_v23  ;;  %v4528_v39 = vld [vmem:[%s5828_s5 + $0xa8] sm:$0xff]  }
 0x8ac   : > { %v5597_v7 = vsub.f32 %v2553_v47, %v2572_v30  ;;  %v5599_v42 = vsub.f32 %v2554_v37, %v2572_v30  ;;  %v4529_v30 = vld [vmem:[%s5828_s5 + $0xa0] sm:$0xff]  }
 0x8ae   : > { %v2575_v35 = vmul.f32 %v5597_v7, %v5597_v7  ;;  %v2576_v8 = vmul.f32 %v5599_v42, %v5599_v42 }
 0x8b0   : > { %v2577_v43 = vadd.f32 %v2576_v8, %v2575_v35  ;;  %v4532_v35 = vld [vmem:[%s5828_s5 + $0x88] sm:$0xff]   ;;  %v4533_v8 = vld [vmem:[%s5828_s5 + $0x80] sm:$0xff]  }
 0x8b2   : > { %v2578_v44 = vrot.slane %v2577_v43, 4 }
 0x8b4   : > { %v2579_v29 = vadd.f32 %v2578_v44, %v2577_v43 }
 0x8b6   : > { %v2580_v27 = vrot.slane %v2579_v29, 2 }
 0x8b8   : > { %v2581_v14 = vadd.f32 %v2580_v27, %v2579_v29 }
 0x8ba   : > { %v2582_v56 = vrot.slane %v2581_v14, 1 }
 0x8bc   : > { %v2583_v60 = vadd.f32 %v2582_v56, %v2581_v14 }
 0x8be   : > { %2586 = vrot.lane.b32.xlu1 %v2583_v60, %s4731_s26  ;;  %2584 = vrot.lane.b32.xlu0 %v2583_v60, %s4730_s25 }
 0x930   : > { %v2587_v9 = vpop.permute.xlu1 %2586  ;;  %v2585_v26 = vpop.permute.xlu0 %2584 }
 0x931   : > { %v2588_v18 = vsel %vm5024_vm2, %v2585_v26, %v2587_v9 }
 0x932   : > { %v2589_v33 = vadd.f32 %v2588_v18, %v2583_v60 }
 0x934   : > { %v2590_v36 = vmul.f32 0.03125, %v2589_v33 }
 0x936   : > { %v2591_v46 = vadd.f32 1e-05, %v2590_v36 }
 0x938   : > { %4620 = vrsqrt.f32 %v2591_v46 }
 0x945   : > { %v4621_v57 = vpop.eup %4620 }
 0x946   : > { %v2596_v10 = vrot.slane %v4621_v57, %v5030_v23 }
 0x948   : > { %v2597_v62 = vmul.f32 %v2596_v10, %v5597_v7  ;;  %v2598_v45 = vmul.f32 %v2596_v10, %v5599_v42  ;;  %v4530_v7 = vld [vmem:[%s5828_s5 + $0x98] sm:$0xff]   ;;  %v4531_v42 = vld [vmem:[%s5828_s5 + $0x90] sm:$0xff]  }
 0x94a   : > { %v2603_v41 = vmul.f32 %v3746_v59, %v2597_v62  ;;  %v2604_v5 = vmul.f32 %v3746_v59, %v2598_v45 }
 0x94c   : > { %v2609_v32 = vadd.f32 %v3747_v12, %v2603_v41  ;;  %v2610_v48 = vadd.f32 %v3747_v12, %v2604_v5 }
 0x94e   : > { %v2613_v19 = vmul.f32 0.70710677, %v2609_v32  ;;  %v2614_v49 = vmul.f32 0.70710677, %v2610_v48  ;;  %v2611_v37 = vmul.f32 0.5, %v2609_v32  ;;  %v2612_v52 = vmul.f32 0.5, %v2610_v48 }
 0x94f   : > { %v4534_v48 = vld [vmem:[#allocation7 + $0x78] sm:$0xff]  }
 0x950   : > { %4622 = verf.f32 %v2613_v19  ;;  %v4535_v19 = vld [vmem:[#allocation7 + $0x38] sm:$0xff]  }
 0x951   : > { %4624 = verf.f32 %v2614_v49  ;;  %v4536_v49 = vld [vmem:[#allocation7 + $0x70] sm:$0xff]  }
 0x95d   : > { %v4623_v50 = vpop.eup %4622 }
 0x95e   : > { %v4625_v47 = vpop.eup %4624  ;;  %v2617_v51 = vadd.f32 1.0, %v4623_v50  ;;  %v4537_v50 = vld [vmem:[#allocation7 + $0x30] sm:$0xff]  }
 0x95f   : > { %v2618_v53 = vadd.f32 1.0, %v4625_v47  ;;  %v4538_v47 = vld [vmem:[#allocation7 + $0x68] sm:$0xff]  }
 0x960   : > { %v2619_v63 = vmul.f32 %v2617_v51, %v2611_v37  ;;  %v4539_v37 = vld [vmem:[#allocation7 + $0x28] sm:$0xff]   ;;  %v4540_v51 = vld [vmem:[#allocation7 + $0x60] sm:$0xff]  }
 0x961   : > { %v2620_v21 = vmul.f32 %v2618_v53, %v2612_v52  ;;  %v4541_v52 = vld [vmem:[#allocation7 + $0x20] sm:$0xff]   ;;  %v4542_v53 = vld [vmem:[#allocation7 + $0x58] sm:$0xff]  }
 0x962   : > { %2623 = vst [vmem:[#allocation5 + $0x1] sm:$0xff] %v2619_v63  ;;  %v4543_v63 = vld [vmem:[#allocation7 + $0x18] sm:$0xff]  }
 0x963   : > { %2624 = vst [vmem:[#allocation5 + $0x9] sm:$0xff] %v2620_v21  ;;  %v4544_v21 = vld [vmem:[#allocation7 + $0x50] sm:$0xff]  }
 0x96a   : > { %v2664_v1 = vld [vmem:[#allocation5 + $0x1] ss:$2 sm:$0xff]  ;;  %v2644_v3 = vld [vmem:[#allocation5] ss:$2 sm:$0xff] }
 0x96b   : > { %v2665_v40 = vpack.c.bf16 %v2664_v1, %v2664_v1  ;;  %v2645_v28 = vpack.c.bf16 %v2644_v3, %v2644_v3  ;;  %v2860_v43 = vld [vmem:[#allocation5 + $0x2] ss:$2 sm:$0xff]  ;;  %v4545_v1 = vld [vmem:[#allocation7 + $0x10] sm:$0xff]  }
 0x96c   : > { %v2861_v44 = vpack.c.bf16 %v2860_v43, %v2860_v43  ;;  %v4546_v3 = vld [vmem:[#allocation7 + $0x48] sm:$0xff]  }
 0x96d   : > { %4275 = vmatmul.mubr.bf16.vlgmr.msra.gmra.mxu0 %v2665_v40  ;;  %4295 = vmatmul.mubr.bf16.vlgmr.msra.gmra.mxu1 %v2645_v28  ;;  %v4548_v40 = vld [vmem:[#allocation7 + $0x40] sm:$0xff]  }
 0x96e   : > { %4299 = vmatpush3.bf16.msra.mxu0 %v4526_v38  ;;  %4314 = vmatprep.mubr.msk.bf16.mxu0 %vm4732_vm3, %v4729_v0  ;;  %v4547_v38 = vld [vmem:[#allocation7 + $0x8] sm:$0xff]   ;;  %v4549_v28 = vld [vmem:[#allocation7] sm:$0xff]  }
 0x96f   : > { %4300 = vmatprep.subr.bf16.mxu0 %v4729_v0  ;;  %4334 = vmatprep.mubr.msk.bf16.mxu1 %vm4732_vm3, %v4729_v0 }
 0x970   : > { %4319 = vmatpush3.bf16.msra.mxu1 %v4534_v48 }
 0x971   : > { %4320 = vmatprep.subr.bf16.mxu1 %v4729_v0 }
 0x972   : > { %4301 = vmatpush3.bf16.msra.mxu0 %v4527_v31 }
 0x973   : > { %4302 = vmatprep.subr.bf16.mxu0 %v4729_v0 }
 0x974   : > { %4321 = vmatpush3.bf16.msra.mxu1 %v4536_v49 }
 0x975   : > { %4322 = vmatprep.subr.bf16.mxu1 %v4729_v0 }
 0x976   : > { %4303 = vmatpush3.bf16.msra.mxu0 %v4528_v39 }
 0x977   : > { %4304 = vmatprep.subr.bf16.mxu0 %v4729_v0 }
 0x978   : > { %4323 = vmatpush3.bf16.msra.mxu1 %v4538_v47 }
 0x979   : > { %4324 = vmatprep.subr.bf16.mxu1 %v4729_v0 }
 0x97a   : > { %4305 = vmatpush3.bf16.msra.mxu0 %v4529_v30 }
 0x97b   : > { %4306 = vmatprep.subr.bf16.mxu0 %v4729_v0 }
 0x97c   : > { %4325 = vmatpush3.bf16.msra.mxu1 %v4540_v51 }
 0x97d   : > { %4326 = vmatprep.subr.bf16.mxu1 %v4729_v0 }
 0x97e   : > { %4307 = vmatpush3.bf16.msra.mxu0 %v4530_v7 }
 0x97f   : > { %4308 = vmatprep.subr.bf16.mxu0 %v4729_v0 }
 0x980   : > { %4327 = vmatpush3.bf16.msra.mxu1 %v4542_v53 }
 0x981   : > { %4328 = vmatprep.subr.bf16.mxu1 %v4729_v0 }
 0x982   : > { %4309 = vmatpush3.bf16.msra.mxu0 %v4531_v42 }
 0x983   : > { %4310 = vmatprep.subr.bf16.mxu0 %v4729_v0 }
 0x984   : > { %4329 = vmatpush3.bf16.msra.mxu1 %v4544_v21 }
 0x985   : > { %4330 = vmatprep.subr.bf16.mxu1 %v4729_v0 }
 0x986   : > { %4311 = vmatpush3.bf16.msra.mxu0 %v4532_v35 }
 0x987   : > { %4312 = vmatprep.subr.bf16.mxu0 %v4729_v0 }
 0x988   : > { %4331 = vmatpush3.bf16.msra.mxu1 %v4546_v3 }
 0x989   : > { %4332 = vmatprep.subr.bf16.mxu1 %v4729_v0 }
 0x98a   : > { %4313 = vmatpush3.bf16.msra.mxu0 %v4533_v8 }
 0x98b   : > { %4338 = vmatprep.subr.bf16.mxu0 %v4729_v0 }
 0x98c   : > { %4333 = vmatpush3.bf16.msra.mxu1 %v4548_v40 }
 0x98d   : > { %4315 = vmatmul.mubr.bf16.vlgmr.msra.gmra.mxu0 %v2861_v44  ;;  %4358 = vmatprep.subr.bf16.mxu1 %v4729_v0  ;;  %v3805_v44 = vld [vmem:[%s5830_s7 + $0xa] ss:$0 sm:$0xff] }
 0x98e   : > { %4354 = vmatprep.mubr.msk.bf16.mxu0 %vm4732_vm3, %v4729_v0  ;;  %4339 = vmatpush3.bf16.msra.mxu0 %v4535_v19 }
 0x98f   : > { %4340 = vmatprep.subr.bf16.mxu0 %v4729_v0 }
 0x992   : > { %4341 = vmatpush3.bf16.msra.mxu0 %v4537_v50 }
 0x993   : > { %4342 = vmatprep.subr.bf16.mxu0 %v4729_v0 }
 0x996   : > { %4343 = vmatpush3.bf16.msra.mxu0 %v4539_v37 }
 0x997   : > { %4344 = vmatprep.subr.bf16.mxu0 %v4729_v0 }
 0x99a   : > { %4345 = vmatpush3.bf16.msra.mxu0 %v4541_v52 }
 0x99b   : > { %4346 = vmatprep.subr.bf16.mxu0 %v4729_v0 }
 0x99e   : > { %4347 = vmatpush3.bf16.msra.mxu0 %v4543_v63 }
 0x99f   : > { %4348 = vmatprep.subr.bf16.mxu0 %v4729_v0 }
 0x9a2   : > { %4349 = vmatpush3.bf16.msra.mxu0 %v4545_v1 }
 0x9a3   : > { %4350 = vmatprep.subr.bf16.mxu0 %v4729_v0 }
 0x9a6   : > { %4351 = vmatpush3.bf16.msra.mxu0 %v4547_v38 }
 0x9a7   : > { %4352 = vmatprep.subr.bf16.mxu0 %v4729_v0 }
 0x9aa   : > { %4353 = vmatpush3.bf16.msra.mxu0 %v4549_v28 }
 0xa2d   : > { %v2748_v29 = vpop.f32.mrf.mxu0  ;;  %v2836_v27 = vpop.f32.mrf.mxu1 }
 0xa2e   : > { %v2837_v34 = vadd.f32 %v2836_v27, %v2748_v29  ;;  %v3806_v27 = vld [vmem:[%s5830_s7 + $0x10] ss:$0 sm:$0xff] }
 0xa2f   : > { %v4276_v14 = vpop.f32.mrf.mxu0  ;;  %v4296_v56 = vpop.f32.mrf.mxu1 }
 0xa31   : > { %v2751_v60 = vpop.f32.mrf.mxu0  ;;  %v2839_v6 = vpop.f32.mrf.mxu1 }
 0xa33   : > { %v4277_v15 = vpop.f32.mrf.mxu0  ;;  %v4297_v13 = vpop.f32.mrf.mxu1 }
 0xa4d   : > { %v2944_v54 = vpop.f32.mrf.mxu0 }
 0xa4e   : > { %v2950_v55 = vadd.f32 %v2944_v54, %v2837_v34 }
 0xa4f   : > { %v4316_v11 = vpop.f32.mrf.mxu0 }
 0xa50   : > { %v2955_v16 = vadd.f32 %v3804_v4, %v2950_v55  ;;  %v4550_v4 = vld [vmem:[#allocation7 + $0xb8] sm:$0xff]  }
 0xa51   : > { %v2947_v58 = vpop.f32.mrf.mxu0 }
 0xa52   : > { %v2956_v20 = vrot.slane %v2955_v16, 4  ;;  %v4551_v58 = vld [vmem:[#allocation7 + $0xb0] sm:$0xff]  }
 0xa53   : > { %v4317_v61 = vpop.f32.mrf.mxu0 }
 0xa54   : > { %v2957_v22 = vadd.f32 %v2956_v20, %v2955_v16  ;;  %v4552_v20 = vld [vmem:[#allocation7 + $0xa8] sm:$0xff]   ;;  %v4553_v61 = vld [vmem:[#allocation7 + $0xa0] sm:$0xff]  }
 0xa56   : > { %v2958_v2 = vrot.slane %v2957_v22, 2 }
 0xa58   : > { %v2959_v24 = vadd.f32 %v2958_v2, %v2957_v22  ;;  %v4554_v22 = vld [vmem:[#allocation7 + $0x98] sm:$0xff]   ;;  %v4555_v2 = vld [vmem:[#allocation7 + $0x90] sm:$0xff]  }
 0xa5a   : > { %v2960_v25 = vrot.slane %v2959_v24, 1 }
 0xa5c   : > { %v2961_v9 = vadd.f32 %v2960_v25, %v2959_v24  ;;  %v4556_v24 = vld [vmem:[#allocation7 + $0x88] sm:$0xff]   ;;  %v4557_v25 = vld [vmem:[#allocation7 + $0x80] sm:$0xff]  }
 0xa5e   : > { %2964 = vrot.lane.b32.xlu1 %v2961_v9, %s4731_s26  ;;  %2962 = vrot.lane.b32.xlu0 %v2961_v9, %s4730_s25 }
 0xad0   : > { %v2965_v26 = vpop.permute.xlu1 %2964  ;;  %v2963_v18 = vpop.permute.xlu0 %2962 }
 0xad1   : > { %v2966_v33 = vsel %vm5024_vm2, %v2963_v18, %v2965_v26 }
 0xad2   : > { %v2967_v36 = vadd.f32 %v2966_v33, %v2961_v9 }
 0xad4   : > { %v2968_v46 = vmul.f32 0.0625, %v2967_v36 }
 0xad6   : > { %v2972_v57 = vrot.slane %v2968_v46, %v5030_v23 }
 0xad8   : > { %v5728_v10 = vsub.f32 %v2955_v16, %v2972_v57 }
 0xada   : > { %v2974_v59 = vmul.f32 %v5728_v10, %v5728_v10 }
 0xadc   : > { %v2975_v62 = vrot.slane %v2974_v59, 4 }
 0xade   : > { %v2976_v45 = vadd.f32 %v2975_v62, %v2974_v59 }
 0xae0   : > { %v2977_v12 = vrot.slane %v2976_v45, 2 }
 0xae2   : > { %v2978_v41 = vadd.f32 %v2977_v12, %v2976_v45  ;;  %v3831_v12 = vld [vmem:[%s5830_s7 + $0x5] ss:$0 sm:$0xff] }
 0xae4   : > { %v2979_v5 = vrot.slane %v2978_v41, 1 }
 0xae6   : > { %v2980_v32 = vadd.f32 %v2979_v5, %v2978_v41 }
 0xae8   : > { %2983 = vrot.lane.b32.xlu1 %v2980_v32, %s4731_s26  ;;  %2981 = vrot.lane.b32.xlu0 %v2980_v32, %s4730_s25 }
 0xb5a   : > { %v2984_v31 = vpop.permute.xlu1 %2983  ;;  %v2982_v39 = vpop.permute.xlu0 %2981 }
 0xb5b   : > { %v2985_v30 = vsel %vm5024_vm2, %v2982_v39, %v2984_v31 }
 0xb5c   : > { %v2986_v7 = vadd.f32 %v2985_v30, %v2980_v32 }
 0xb5e   : > { %v2987_v42 = vmul.f32 0.0625, %v2986_v7 }
 0xb60   : > { %v2988_v35 = vadd.f32 1e-05, %v2987_v42 }
 0xb62   : > { %4626 = vrsqrt.f32 %v2988_v35 }
 0xb6f   : > { %v4627_v8 = vpop.eup %4626 }
 0xb70   : > { %v2993_v43 = vrot.slane %v4627_v8, %v5030_v23 }
 0xb72   : > { %v2994_v29 = vmul.f32 %v2993_v43, %v5728_v10 }
 0xb74   : > { %v2999_v14 = vmul.f32 %v3805_v44, %v2994_v29 }
 0xb76   : > { %v3004_v56 = vadd.f32 %v3806_v27, %v2999_v14 }
 0xb78   : > { %v3006_v60 = vmul.f32 0.70710677, %v3004_v56  ;;  %v3005_v15 = vmul.f32 0.5, %v3004_v56 }
 0xb7a   : > { %4628 = verf.f32 %v3006_v60 }
 0xb87   : > { %v4629_v6 = vpop.eup %4628 }
 0xb88   : > { %v3008_v13 = vadd.f32 1.0, %v4629_v6 }
 0xb8a   : > { %v3009_v34 = vmul.f32 %v3008_v13, %v3005_v15  ;;  %v3832_v13 = vld [vmem:[%s5830_s7 + $0xb] ss:$0 sm:$0xff] }
 0xb8c   : > { %3012 = vst [vmem:[#allocation6 + $0x1] sm:$0xff] %v3009_v34 }
 0xb93   : > { %v3052_v54 = vld [vmem:[#allocation6 + $0x1] ss:$2 sm:$0xf]  ;;  %v3032_v55 = vld [vmem:[#allocation6] ss:$2 sm:$0xf] }
 0xb94   : > { %v3053_v11 = vpack.c.bf16 %v3052_v54, %v3052_v54  ;;  %v3033_v16 = vpack.c.bf16 %v3032_v55, %v3032_v55  ;;  %v3248_v9 = vld [vmem:[#allocation6 + $0x2] ss:$2 sm:$0xf] }
 0xb95   : > { %v3249_v26 = vpack.c.bf16 %v3248_v9, %v3248_v9 }
 0xb96   : > { %4335 = vmatmul.mubr.bf16.vlgmr.msra.gmra.mxu1 %v3053_v11  ;;  %4355 = vmatmul.mubr.bf16.vlgmr.msra.gmra.mxu0 %v3033_v16 }
 0xb97   : > { %4359 = vmatpush3.bf16.msra.mxu1 %v4550_v4  ;;  %4374 = vmatprep.mubr.msk.bf16.mxu1 %vm4732_vm3, %v4729_v0  ;;  %v3833_v4 = vld [vmem:[%s5830_s7 + $0x11] ss:$0 sm:$0xff] }
 0xb98   : > { %4360 = vmatprep.subr.bf16.mxu1 %v4729_v0 }
 0xb9b   : > { %4361 = vmatpush3.bf16.msra.mxu1 %v4551_v58 }
 0xb9c   : > { %4362 = vmatprep.subr.bf16.mxu1 %v4729_v0 }
 0xb9f   : > { %4363 = vmatpush3.bf16.msra.mxu1 %v4552_v20 }
 0xba0   : > { %4364 = vmatprep.subr.bf16.mxu1 %v4729_v0 }
 0xba3   : > { %4365 = vmatpush3.bf16.msra.mxu1 %v4553_v61 }
 0xba4   : > { %4366 = vmatprep.subr.bf16.mxu1 %v4729_v0 }
 0xba7   : > { %4367 = vmatpush3.bf16.msra.mxu1 %v4554_v22 }
 0xba8   : > { %4368 = vmatprep.subr.bf16.mxu1 %v4729_v0 }
 0xbab   : > { %4369 = vmatpush3.bf16.msra.mxu1 %v4555_v2 }
 0xbac   : > { %4370 = vmatprep.subr.bf16.mxu1 %v4729_v0 }
 0xbaf   : > { %4371 = vmatpush3.bf16.msra.mxu1 %v4556_v24 }
 0xbb0   : > { %4372 = vmatprep.subr.bf16.mxu1 %v4729_v0 }
 0xbb3   : > { %4373 = vmatpush3.bf16.msra.mxu1 %v4557_v25 }
 0xbb6   : > { %4375 = vmatmul.mubr.bf16.vlgmr.msra.gmra.mxu1 %v3249_v26 }
 0xc56   : > { %v3136_v18 = vpop.f32.mrf.mxu1  ;;  %v3224_v33 = vpop.f32.mrf.mxu0 }
 0xc57   : > { %v3225_v45 = vadd.f32 %v3224_v33, %v3136_v18 }
 0xc58   : > { %v4336_v36 = vpop.f32.mrf.mxu1  ;;  %v4356_v46 = vpop.f32.mrf.mxu0 }
 0xc5a   : > { %v3139_v57 = vpop.f32.mrf.mxu1  ;;  %v3227_v10 = vpop.f32.mrf.mxu0 }
 0xc5c   : > { %v4337_v59 = vpop.f32.mrf.mxu1  ;;  %v4357_v62 = vpop.f32.mrf.mxu0 }
 0xc76   : > { %v3332_v41 = vpop.f32.mrf.mxu1 }
 0xc77   : > { %v3338_v5 = vadd.f32 %v3332_v41, %v3225_v45 }
 0xc78   : > { %v4376_v0 = vpop.f32.mrf.mxu1 }
 0xc79   : > { %v3343_v32 = vadd.f32 %v3831_v12, %v3338_v5 }
 0xc7a   : > { %v3335_v48 = vpop.f32.mrf.mxu1 }
 0xc7b   : > { %v3345_v19 = vsel %vm3344_vm4, %v3343_v32, 0.0 }
 0xc7c   : > { %v3346_v49 = vrot.slane %v3345_v19, 4  ;;  %v4377_v50 = vpop.f32.mrf.mxu1 }
 0xc7e   : > { %v3347_v47 = vadd.f32 %v3346_v49, %v3345_v19 }
 0xc80   : > { %v3348_v37 = vrot.slane %v3347_v47, 2 }
 0xc82   : > { %v3349_v51 = vadd.f32 %v3348_v37, %v3347_v47 }
 0xc84   : > { %v3350_v52 = vrot.slane %v3349_v51, 1 }
 0xc86   : > { %v3351_v53 = vadd.f32 %v3350_v52, %v3349_v51 }
 0xc88   : > { %3354 = vrot.lane.b32.xlu1 %v3351_v53, %s4731_s26  ;;  %3352 = vrot.lane.b32.xlu0 %v3351_v53, %s4730_s25 }
 0xcfa   : > { %v3355_v63 = vpop.permute.xlu1 %3354  ;;  %v3353_v21 = vpop.permute.xlu0 %3352 }
 0xcfb   : > { %v3356_v1 = vsel %vm5024_vm2, %v3353_v21, %v3355_v63 }
 0xcfc   : > { %v3357_v3 = vadd.f32 %v3356_v1, %v3351_v53 }
 0xcfe   : > { %v3358_v38 = vmul.f32 0.125, %v3357_v3 }
 0xd00   : > { %v3362_v40 = vrot.slane %v3358_v38, %v5030_v23 }
 0xd02   : > { %v3363_v28 = vsub.f32 %v3343_v32, %v3362_v40 }
 0xd04   : > { %v3364_v31 = vmul.f32 %v3363_v28, %v3363_v28 }
 0xd06   : > { %v3365_v39 = vsel %vm3344_vm4, %v3364_v31, 0.0 }
 0xd07   : > { %v3366_v30 = vrot.slane %v3365_v39, 4 }
 0xd09   : > { %v3367_v7 = vadd.f32 %v3366_v30, %v3365_v39 }
 0xd0b   : > { %v3368_v42 = vrot.slane %v3367_v7, 2 }
 0xd0d   : > { %v3369_v35 = vadd.f32 %v3368_v42, %v3367_v7 }
 0xd0f   : > { %v3370_v8 = vrot.slane %v3369_v35, 1 }
 0xd11   : > { %v3371_v43 = vadd.f32 %v3370_v8, %v3369_v35 }
 0xd13   : > { %3374 = vrot.lane.b32.xlu1 %v3371_v43, %s4731_s26  ;;  %3372 = vrot.lane.b32.xlu0 %v3371_v43, %s4730_s25  ;;  %s4664_s25 = sshll.u32 %s4733_s17, 4  ;;  %s4665_s25 = int_to_ptr.vmem [resolvable:$false] %s4664_s25 }
 0xd14   : > { %s4666_s9 = scalar_lea.vmem %s4665_s25, 128  ;;  %p4667_p11 = scmp.lt.s32.totalorder %s3417_s22, %s4665_s25 }
 0xd15   : > { %p4668_p12 = scmp.lt.s32.totalorder %s4666_s9, %s4660_s13 }
 0xd17   : > { %p4669_p13 = por %p4668_p12, %p4667_p11 }
 0xd19   : > { %p4670_p0 = pnand %p4669_p13, %p4663_p10 }
 0xd85   : > { %v3375_v44 = vpop.permute.xlu1 %3374  ;;  %v3373_v29 = vpop.permute.xlu0 %3372 }
 0xd86   : > { %v3376_v27 = vsel %vm5024_vm2, %v3373_v29, %v3375_v44 }
 0xd87   : > { %v3377_v14 = vadd.f32 %v3376_v27, %v3371_v43 }
 0xd89   : > { %v3378_v56 = vmul.f32 0.125, %v3377_v14 }
 0xd8b   : > { %v3379_v60 = vadd.f32 1e-05, %v3378_v56 }
 0xd8d   : > { %4630 = vrsqrt.f32 %v3379_v60 }
 0xd9a   : > { %v4631_v6 = vpop.eup %4630 }
 0xd9b   : > { %v3384_v15 = vrot.slane %v4631_v6, %v5030_v23 }
 0xd9d   : > { %v3385_v34 = vmul.f32 %v3384_v15, %v3363_v28 }
 0xd9f   : > { %v3390_v54 = vmul.f32 %v3832_v13, %v3385_v34 }
 0xda1   : > { %v3395_v17 = vadd.f32 %v3833_v4, %v3390_v54 }
 0xda3   : > { %v3397_v55 = vmul.f32 0.70710677, %v3395_v17  ;;  %v3396_v23 = vmul.f32 0.5, %v3395_v17 }
 0xda5   : > { %4632 = verf.f32 %v3397_v55 }
 0xdb2   : > { %v4633_v11 = vpop.eup %4632 }
 0xdb3   : > { %v3399_v16 = vadd.f32 1.0, %v4633_v11 }
 0xdb5   : > { %v3400_v58 = vmul.f32 %v3399_v16, %v3396_v23 }
 0xdb7   : > { %3401 = vst [vmem:[%s313_s21] sm:$0xf] %v3400_v58 }
 0xdb8   : > { %4673 = shalt.err (!%p4670_p0)
}
 0xdb9   : > { %s4674_s26 = scalar_lea.hbm %s3414_s10, 64  ;;  %s4678_s20 = scalar_lea.hbm %s5831_s8, 128 }
 0xdba   : > { %p4675_p1 = scmp.ne.s32.totalorder %s3414_s10, %s4674_s26  ;;  %p4679_p4 = scmp.lt.s32.totalorder %s3414_s10, %s5831_s8 }
 0xdbb   : > { %p4680_p7 = scmp.lt.s32.totalorder %s4678_s20, %s4674_s26 }
 0xdbc   : > { %p4676_p2 = pnand %p4675_p1, %p4817_p5 }
 0xdbd   : > { %p4681_p8 = por %p4680_p7, %p4679_p4 }
 0xdbe   : > { %p4677_p3 = pneg %p4676_p2 }
 0xdc0   : > { %p4682_p6 = pnand %p4681_p8, %p4677_p3 }
 0xdc2   : > { %4685 = shalt.err (!%p4682_p6)
}
 0xdc3   : > { %4386 = dma.vmem_to_hbm [thread:$0]  (%p4817_p5), %s3417_s22, 64, %s3414_s10, %s3403_s12  }
 0xdc4 PF: > { %p4398_p9 = scmp.ge.s32.totalorder %s4724_s30, 2  ;;  %s3428_s24 = sand.u32 1, %s4712_s27  }
 0xdc5   : > { %p5837_p10 = scmp.ne.s32.totalorder %s5833_s16, 0  ;;  %s3429_s13 = scalar_lea.sflag [#allocation9], %s3428_s24 }
 0xdc7   : > { %p4393_p11 = pnand %p4398_p9, %p5837_p10 }
 0xdc9   : > { %p4394_p12 = pneg %p4393_p11 }
 0xdcb   : > { %4707 = dma.done.wait (%p4394_p12), %s3429_s13, 64  }
 0xdcc   : > { %4709 = vsyncadd (%p4394_p12), %s3429_s13, 4294967232  ;;  %p19_p13 = scmp.ge.s32.totalorder %s4804_s11, 4   ;;  %s5838_s27 = smov %s4716_s28 }
 0xdcd   : > { %s5839_s28 = smov %s4720_s29  ;;  %s5840_s29 = smov %s4815_s14 }
 0xdce   : > { %s5841_s30 = smov %s4804_s11  ;;  %21 = sbr.rel (!%p19_p13) target bundleno = 4 (0x4), region = 194 }
 0xdd3   :  { %3434 = vsyncpa [#allocation8], 1 }
 0xdd4   :  { %3436 = vsyncpa [#allocation8 + $0x1], 1 }
 0xdd5   :  { %3437 = vsyncpa [#allocation9], 1 }
 0xdd6   :  { %3439 = vsyncpa [#allocation9 + $0x1], 1 }

</bundles_post_ra>
